<compile_context>
chip_gen: v7x
topology: tpu7x:2x2x1
jax: 0.10.0
libtpu: 0.0.40
codegen_flags: <defaults>
</compile_context>

<pallas_src>
import functools
import math

import jax
import jax.numpy as jnp
from jax import lax
from jax.experimental import pallas as pl
from jax.experimental.pallas import tpu as pltpu

# ----------------------------- config (small) -------------------------------
IMG_SIZE = 16
PATCH = 4
IN_CHANS = 4
EMBED = 32
DEPTH = 2
NUM_HEADS = 4
HEAD_DIM = EMBED // NUM_HEADS
MLP_RATIO = 4.0
HIDDEN = int(EMBED * MLP_RATIO)          # 128
NUM_CLASSES = 16
NUM_PATCHES = (IMG_SIZE // PATCH) ** 2   # 16
SEQ = NUM_PATCHES + 1                    # 17 (patches + cls)
NPAD = ((SEQ + 7) // 8) * 8              # 24: sublane-aligned padded sequence
CPP = IN_CHANS * PATCH * PATCH           # 64: flattened patch features

MXU_DTYPE = jnp.bfloat16                 # MXU inputs; accumulation + VPU/EUP in f32
LN_EPS = 1e-5
NEG = -1e30                              # additive mask for padded / cross-image keys
VEC_W = max(128, HIDDEN, 3 * EMBED)      # width of the packed small-vector slab
ROWS_PER_BLOCK = 8                       # packed vector rows per transformer block


# --------------------------- in-kernel helpers -------------------------------
def _mm(a, b):
    """MXU matmul: bf16 inputs, f32 accumulation."""
    return jnp.dot(a.astype(MXU_DTYPE), b.astype(MXU_DTYPE),
                   preferred_element_type=jnp.float32)


def _layernorm(x, g, b):
    mean = jnp.mean(x, axis=-1, keepdims=True)
    xc = x - mean
    var = jnp.mean(xc * xc, axis=-1, keepdims=True)   # biased variance (torch LN)
    return xc * lax.rsqrt(var + LN_EPS) * g + b


def _gelu(x):
    # exact erf GELU, matches torch.nn.GELU() default
    return 0.5 * x * (1.0 + lax.erf(x * (1.0 / math.sqrt(2.0))))


# ------------------------------ fused kernel --------------------------------
def _vit_kernel(patches_ref, base_ref, patch_w_ref, vec_ref,
                qkv_w_ref, proj_w_ref, fc1_w_ref, fc2_w_ref, head_w_ref,
                out_ref, *, bb):
    E, H, D = EMBED, NUM_HEADS, HEAD_DIM
    BN = bb * NPAD                                     # rows handled by this grid step

    def vrow(i, w):
        # (1, w) static slice of the packed bias/LayerNorm slab
        return vec_ref[i:i + 1, 0:w]

    # Additive attention bias, built once: 0 where the key column is a real
    # token of the same image as the query row, else -1e30.
    ri = lax.broadcasted_iota(jnp.int32, (BN, BN), 0)
    ci = lax.broadcasted_iota(jnp.int32, (BN, BN), 1)
    terms = []
    for b in range(bb):
        rows_b = (ri >= b * NPAD) & (ri < (b + 1) * NPAD)
        cols_b = (ci >= b * NPAD) & (ci < b * NPAD + SEQ)
        terms.append(rows_b & cols_b)
    valid = functools.reduce(jnp.logical_or, terms)
    bias = jnp.where(valid, 0.0, NEG).astype(jnp.float32)        # (BN, BN)
    bias_all = jnp.concatenate([bias] * H, axis=0)               # (H*BN, BN)

    # ---- patch embedding (Conv2d k=s=PATCH as matmul) + cls/pos assembly ----
    # base_ref already carries pos_embed + conv bias on patch rows, cls_token +
    # pos_embed[0] on row 16 and zeros on the pad rows, so this is one full
    # lane-dense add (no masked scatter stores).  pos_drop p=0.0 -> identity.
    xs = _mm(patches_ref[...], patch_w_ref[...]) + base_ref[...]  # (BN, E) f32

    # ---- transformer encoder blocks (statically unrolled) --------------------
    for d in range(DEPTH):
        rb = d * ROWS_PER_BLOCK
        # --- attention: LN1 -> qkv -> batched per-head softmax(QK^T)V -> proj ---
        h1 = _layernorm(xs, vrow(rb + 0, E), vrow(rb + 1, E))
        # q columns of qkv_w / qkv_b are pre-scaled by 1/sqrt(D) in the wrapper.
        qkv = _mm(h1, qkv_w_ref[d]) + vrow(rb + 2, 3 * E)         # (BN, 3E)

        # One (BN,D) x (BN,D)^T score matmul per head covering the whole batch
        # block; cross-image and padded-key entries are masked by `bias_all`.
        s_heads = [
            lax.dot_general(qkv[:, h * D:(h + 1) * D].astype(MXU_DTYPE),
                            qkv[:, E + h * D:E + (h + 1) * D].astype(MXU_DTYPE),
                            (((1,), (1,)), ((), ())),
                            preferred_element_type=jnp.float32)
            for h in range(H)]
        scores = jnp.concatenate(s_heads, axis=0) + bias_all      # (H*BN, BN)

        # single stacked softmax across all heads / images of this block
        m = jnp.max(scores, axis=-1, keepdims=True)
        p = jnp.exp(scores - m)
        p = p * pl.reciprocal(jnp.sum(p, axis=-1, keepdims=True), approx=True)

        # per-head (H*BN,BN)x(BN,D) attention-value matmuls, lane-concatenated
        # once into a (BN, E) slab that feeds the proj matmul directly.
        attn = jnp.concatenate(
            [_mm(p[h * BN:(h + 1) * BN, :],
                 qkv[:, 2 * E + h * D:2 * E + (h + 1) * D])
             for h in range(H)], axis=-1)                         # (BN, E)
        # attn_drop / proj_drop are p=0.0 -> identity.
        xs = xs + _mm(attn, proj_w_ref[d]) + vrow(rb + 3, E)

        # --- MLP: LN2 -> fc1 + GELU -> fc2 + fused residual ---
        h2 = _layernorm(xs, vrow(rb + 4, E), vrow(rb + 5, E))
        f = _gelu(_mm(h2, fc1_w_ref[d]) + vrow(rb + 6, HIDDEN))   # (BN, HIDDEN)
        xs = xs + _mm(f, fc2_w_ref[d]) + vrow(rb + 7, E)

    # ---- final LayerNorm on the cls rows only + classification head ---------
    fb = DEPTH * ROWS_PER_BLOCK
    cls_rows = jnp.concatenate(
        [xs[b * NPAD + NUM_PATCHES: b * NPAD + NUM_PATCHES + 1, :]
         for b in range(bb)], axis=0)                             # (bb, E)
    cls_n = _layernorm(cls_rows, vrow(fb + 0, E), vrow(fb + 1, E))
    logits = _mm(cls_n, head_w_ref[...]) + vrow(fb + 2, NUM_CLASSES)
    out_ref[...] = logits.astype(out_ref.dtype)


# ------------------------------ parameters ----------------------------------
def init_params(key):
    """Deterministic init; shapes mirror the PyTorch module.

    Linear weights stored as (in_features, out_features) = torch weight^T.
    Per-block parameters are stacked along a leading DEPTH axis.
    """
    def trunc(k, shape, std=0.02):
        return std * jax.random.truncated_normal(k, -2.0, 2.0, shape, jnp.float32)

    keys = iter(jax.random.split(key, 16))
    return {
        # conv weight (E, C, p, p) flattened to (C*p*p, E)
        "patch_w": trunc(next(keys), (CPP, EMBED)),
        "patch_b": jnp.zeros((1, EMBED), jnp.float32),
        "cls_token": trunc(next(keys), (1, EMBED)),
        "pos_embed": trunc(next(keys), (SEQ, EMBED)),
        # stacked per-block params (DEPTH leading axis)
        "ln1_g": jnp.ones((DEPTH, 1, EMBED), jnp.float32),
        "ln1_b": jnp.zeros((DEPTH, 1, EMBED), jnp.float32),
        "qkv_w": trunc(next(keys), (DEPTH, EMBED, 3 * EMBED)),
        "qkv_b": jnp.zeros((DEPTH, 1, 3 * EMBED), jnp.float32),
        "proj_w": trunc(next(keys), (DEPTH, EMBED, EMBED)),
        "proj_b": jnp.zeros((DEPTH, 1, EMBED), jnp.float32),
        "ln2_g": jnp.ones((DEPTH, 1, EMBED), jnp.float32),
        "ln2_b": jnp.zeros((DEPTH, 1, EMBED), jnp.float32),
        "fc1_w": trunc(next(keys), (DEPTH, EMBED, HIDDEN)),
        "fc1_b": jnp.zeros((DEPTH, 1, HIDDEN), jnp.float32),
        "fc2_w": trunc(next(keys), (DEPTH, HIDDEN, EMBED)),
        "fc2_b": jnp.zeros((DEPTH, 1, EMBED), jnp.float32),
        # final norm + head
        "ln_g": jnp.ones((1, EMBED), jnp.float32),
        "ln_b": jnp.zeros((1, EMBED), jnp.float32),
        "head_w": trunc(next(keys), (EMBED, NUM_CLASSES)),
        "head_b": jnp.zeros((1, NUM_CLASSES), jnp.float32),
    }


# ------------------------------ forward pass --------------------------------
def vit_forward(params, x, batch_blocks=1):
    """x: (B, C, H, W) NCHW float32 -> logits (B, NUM_CLASSES).

    batch_blocks=1 runs the whole model in one grid step (best on single-TC
    v5e/v6e).  On v7x set batch_blocks=2 so the "parallel" grid axis shards the
    batch across both TensorCores (weights are <100 KB, duplicate DMA is free).
    """
    B, Cin, Him, Wim = x.shape
    assert B % batch_blocks == 0
    bb = B // batch_blocks                 # images handled per grid step
    BN = bb * NPAD
    Hp, Wp = Him // PATCH, Wim // PATCH
    scale = HEAD_DIM ** (-0.5)

    # -- patchify + pad each image's 16 token rows to NPAD (layout plumbing) --
    patches = x.reshape(B, Cin, Hp, PATCH, Wp, PATCH)
    patches = patches.transpose(0, 2, 4, 1, 3, 5).reshape(B, Hp * Wp, CPP)
    patches = jnp.pad(patches, ((0, 0), (0, NPAD - NUM_PATCHES), (0, 0)))
    patches = patches.reshape(B * NPAD, CPP)

    # -- per-image base slab: pos+conv-bias rows / cls+pos0 row / zero pad rows --
    base = jnp.concatenate([
        params["pos_embed"][1:] + params["patch_b"],              # patch rows
        params["cls_token"] + params["pos_embed"][0:1],           # cls row (16)
        jnp.zeros((NPAD - SEQ, EMBED), jnp.float32),              # pad rows
    ], axis=0)
    base_full = jnp.tile(base, (bb, 1))                           # (BN, E)

    # -- fold 1/sqrt(head_dim) into the q third of the qkv projection --
    qkv_w = params["qkv_w"].at[:, :, :EMBED].multiply(scale)

    # -- pack every small bias / LayerNorm vector into ONE (rows,128) slab --
    def row(v):
        return jnp.pad(v, (0, VEC_W - v.shape[-1]))
    rows = []
    for d in range(DEPTH):
        qb = params["qkv_b"][d, 0].at[:EMBED].multiply(scale)
        rows += [row(params["ln1_g"][d, 0]), row(params["ln1_b"][d, 0]), row(qb),
                 row(params["proj_b"][d, 0]), row(params["ln2_g"][d, 0]),
                 row(params["ln2_b"][d, 0]), row(params["fc1_b"][d, 0]),
                 row(params["fc2_b"][d, 0])]
    rows += [row(params["ln_g"][0]), row(params["ln_b"][0]), row(params["head_b"][0])]
    vec = jnp.stack(rows, axis=0)
    vec = jnp.pad(vec, ((0, (-vec.shape[0]) % 8), (0, 0)))        # sublane-pad rows

    inputs = (patches, base_full, params["patch_w"], vec,
              qkv_w, params["proj_w"], params["fc1_w"], params["fc2_w"],
              params["head_w"])

    def full_spec(a):
        nd = a.ndim
        return pl.BlockSpec(a.shape, lambda i, _nd=nd: (0,) * _nd)

    in_specs = [pl.BlockSpec((BN, CPP), lambda i: (i, 0))] + \
               [full_spec(a) for a in inputs[1:]]
    # TODO(synk): with batch_blocks>1 the (bb, NUM_CLASSES) output block has a
    # sub-8 sublane extent (masked store); the default batch_blocks=1 path used
    # below writes the full (B, NUM_CLASSES) block.
    out_spec = pl.BlockSpec((bb, NUM_CLASSES), lambda i: (i, 0))

    fused = pl.pallas_call(
        functools.partial(_vit_kernel, bb=bb),
        out_shape=jax.ShapeDtypeStruct((B, NUM_CLASSES), jnp.float32),
        grid=(batch_blocks,),
        in_specs=in_specs,
        out_specs=out_spec,
        compiler_params=pltpu.CompilerParams(
            dimension_semantics=("parallel",)),
    )
    return fused(*inputs)


# ---------------------------------- main -------------------------------------
if __name__ == "__main__":
    key = jax.random.PRNGKey(0)
    kx, kp = jax.random.split(key)
    x = jax.random.normal(kx, (2, IN_CHANS, IMG_SIZE, IMG_SIZE), jnp.float32)
    params = init_params(kp)

    fwd = jax.jit(vit_forward)            # batch_blocks defaults to 1 -> grid=(1,)
    logits = fwd(params, x)
    jax.block_until_ready(logits)
    assert logits.shape == (2, NUM_CLASSES)
    assert bool(jnp.all(jnp.isfinite(logits)))
    print("KERNEL_OK")
</pallas_src>

<mosaic_0001>
module attributes {stable_mosaic.version = 11 : i64} {
  func.func @_vit_kernel(%arg0: i32, %arg1: memref<48x64xf32, #tpu.memory_space<vmem>>, %arg2: memref<48x32xf32, #tpu.memory_space<vmem>>, %arg3: memref<64x32xf32, #tpu.memory_space<vmem>>, %arg4: memref<24x128xf32, #tpu.memory_space<vmem>>, %arg5: memref<2x32x96xf32, #tpu.memory_space<vmem>>, %arg6: memref<2x32x32xf32, #tpu.memory_space<vmem>>, %arg7: memref<2x32x128xf32, #tpu.memory_space<vmem>>, %arg8: memref<2x128x32xf32, #tpu.memory_space<vmem>>, %arg9: memref<32x16xf32, #tpu.memory_space<vmem>>, %arg10: memref<2x16xf32, #tpu.memory_space<vmem>>) attributes {dimension_semantics = [#tpu.dimension_semantics<parallel>], iteration_bounds = array<i64: 1>, scalar_prefetch = 0 : i64, scratch_operands = 0 : i64, tpu.core_type = #tpu.core_type<tc>, window_params = [{transform_indices = @transform_0, window_bounds = array<i64: 48, 64>}, {pipeline_mode = #tpu.pipeline_mode<synchronous>, transform_indices = @transform_1, window_bounds = array<i64: 48, 32>}, {pipeline_mode = #tpu.pipeline_mode<synchronous>, transform_indices = @transform_2, window_bounds = array<i64: 64, 32>}, {pipeline_mode = #tpu.pipeline_mode<synchronous>, transform_indices = @transform_3, window_bounds = array<i64: 24, 128>}, {pipeline_mode = #tpu.pipeline_mode<synchronous>, transform_indices = @transform_4, window_bounds = array<i64: 2, 32, 96>}, {pipeline_mode = #tpu.pipeline_mode<synchronous>, transform_indices = @transform_5, window_bounds = array<i64: 2, 32, 32>}, {pipeline_mode = #tpu.pipeline_mode<synchronous>, transform_indices = @transform_6, window_bounds = array<i64: 2, 32, 128>}, {pipeline_mode = #tpu.pipeline_mode<synchronous>, transform_indices = @transform_7, window_bounds = array<i64: 2, 128, 32>}, {pipeline_mode = #tpu.pipeline_mode<synchronous>, transform_indices = @transform_8, window_bounds = array<i64: 32, 16>}, {transform_indices = @transform_9, window_bounds = array<i64: 2, 16>}]} {
    %0 = tpu.iota {dimensions = array<i32: 0>} : vector<48x48xi32>
    %1 = tpu.iota {dimensions = array<i32: 1>} : vector<48x48xi32>
    %c0_i32 = arith.constant 0 : i32
    %2 = vector.broadcast %c0_i32 : i32 to vector<48x48xi32>
    %3 = arith.cmpi sge, %0, %2 : vector<48x48xi32>
    %c24_i32 = arith.constant 24 : i32
    %4 = vector.broadcast %c24_i32 : i32 to vector<48x48xi32>
    %5 = arith.cmpi slt, %0, %4 : vector<48x48xi32>
    %6 = arith.andi %3, %5 : vector<48x48xi1>
    %c0_i32_0 = arith.constant 0 : i32
    %7 = vector.broadcast %c0_i32_0 : i32 to vector<48x48xi32>
    %8 = arith.cmpi sge, %1, %7 : vector<48x48xi32>
    %c17_i32 = arith.constant 17 : i32
    %9 = vector.broadcast %c17_i32 : i32 to vector<48x48xi32>
    %10 = arith.cmpi slt, %1, %9 : vector<48x48xi32>
    %11 = arith.andi %8, %10 : vector<48x48xi1>
    %12 = arith.andi %6, %11 : vector<48x48xi1>
    %c24_i32_1 = arith.constant 24 : i32
    %13 = vector.broadcast %c24_i32_1 : i32 to vector<48x48xi32>
    %14 = arith.cmpi sge, %0, %13 : vector<48x48xi32>
    %c48_i32 = arith.constant 48 : i32
    %15 = vector.broadcast %c48_i32 : i32 to vector<48x48xi32>
    %16 = arith.cmpi slt, %0, %15 : vector<48x48xi32>
    %17 = arith.andi %14, %16 : vector<48x48xi1>
    %c24_i32_2 = arith.constant 24 : i32
    %18 = vector.broadcast %c24_i32_2 : i32 to vector<48x48xi32>
    %19 = arith.cmpi sge, %1, %18 : vector<48x48xi32>
    %c41_i32 = arith.constant 41 : i32
    %20 = vector.broadcast %c41_i32 : i32 to vector<48x48xi32>
    %21 = arith.cmpi slt, %1, %20 : vector<48x48xi32>
    %22 = arith.andi %19, %21 : vector<48x48xi1>
    %23 = arith.andi %17, %22 : vector<48x48xi1>
    %24 = arith.ori %12, %23 : vector<48x48xi1>
    %cst = arith.constant 0.000000e+00 : f32
    %cst_3 = arith.constant -1.000000e+30 : f32
    %25 = vector.broadcast %cst : f32 to vector<48x48xf32>
    %26 = vector.broadcast %cst_3 : f32 to vector<48x48xf32>
    %27 = arith.select %24, %25, %26 : vector<48x48xi1>, vector<48x48xf32>
    %28 = tpu.concatenate %27, %27, %27, %27 in 0 : vector<48x48xf32>, vector<48x48xf32>, vector<48x48xf32>, vector<48x48xf32> -> vector<192x48xf32>
    %c0 = arith.constant 0 : index
    %c0_4 = arith.constant 0 : index
    %29 = vector.load %arg1[%c0, %c0_4] : memref<48x64xf32, #tpu.memory_space<vmem>>, vector<48x64xf32>
    %c0_5 = arith.constant 0 : index
    %c0_6 = arith.constant 0 : index
    %30 = vector.load %arg3[%c0_5, %c0_6] : memref<64x32xf32, #tpu.memory_space<vmem>>, vector<64x32xf32>
    %31 = arith.truncf %29 : vector<48x64xf32> to vector<48x64xbf16>
    %32 = arith.truncf %30 : vector<64x32xf32> to vector<64x32xbf16>
    %cst_7 = arith.constant dense<0.000000e+00> : vector<48x32xf32>
    %33 = tpu.matmul %31, %32, %cst_7 {dimension_numbers = #tpu.dot_dimension_numbers<[1], [0], [0], [1], [0, 0, 1, 1], [], []>} : vector<48x64xbf16>, vector<64x32xbf16>, vector<48x32xf32> -> vector<48x32xf32>
    %c0_8 = arith.constant 0 : index
    %c0_9 = arith.constant 0 : index
    %34 = vector.load %arg2[%c0_8, %c0_9] : memref<48x32xf32, #tpu.memory_space<vmem>>, vector<48x32xf32>
    %35 = arith.addf %33, %34 : vector<48x32xf32>
    %c0_10 = arith.constant 0 : index
    %c0_11 = arith.constant 0 : index
    %36 = vector.load %arg4[%c0_10, %c0_11] : memref<24x128xf32, #tpu.memory_space<vmem>>, vector<1x32xf32>
    %c1 = arith.constant 1 : index
    %c0_12 = arith.constant 0 : index
    %37 = vector.load %arg4[%c1, %c0_12] : memref<24x128xf32, #tpu.memory_space<vmem>>, vector<1x32xf32>
    %cst_13 = arith.constant dense<0.000000e+00> : vector<48xf32>
    %38 = vector.multi_reduction <add>, %35, %cst_13 [1] : vector<48x32xf32> to vector<48xf32>
    %39 = vector.shape_cast %38 : vector<48xf32> to vector<48x1xf32>
    %cst_14 = arith.constant 3.200000e+01 : f32
    %40 = vector.broadcast %cst_14 : f32 to vector<48x1xf32>
    %41 = arith.divf %39, %40 : vector<48x1xf32>
    %42 = vector.broadcast %41 : vector<48x1xf32> to vector<48x32xf32>
    %43 = arith.subf %35, %42 : vector<48x32xf32>
    %44 = arith.mulf %43, %43 : vector<48x32xf32>
    %cst_15 = arith.constant dense<0.000000e+00> : vector<48xf32>
    %45 = vector.multi_reduction <add>, %44, %cst_15 [1] : vector<48x32xf32> to vector<48xf32>
    %46 = vector.shape_cast %45 : vector<48xf32> to vector<48x1xf32>
    %cst_16 = arith.constant 3.200000e+01 : f32
    %47 = vector.broadcast %cst_16 : f32 to vector<48x1xf32>
    %48 = arith.divf %46, %47 : vector<48x1xf32>
    %cst_17 = arith.constant 9.99999974E-6 : f32
    %49 = vector.broadcast %cst_17 : f32 to vector<48x1xf32>
    %50 = arith.addf %48, %49 : vector<48x1xf32>
    %51 = math.rsqrt %50 : vector<48x1xf32>
    %52 = vector.broadcast %51 : vector<48x1xf32> to vector<48x32xf32>
    %53 = arith.mulf %43, %52 : vector<48x32xf32>
    %54 = vector.broadcast %36 : vector<1x32xf32> to vector<48x32xf32>
    %55 = arith.mulf %53, %54 : vector<48x32xf32>
    %56 = vector.broadcast %37 : vector<1x32xf32> to vector<48x32xf32>
    %57 = arith.addf %55, %56 : vector<48x32xf32>
    %c0_18 = arith.constant 0 : index
    %c0_19 = arith.constant 0 : index
    %c0_20 = arith.constant 0 : index
    %58 = vector.load %arg5[%c0_18, %c0_19, %c0_20] : memref<2x32x96xf32, #tpu.memory_space<vmem>>, vector<1x32x96xf32>
    %59 = vector.shape_cast %58 : vector<1x32x96xf32> to vector<32x96xf32>
    %60 = arith.truncf %57 : vector<48x32xf32> to vector<48x32xbf16>
    %61 = arith.truncf %59 : vector<32x96xf32> to vector<32x96xbf16>
    %cst_21 = arith.constant dense<0.000000e+00> : vector<48x96xf32>
    %62 = tpu.matmul %60, %61, %cst_21 {dimension_numbers = #tpu.dot_dimension_numbers<[1], [0], [0], [1], [0, 0, 1, 1], [], []>} : vector<48x32xbf16>, vector<32x96xbf16>, vector<48x96xf32> -> vector<48x96xf32>
    %c2 = arith.constant 2 : index
    %c0_22 = arith.constant 0 : index
    %63 = vector.load %arg4[%c2, %c0_22] : memref<24x128xf32, #tpu.memory_space<vmem>>, vector<1x96xf32>
    %64 = vector.broadcast %63 : vector<1x96xf32> to vector<48x96xf32>
    %65 = arith.addf %62, %64 : vector<48x96xf32>
    %66 = vector.extract_strided_slice %65 {offsets = [0, 0], sizes = [48, 8], strides = [1, 1]} : vector<48x96xf32> to vector<48x8xf32>
    %67 = arith.truncf %66 : vector<48x8xf32> to vector<48x8xbf16>
    %68 = vector.extract_strided_slice %65 {offsets = [0, 32], sizes = [48, 8], strides = [1, 1]} : vector<48x96xf32> to vector<48x8xf32>
    %69 = arith.truncf %68 : vector<48x8xf32> to vector<48x8xbf16>
    %cst_23 = arith.constant dense<0.000000e+00> : vector<48x48xf32>
    %70 = tpu.matmul %67, %69, %cst_23 {dimension_numbers = #tpu.dot_dimension_numbers<[1], [1], [0], [0], [0, 0, 1, 0], [], []>} : vector<48x8xbf16>, vector<48x8xbf16>, vector<48x48xf32> -> vector<48x48xf32>
    %71 = vector.extract_strided_slice %65 {offsets = [0, 8], sizes = [48, 8], strides = [1, 1]} : vector<48x96xf32> to vector<48x8xf32>
    %72 = arith.truncf %71 : vector<48x8xf32> to vector<48x8xbf16>
    %73 = vector.extract_strided_slice %65 {offsets = [0, 40], sizes = [48, 8], strides = [1, 1]} : vector<48x96xf32> to vector<48x8xf32>
    %74 = arith.truncf %73 : vector<48x8xf32> to vector<48x8xbf16>
    %cst_24 = arith.constant dense<0.000000e+00> : vector<48x48xf32>
    %75 = tpu.matmul %72, %74, %cst_24 {dimension_numbers = #tpu.dot_dimension_numbers<[1], [1], [0], [0], [0, 0, 1, 0], [], []>} : vector<48x8xbf16>, vector<48x8xbf16>, vector<48x48xf32> -> vector<48x48xf32>
    %76 = vector.extract_strided_slice %65 {offsets = [0, 16], sizes = [48, 8], strides = [1, 1]} : vector<48x96xf32> to vector<48x8xf32>
    %77 = arith.truncf %76 : vector<48x8xf32> to vector<48x8xbf16>
    %78 = vector.extract_strided_slice %65 {offsets = [0, 48], sizes = [48, 8], strides = [1, 1]} : vector<48x96xf32> to vector<48x8xf32>
    %79 = arith.truncf %78 : vector<48x8xf32> to vector<48x8xbf16>
    %cst_25 = arith.constant dense<0.000000e+00> : vector<48x48xf32>
    %80 = tpu.matmul %77, %79, %cst_25 {dimension_numbers = #tpu.dot_dimension_numbers<[1], [1], [0], [0], [0, 0, 1, 0], [], []>} : vector<48x8xbf16>, vector<48x8xbf16>, vector<48x48xf32> -> vector<48x48xf32>
    %81 = vector.extract_strided_slice %65 {offsets = [0, 24], sizes = [48, 8], strides = [1, 1]} : vector<48x96xf32> to vector<48x8xf32>
    %82 = arith.truncf %81 : vector<48x8xf32> to vector<48x8xbf16>
    %83 = vector.extract_strided_slice %65 {offsets = [0, 56], sizes = [48, 8], strides = [1, 1]} : vector<48x96xf32> to vector<48x8xf32>
    %84 = arith.truncf %83 : vector<48x8xf32> to vector<48x8xbf16>
    %cst_26 = arith.constant dense<0.000000e+00> : vector<48x48xf32>
    %85 = tpu.matmul %82, %84, %cst_26 {dimension_numbers = #tpu.dot_dimension_numbers<[1], [1], [0], [0], [0, 0, 1, 0], [], []>} : vector<48x8xbf16>, vector<48x8xbf16>, vector<48x48xf32> -> vector<48x48xf32>
    %86 = tpu.concatenate %70, %75, %80, %85 in 0 : vector<48x48xf32>, vector<48x48xf32>, vector<48x48xf32>, vector<48x48xf32> -> vector<192x48xf32>
    %87 = arith.addf %86, %28 : vector<192x48xf32>
    %cst_27 = arith.constant dense<0xFF800000> : vector<192xf32>
    %88 = vector.multi_reduction <maximumf>, %87, %cst_27 [1] : vector<192x48xf32> to vector<192xf32>
    %89 = vector.shape_cast %88 : vector<192xf32> to vector<192x1xf32>
    %90 = vector.broadcast %89 : vector<192x1xf32> to vector<192x48xf32>
    %91 = arith.subf %87, %90 : vector<192x48xf32>
    %92 = math.exp %91 : vector<192x48xf32>
    %cst_28 = arith.constant dense<0.000000e+00> : vector<192xf32>
    %93 = vector.multi_reduction <add>, %92, %cst_28 [1] : vector<192x48xf32> to vector<192xf32>
    %94 = vector.shape_cast %93 : vector<192xf32> to vector<192x1xf32>
    %95 = tpu.reciprocal %94 {approx = true} : vector<192x1xf32> -> vector<192x1xf32>
    %96 = vector.broadcast %95 : vector<192x1xf32> to vector<192x48xf32>
    %97 = arith.mulf %92, %96 : vector<192x48xf32>
    %98 = vector.extract_strided_slice %97 {offsets = [0, 0], sizes = [48, 48], strides = [1, 1]} : vector<192x48xf32> to vector<48x48xf32>
    %99 = vector.extract_strided_slice %65 {offsets = [0, 64], sizes = [48, 8], strides = [1, 1]} : vector<48x96xf32> to vector<48x8xf32>
    %100 = arith.truncf %98 : vector<48x48xf32> to vector<48x48xbf16>
    %101 = arith.truncf %99 : vector<48x8xf32> to vector<48x8xbf16>
    %cst_29 = arith.constant dense<0.000000e+00> : vector<48x8xf32>
    %102 = tpu.matmul %100, %101, %cst_29 {dimension_numbers = #tpu.dot_dimension_numbers<[1], [0], [0], [1], [0, 0, 1, 1], [], []>} : vector<48x48xbf16>, vector<48x8xbf16>, vector<48x8xf32> -> vector<48x8xf32>
    %103 = vector.extract_strided_slice %97 {offsets = [48, 0], sizes = [48, 48], strides = [1, 1]} : vector<192x48xf32> to vector<48x48xf32>
    %104 = vector.extract_strided_slice %65 {offsets = [0, 72], sizes = [48, 8], strides = [1, 1]} : vector<48x96xf32> to vector<48x8xf32>
    %105 = arith.truncf %103 : vector<48x48xf32> to vector<48x48xbf16>
    %106 = arith.truncf %104 : vector<48x8xf32> to vector<48x8xbf16>
    %cst_30 = arith.constant dense<0.000000e+00> : vector<48x8xf32>
    %107 = tpu.matmul %105, %106, %cst_30 {dimension_numbers = #tpu.dot_dimension_numbers<[1], [0], [0], [1], [0, 0, 1, 1], [], []>} : vector<48x48xbf16>, vector<48x8xbf16>, vector<48x8xf32> -> vector<48x8xf32>
    %108 = vector.extract_strided_slice %97 {offsets = [96, 0], sizes = [48, 48], strides = [1, 1]} : vector<192x48xf32> to vector<48x48xf32>
    %109 = vector.extract_strided_slice %65 {offsets = [0, 80], sizes = [48, 8], strides = [1, 1]} : vector<48x96xf32> to vector<48x8xf32>
    %110 = arith.truncf %108 : vector<48x48xf32> to vector<48x48xbf16>
    %111 = arith.truncf %109 : vector<48x8xf32> to vector<48x8xbf16>
    %cst_31 = arith.constant dense<0.000000e+00> : vector<48x8xf32>
    %112 = tpu.matmul %110, %111, %cst_31 {dimension_numbers = #tpu.dot_dimension_numbers<[1], [0], [0], [1], [0, 0, 1, 1], [], []>} : vector<48x48xbf16>, vector<48x8xbf16>, vector<48x8xf32> -> vector<48x8xf32>
    %113 = vector.extract_strided_slice %97 {offsets = [144, 0], sizes = [48, 48], strides = [1, 1]} : vector<192x48xf32> to vector<48x48xf32>
    %114 = vector.extract_strided_slice %65 {offsets = [0, 88], sizes = [48, 8], strides = [1, 1]} : vector<48x96xf32> to vector<48x8xf32>
    %115 = arith.truncf %113 : vector<48x48xf32> to vector<48x48xbf16>
    %116 = arith.truncf %114 : vector<48x8xf32> to vector<48x8xbf16>
    %cst_32 = arith.constant dense<0.000000e+00> : vector<48x8xf32>
    %117 = tpu.matmul %115, %116, %cst_32 {dimension_numbers = #tpu.dot_dimension_numbers<[1], [0], [0], [1], [0, 0, 1, 1], [], []>} : vector<48x48xbf16>, vector<48x8xbf16>, vector<48x8xf32> -> vector<48x8xf32>
    %118 = tpu.concatenate %102, %107, %112, %117 in 1 : vector<48x8xf32>, vector<48x8xf32>, vector<48x8xf32>, vector<48x8xf32> -> vector<48x32xf32>
    %c0_33 = arith.constant 0 : index
    %c0_34 = arith.constant 0 : index
    %c0_35 = arith.constant 0 : index
    %119 = vector.load %arg6[%c0_33, %c0_34, %c0_35] : memref<2x32x32xf32, #tpu.memory_space<vmem>>, vector<1x32x32xf32>
    %120 = vector.shape_cast %119 : vector<1x32x32xf32> to vector<32x32xf32>
    %121 = arith.truncf %118 : vector<48x32xf32> to vector<48x32xbf16>
    %122 = arith.truncf %120 : vector<32x32xf32> to vector<32x32xbf16>
    %cst_36 = arith.constant dense<0.000000e+00> : vector<48x32xf32>
    %123 = tpu.matmul %121, %122, %cst_36 {dimension_numbers = #tpu.dot_dimension_numbers<[1], [0], [0], [1], [0, 0, 1, 1], [], []>} : vector<48x32xbf16>, vector<32x32xbf16>, vector<48x32xf32> -> vector<48x32xf32>
    %124 = arith.addf %35, %123 : vector<48x32xf32>
    %c3 = arith.constant 3 : index
    %c0_37 = arith.constant 0 : index
    %125 = vector.load %arg4[%c3, %c0_37] : memref<24x128xf32, #tpu.memory_space<vmem>>, vector<1x32xf32>
    %126 = vector.broadcast %125 : vector<1x32xf32> to vector<48x32xf32>
    %127 = arith.addf %124, %126 : vector<48x32xf32>
    %c4 = arith.constant 4 : index
    %c0_38 = arith.constant 0 : index
    %128 = vector.load %arg4[%c4, %c0_38] : memref<24x128xf32, #tpu.memory_space<vmem>>, vector<1x32xf32>
    %c5 = arith.constant 5 : index
    %c0_39 = arith.constant 0 : index
    %129 = vector.load %arg4[%c5, %c0_39] : memref<24x128xf32, #tpu.memory_space<vmem>>, vector<1x32xf32>
    %cst_40 = arith.constant dense<0.000000e+00> : vector<48xf32>
    %130 = vector.multi_reduction <add>, %127, %cst_40 [1] : vector<48x32xf32> to vector<48xf32>
    %131 = vector.shape_cast %130 : vector<48xf32> to vector<48x1xf32>
    %cst_41 = arith.constant 3.200000e+01 : f32
    %132 = vector.broadcast %cst_41 : f32 to vector<48x1xf32>
    %133 = arith.divf %131, %132 : vector<48x1xf32>
    %134 = vector.broadcast %133 : vector<48x1xf32> to vector<48x32xf32>
    %135 = arith.subf %127, %134 : vector<48x32xf32>
    %136 = arith.mulf %135, %135 : vector<48x32xf32>
    %cst_42 = arith.constant dense<0.000000e+00> : vector<48xf32>
    %137 = vector.multi_reduction <add>, %136, %cst_42 [1] : vector<48x32xf32> to vector<48xf32>
    %138 = vector.shape_cast %137 : vector<48xf32> to vector<48x1xf32>
    %cst_43 = arith.constant 3.200000e+01 : f32
    %139 = vector.broadcast %cst_43 : f32 to vector<48x1xf32>
    %140 = arith.divf %138, %139 : vector<48x1xf32>
    %cst_44 = arith.constant 9.99999974E-6 : f32
    %141 = vector.broadcast %cst_44 : f32 to vector<48x1xf32>
    %142 = arith.addf %140, %141 : vector<48x1xf32>
    %143 = math.rsqrt %142 : vector<48x1xf32>
    %144 = vector.broadcast %143 : vector<48x1xf32> to vector<48x32xf32>
    %145 = arith.mulf %135, %144 : vector<48x32xf32>
    %146 = vector.broadcast %128 : vector<1x32xf32> to vector<48x32xf32>
    %147 = arith.mulf %145, %146 : vector<48x32xf32>
    %148 = vector.broadcast %129 : vector<1x32xf32> to vector<48x32xf32>
    %149 = arith.addf %147, %148 : vector<48x32xf32>
    %c0_45 = arith.constant 0 : index
    %c0_46 = arith.constant 0 : index
    %c0_47 = arith.constant 0 : index
    %150 = vector.load %arg7[%c0_45, %c0_46, %c0_47] : memref<2x32x128xf32, #tpu.memory_space<vmem>>, vector<1x32x128xf32>
    %151 = vector.shape_cast %150 : vector<1x32x128xf32> to vector<32x128xf32>
    %152 = arith.truncf %149 : vector<48x32xf32> to vector<48x32xbf16>
    %153 = arith.truncf %151 : vector<32x128xf32> to vector<32x128xbf16>
    %cst_48 = arith.constant dense<0.000000e+00> : vector<48x128xf32>
    %154 = tpu.matmul %152, %153, %cst_48 {dimension_numbers = #tpu.dot_dimension_numbers<[1], [0], [0], [1], [0, 0, 1, 1], [], []>} : vector<48x32xbf16>, vector<32x128xbf16>, vector<48x128xf32> -> vector<48x128xf32>
    %c6 = arith.constant 6 : index
    %c0_49 = arith.constant 0 : index
    %155 = vector.load %arg4[%c6, %c0_49] : memref<24x128xf32, #tpu.memory_space<vmem>>, vector<1x128xf32>
    %156 = vector.broadcast %155 : vector<1x128xf32> to vector<48x128xf32>
    %157 = arith.addf %154, %156 : vector<48x128xf32>
    %cst_50 = arith.constant 5.000000e-01 : f32
    %158 = vector.broadcast %cst_50 : f32 to vector<48x128xf32>
    %159 = arith.mulf %158, %157 : vector<48x128xf32>
    %cst_51 = arith.constant 0.707106769 : f32
    %160 = vector.broadcast %cst_51 : f32 to vector<48x128xf32>
    %161 = arith.mulf %157, %160 : vector<48x128xf32>
    %162 = math.erf %161 : vector<48x128xf32>
    %cst_52 = arith.constant 1.000000e+00 : f32
    %163 = vector.broadcast %cst_52 : f32 to vector<48x128xf32>
    %164 = arith.addf %163, %162 : vector<48x128xf32>
    %165 = arith.mulf %159, %164 : vector<48x128xf32>
    %c0_53 = arith.constant 0 : index
    %c0_54 = arith.constant 0 : index
    %c0_55 = arith.constant 0 : index
    %166 = vector.load %arg8[%c0_53, %c0_54, %c0_55] : memref<2x128x32xf32, #tpu.memory_space<vmem>>, vector<1x128x32xf32>
    %167 = vector.shape_cast %166 : vector<1x128x32xf32> to vector<128x32xf32>
    %168 = arith.truncf %165 : vector<48x128xf32> to vector<48x128xbf16>
    %169 = arith.truncf %167 : vector<128x32xf32> to vector<128x32xbf16>
    %cst_56 = arith.constant dense<0.000000e+00> : vector<48x32xf32>
    %170 = tpu.matmul %168, %169, %cst_56 {dimension_numbers = #tpu.dot_dimension_numbers<[1], [0], [0], [1], [0, 0, 1, 1], [], []>} : vector<48x128xbf16>, vector<128x32xbf16>, vector<48x32xf32> -> vector<48x32xf32>
    %171 = arith.addf %127, %170 : vector<48x32xf32>
    %c7 = arith.constant 7 : index
    %c0_57 = arith.constant 0 : index
    %172 = vector.load %arg4[%c7, %c0_57] : memref<24x128xf32, #tpu.memory_space<vmem>>, vector<1x32xf32>
    %173 = vector.broadcast %172 : vector<1x32xf32> to vector<48x32xf32>
    %174 = arith.addf %171, %173 : vector<48x32xf32>
    %c8 = arith.constant 8 : index
    %c0_58 = arith.constant 0 : index
    %175 = vector.load %arg4[%c8, %c0_58] : memref<24x128xf32, #tpu.memory_space<vmem>>, vector<1x32xf32>
    %c9 = arith.constant 9 : index
    %c0_59 = arith.constant 0 : index
    %176 = vector.load %arg4[%c9, %c0_59] : memref<24x128xf32, #tpu.memory_space<vmem>>, vector<1x32xf32>
    %cst_60 = arith.constant dense<0.000000e+00> : vector<48xf32>
    %177 = vector.multi_reduction <add>, %174, %cst_60 [1] : vector<48x32xf32> to vector<48xf32>
    %178 = vector.shape_cast %177 : vector<48xf32> to vector<48x1xf32>
    %cst_61 = arith.constant 3.200000e+01 : f32
    %179 = vector.broadcast %cst_61 : f32 to vector<48x1xf32>
    %180 = arith.divf %178, %179 : vector<48x1xf32>
    %181 = vector.broadcast %180 : vector<48x1xf32> to vector<48x32xf32>
    %182 = arith.subf %174, %181 : vector<48x32xf32>
    %183 = arith.mulf %182, %182 : vector<48x32xf32>
    %cst_62 = arith.constant dense<0.000000e+00> : vector<48xf32>
    %184 = vector.multi_reduction <add>, %183, %cst_62 [1] : vector<48x32xf32> to vector<48xf32>
    %185 = vector.shape_cast %184 : vector<48xf32> to vector<48x1xf32>
    %cst_63 = arith.constant 3.200000e+01 : f32
    %186 = vector.broadcast %cst_63 : f32 to vector<48x1xf32>
    %187 = arith.divf %185, %186 : vector<48x1xf32>
    %cst_64 = arith.constant 9.99999974E-6 : f32
    %188 = vector.broadcast %cst_64 : f32 to vector<48x1xf32>
    %189 = arith.addf %187, %188 : vector<48x1xf32>
    %190 = math.rsqrt %189 : vector<48x1xf32>
    %191 = vector.broadcast %190 : vector<48x1xf32> to vector<48x32xf32>
    %192 = arith.mulf %182, %191 : vector<48x32xf32>
    %193 = vector.broadcast %175 : vector<1x32xf32> to vector<48x32xf32>
    %194 = arith.mulf %192, %193 : vector<48x32xf32>
    %195 = vector.broadcast %176 : vector<1x32xf32> to vector<48x32xf32>
    %196 = arith.addf %194, %195 : vector<48x32xf32>
    %c1_65 = arith.constant 1 : index
    %c0_66 = arith.constant 0 : index
    %c0_67 = arith.constant 0 : index
    %197 = vector.load %arg5[%c1_65, %c0_66, %c0_67] : memref<2x32x96xf32, #tpu.memory_space<vmem>>, vector<1x32x96xf32>
    %198 = vector.shape_cast %197 : vector<1x32x96xf32> to vector<32x96xf32>
    %199 = arith.truncf %196 : vector<48x32xf32> to vector<48x32xbf16>
    %200 = arith.truncf %198 : vector<32x96xf32> to vector<32x96xbf16>
    %cst_68 = arith.constant dense<0.000000e+00> : vector<48x96xf32>
    %201 = tpu.matmul %199, %200, %cst_68 {dimension_numbers = #tpu.dot_dimension_numbers<[1], [0], [0], [1], [0, 0, 1, 1], [], []>} : vector<48x32xbf16>, vector<32x96xbf16>, vector<48x96xf32> -> vector<48x96xf32>
    %c10 = arith.constant 10 : index
    %c0_69 = arith.constant 0 : index
    %202 = vector.load %arg4[%c10, %c0_69] : memref<24x128xf32, #tpu.memory_space<vmem>>, vector<1x96xf32>
    %203 = vector.broadcast %202 : vector<1x96xf32> to vector<48x96xf32>
    %204 = arith.addf %201, %203 : vector<48x96xf32>
    %205 = vector.extract_strided_slice %204 {offsets = [0, 0], sizes = [48, 8], strides = [1, 1]} : vector<48x96xf32> to vector<48x8xf32>
    %206 = arith.truncf %205 : vector<48x8xf32> to vector<48x8xbf16>
    %207 = vector.extract_strided_slice %204 {offsets = [0, 32], sizes = [48, 8], strides = [1, 1]} : vector<48x96xf32> to vector<48x8xf32>
    %208 = arith.truncf %207 : vector<48x8xf32> to vector<48x8xbf16>
    %cst_70 = arith.constant dense<0.000000e+00> : vector<48x48xf32>
    %209 = tpu.matmul %206, %208, %cst_70 {dimension_numbers = #tpu.dot_dimension_numbers<[1], [1], [0], [0], [0, 0, 1, 0], [], []>} : vector<48x8xbf16>, vector<48x8xbf16>, vector<48x48xf32> -> vector<48x48xf32>
    %210 = vector.extract_strided_slice %204 {offsets = [0, 8], sizes = [48, 8], strides = [1, 1]} : vector<48x96xf32> to vector<48x8xf32>
    %211 = arith.truncf %210 : vector<48x8xf32> to vector<48x8xbf16>
    %212 = vector.extract_strided_slice %204 {offsets = [0, 40], sizes = [48, 8], strides = [1, 1]} : vector<48x96xf32> to vector<48x8xf32>
    %213 = arith.truncf %212 : vector<48x8xf32> to vector<48x8xbf16>
    %cst_71 = arith.constant dense<0.000000e+00> : vector<48x48xf32>
    %214 = tpu.matmul %211, %213, %cst_71 {dimension_numbers = #tpu.dot_dimension_numbers<[1], [1], [0], [0], [0, 0, 1, 0], [], []>} : vector<48x8xbf16>, vector<48x8xbf16>, vector<48x48xf32> -> vector<48x48xf32>
    %215 = vector.extract_strided_slice %204 {offsets = [0, 16], sizes = [48, 8], strides = [1, 1]} : vector<48x96xf32> to vector<48x8xf32>
    %216 = arith.truncf %215 : vector<48x8xf32> to vector<48x8xbf16>
    %217 = vector.extract_strided_slice %204 {offsets = [0, 48], sizes = [48, 8], strides = [1, 1]} : vector<48x96xf32> to vector<48x8xf32>
    %218 = arith.truncf %217 : vector<48x8xf32> to vector<48x8xbf16>
    %cst_72 = arith.constant dense<0.000000e+00> : vector<48x48xf32>
    %219 = tpu.matmul %216, %218, %cst_72 {dimension_numbers = #tpu.dot_dimension_numbers<[1], [1], [0], [0], [0, 0, 1, 0], [], []>} : vector<48x8xbf16>, vector<48x8xbf16>, vector<48x48xf32> -> vector<48x48xf32>
    %220 = vector.extract_strided_slice %204 {offsets = [0, 24], sizes = [48, 8], strides = [1, 1]} : vector<48x96xf32> to vector<48x8xf32>
    %221 = arith.truncf %220 : vector<48x8xf32> to vector<48x8xbf16>
    %222 = vector.extract_strided_slice %204 {offsets = [0, 56], sizes = [48, 8], strides = [1, 1]} : vector<48x96xf32> to vector<48x8xf32>
    %223 = arith.truncf %222 : vector<48x8xf32> to vector<48x8xbf16>
    %cst_73 = arith.constant dense<0.000000e+00> : vector<48x48xf32>
    %224 = tpu.matmul %221, %223, %cst_73 {dimension_numbers = #tpu.dot_dimension_numbers<[1], [1], [0], [0], [0, 0, 1, 0], [], []>} : vector<48x8xbf16>, vector<48x8xbf16>, vector<48x48xf32> -> vector<48x48xf32>
    %225 = tpu.concatenate %209, %214, %219, %224 in 0 : vector<48x48xf32>, vector<48x48xf32>, vector<48x48xf32>, vector<48x48xf32> -> vector<192x48xf32>
    %226 = arith.addf %225, %28 : vector<192x48xf32>
    %cst_74 = arith.constant dense<0xFF800000> : vector<192xf32>
    %227 = vector.multi_reduction <maximumf>, %226, %cst_74 [1] : vector<192x48xf32> to vector<192xf32>
    %228 = vector.shape_cast %227 : vector<192xf32> to vector<192x1xf32>
    %229 = vector.broadcast %228 : vector<192x1xf32> to vector<192x48xf32>
    %230 = arith.subf %226, %229 : vector<192x48xf32>
    %231 = math.exp %230 : vector<192x48xf32>
    %cst_75 = arith.constant dense<0.000000e+00> : vector<192xf32>
    %232 = vector.multi_reduction <add>, %231, %cst_75 [1] : vector<192x48xf32> to vector<192xf32>
    %233 = vector.shape_cast %232 : vector<192xf32> to vector<192x1xf32>
    %234 = tpu.reciprocal %233 {approx = true} : vector<192x1xf32> -> vector<192x1xf32>
    %235 = vector.broadcast %234 : vector<192x1xf32> to vector<192x48xf32>
    %236 = arith.mulf %231, %235 : vector<192x48xf32>
    %237 = vector.extract_strided_slice %236 {offsets = [0, 0], sizes = [48, 48], strides = [1, 1]} : vector<192x48xf32> to vector<48x48xf32>
    %238 = vector.extract_strided_slice %204 {offsets = [0, 64], sizes = [48, 8], strides = [1, 1]} : vector<48x96xf32> to vector<48x8xf32>
    %239 = arith.truncf %237 : vector<48x48xf32> to vector<48x48xbf16>
    %240 = arith.truncf %238 : vector<48x8xf32> to vector<48x8xbf16>
    %cst_76 = arith.constant dense<0.000000e+00> : vector<48x8xf32>
    %241 = tpu.matmul %239, %240, %cst_76 {dimension_numbers = #tpu.dot_dimension_numbers<[1], [0], [0], [1], [0, 0, 1, 1], [], []>} : vector<48x48xbf16>, vector<48x8xbf16>, vector<48x8xf32> -> vector<48x8xf32>
    %242 = vector.extract_strided_slice %236 {offsets = [48, 0], sizes = [48, 48], strides = [1, 1]} : vector<192x48xf32> to vector<48x48xf32>
    %243 = vector.extract_strided_slice %204 {offsets = [0, 72], sizes = [48, 8], strides = [1, 1]} : vector<48x96xf32> to vector<48x8xf32>
    %244 = arith.truncf %242 : vector<48x48xf32> to vector<48x48xbf16>
    %245 = arith.truncf %243 : vector<48x8xf32> to vector<48x8xbf16>
    %cst_77 = arith.constant dense<0.000000e+00> : vector<48x8xf32>
    %246 = tpu.matmul %244, %245, %cst_77 {dimension_numbers = #tpu.dot_dimension_numbers<[1], [0], [0], [1], [0, 0, 1, 1], [], []>} : vector<48x48xbf16>, vector<48x8xbf16>, vector<48x8xf32> -> vector<48x8xf32>
    %247 = vector.extract_strided_slice %236 {offsets = [96, 0], sizes = [48, 48], strides = [1, 1]} : vector<192x48xf32> to vector<48x48xf32>
    %248 = vector.extract_strided_slice %204 {offsets = [0, 80], sizes = [48, 8], strides = [1, 1]} : vector<48x96xf32> to vector<48x8xf32>
    %249 = arith.truncf %247 : vector<48x48xf32> to vector<48x48xbf16>
    %250 = arith.truncf %248 : vector<48x8xf32> to vector<48x8xbf16>
    %cst_78 = arith.constant dense<0.000000e+00> : vector<48x8xf32>
    %251 = tpu.matmul %249, %250, %cst_78 {dimension_numbers = #tpu.dot_dimension_numbers<[1], [0], [0], [1], [0, 0, 1, 1], [], []>} : vector<48x48xbf16>, vector<48x8xbf16>, vector<48x8xf32> -> vector<48x8xf32>
    %252 = vector.extract_strided_slice %236 {offsets = [144, 0], sizes = [48, 48], strides = [1, 1]} : vector<192x48xf32> to vector<48x48xf32>
    %253 = vector.extract_strided_slice %204 {offsets = [0, 88], sizes = [48, 8], strides = [1, 1]} : vector<48x96xf32> to vector<48x8xf32>
    %254 = arith.truncf %252 : vector<48x48xf32> to vector<48x48xbf16>
    %255 = arith.truncf %253 : vector<48x8xf32> to vector<48x8xbf16>
    %cst_79 = arith.constant dense<0.000000e+00> : vector<48x8xf32>
    %256 = tpu.matmul %254, %255, %cst_79 {dimension_numbers = #tpu.dot_dimension_numbers<[1], [0], [0], [1], [0, 0, 1, 1], [], []>} : vector<48x48xbf16>, vector<48x8xbf16>, vector<48x8xf32> -> vector<48x8xf32>
    %257 = tpu.concatenate %241, %246, %251, %256 in 1 : vector<48x8xf32>, vector<48x8xf32>, vector<48x8xf32>, vector<48x8xf32> -> vector<48x32xf32>
    %c1_80 = arith.constant 1 : index
    %c0_81 = arith.constant 0 : index
    %c0_82 = arith.constant 0 : index
    %258 = vector.load %arg6[%c1_80, %c0_81, %c0_82] : memref<2x32x32xf32, #tpu.memory_space<vmem>>, vector<1x32x32xf32>
    %259 = vector.shape_cast %258 : vector<1x32x32xf32> to vector<32x32xf32>
    %260 = arith.truncf %257 : vector<48x32xf32> to vector<48x32xbf16>
    %261 = arith.truncf %259 : vector<32x32xf32> to vector<32x32xbf16>
    %cst_83 = arith.constant dense<0.000000e+00> : vector<48x32xf32>
    %262 = tpu.matmul %260, %261, %cst_83 {dimension_numbers = #tpu.dot_dimension_numbers<[1], [0], [0], [1], [0, 0, 1, 1], [], []>} : vector<48x32xbf16>, vector<32x32xbf16>, vector<48x32xf32> -> vector<48x32xf32>
    %263 = arith.addf %174, %262 : vector<48x32xf32>
    %c11 = arith.constant 11 : index
    %c0_84 = arith.constant 0 : index
    %264 = vector.load %arg4[%c11, %c0_84] : memref<24x128xf32, #tpu.memory_space<vmem>>, vector<1x32xf32>
    %265 = vector.broadcast %264 : vector<1x32xf32> to vector<48x32xf32>
    %266 = arith.addf %263, %265 : vector<48x32xf32>
    %c12 = arith.constant 12 : index
    %c0_85 = arith.constant 0 : index
    %267 = vector.load %arg4[%c12, %c0_85] : memref<24x128xf32, #tpu.memory_space<vmem>>, vector<1x32xf32>
    %c13 = arith.constant 13 : index
    %c0_86 = arith.constant 0 : index
    %268 = vector.load %arg4[%c13, %c0_86] : memref<24x128xf32, #tpu.memory_space<vmem>>, vector<1x32xf32>
    %cst_87 = arith.constant dense<0.000000e+00> : vector<48xf32>
    %269 = vector.multi_reduction <add>, %266, %cst_87 [1] : vector<48x32xf32> to vector<48xf32>
    %270 = vector.shape_cast %269 : vector<48xf32> to vector<48x1xf32>
    %cst_88 = arith.constant 3.200000e+01 : f32
    %271 = vector.broadcast %cst_88 : f32 to vector<48x1xf32>
    %272 = arith.divf %270, %271 : vector<48x1xf32>
    %273 = vector.broadcast %272 : vector<48x1xf32> to vector<48x32xf32>
    %274 = arith.subf %266, %273 : vector<48x32xf32>
    %275 = arith.mulf %274, %274 : vector<48x32xf32>
    %cst_89 = arith.constant dense<0.000000e+00> : vector<48xf32>
    %276 = vector.multi_reduction <add>, %275, %cst_89 [1] : vector<48x32xf32> to vector<48xf32>
    %277 = vector.shape_cast %276 : vector<48xf32> to vector<48x1xf32>
    %cst_90 = arith.constant 3.200000e+01 : f32
    %278 = vector.broadcast %cst_90 : f32 to vector<48x1xf32>
    %279 = arith.divf %277, %278 : vector<48x1xf32>
    %cst_91 = arith.constant 9.99999974E-6 : f32
    %280 = vector.broadcast %cst_91 : f32 to vector<48x1xf32>
    %281 = arith.addf %279, %280 : vector<48x1xf32>
    %282 = math.rsqrt %281 : vector<48x1xf32>
    %283 = vector.broadcast %282 : vector<48x1xf32> to vector<48x32xf32>
    %284 = arith.mulf %274, %283 : vector<48x32xf32>
    %285 = vector.broadcast %267 : vector<1x32xf32> to vector<48x32xf32>
    %286 = arith.mulf %284, %285 : vector<48x32xf32>
    %287 = vector.broadcast %268 : vector<1x32xf32> to vector<48x32xf32>
    %288 = arith.addf %286, %287 : vector<48x32xf32>
    %c1_92 = arith.constant 1 : index
    %c0_93 = arith.constant 0 : index
    %c0_94 = arith.constant 0 : index
    %289 = vector.load %arg7[%c1_92, %c0_93, %c0_94] : memref<2x32x128xf32, #tpu.memory_space<vmem>>, vector<1x32x128xf32>
    %290 = vector.shape_cast %289 : vector<1x32x128xf32> to vector<32x128xf32>
    %291 = arith.truncf %288 : vector<48x32xf32> to vector<48x32xbf16>
    %292 = arith.truncf %290 : vector<32x128xf32> to vector<32x128xbf16>
    %cst_95 = arith.constant dense<0.000000e+00> : vector<48x128xf32>
    %293 = tpu.matmul %291, %292, %cst_95 {dimension_numbers = #tpu.dot_dimension_numbers<[1], [0], [0], [1], [0, 0, 1, 1], [], []>} : vector<48x32xbf16>, vector<32x128xbf16>, vector<48x128xf32> -> vector<48x128xf32>
    %c14 = arith.constant 14 : index
    %c0_96 = arith.constant 0 : index
    %294 = vector.load %arg4[%c14, %c0_96] : memref<24x128xf32, #tpu.memory_space<vmem>>, vector<1x128xf32>
    %295 = vector.broadcast %294 : vector<1x128xf32> to vector<48x128xf32>
    %296 = arith.addf %293, %295 : vector<48x128xf32>
    %cst_97 = arith.constant 5.000000e-01 : f32
    %297 = vector.broadcast %cst_97 : f32 to vector<48x128xf32>
    %298 = arith.mulf %297, %296 : vector<48x128xf32>
    %cst_98 = arith.constant 0.707106769 : f32
    %299 = vector.broadcast %cst_98 : f32 to vector<48x128xf32>
    %300 = arith.mulf %296, %299 : vector<48x128xf32>
    %301 = math.erf %300 : vector<48x128xf32>
    %cst_99 = arith.constant 1.000000e+00 : f32
    %302 = vector.broadcast %cst_99 : f32 to vector<48x128xf32>
    %303 = arith.addf %302, %301 : vector<48x128xf32>
    %304 = arith.mulf %298, %303 : vector<48x128xf32>
    %c1_100 = arith.constant 1 : index
    %c0_101 = arith.constant 0 : index
    %c0_102 = arith.constant 0 : index
    %305 = vector.load %arg8[%c1_100, %c0_101, %c0_102] : memref<2x128x32xf32, #tpu.memory_space<vmem>>, vector<1x128x32xf32>
    %306 = vector.shape_cast %305 : vector<1x128x32xf32> to vector<128x32xf32>
    %307 = arith.truncf %304 : vector<48x128xf32> to vector<48x128xbf16>
    %308 = arith.truncf %306 : vector<128x32xf32> to vector<128x32xbf16>
    %cst_103 = arith.constant dense<0.000000e+00> : vector<48x32xf32>
    %309 = tpu.matmul %307, %308, %cst_103 {dimension_numbers = #tpu.dot_dimension_numbers<[1], [0], [0], [1], [0, 0, 1, 1], [], []>} : vector<48x128xbf16>, vector<128x32xbf16>, vector<48x32xf32> -> vector<48x32xf32>
    %310 = arith.addf %266, %309 : vector<48x32xf32>
    %c15 = arith.constant 15 : index
    %c0_104 = arith.constant 0 : index
    %311 = vector.load %arg4[%c15, %c0_104] : memref<24x128xf32, #tpu.memory_space<vmem>>, vector<1x32xf32>
    %312 = vector.broadcast %311 : vector<1x32xf32> to vector<48x32xf32>
    %313 = arith.addf %310, %312 : vector<48x32xf32>
    %314 = vector.extract_strided_slice %313 {offsets = [16, 0], sizes = [1, 32], strides = [1, 1]} : vector<48x32xf32> to vector<1x32xf32>
    %315 = vector.extract_strided_slice %313 {offsets = [40, 0], sizes = [1, 32], strides = [1, 1]} : vector<48x32xf32> to vector<1x32xf32>
    %316 = tpu.concatenate %314, %315 in 0 : vector<1x32xf32>, vector<1x32xf32> -> vector<2x32xf32>
    %c16 = arith.constant 16 : index
    %c0_105 = arith.constant 0 : index
    %317 = vector.load %arg4[%c16, %c0_105] : memref<24x128xf32, #tpu.memory_space<vmem>>, vector<1x32xf32>
    %c17 = arith.constant 17 : index
    %c0_106 = arith.constant 0 : index
    %318 = vector.load %arg4[%c17, %c0_106] : memref<24x128xf32, #tpu.memory_space<vmem>>, vector<1x32xf32>
    %cst_107 = arith.constant dense<0.000000e+00> : vector<2xf32>
    %319 = vector.multi_reduction <add>, %316, %cst_107 [1] : vector<2x32xf32> to vector<2xf32>
    %320 = vector.shape_cast %319 : vector<2xf32> to vector<2x1xf32>
    %cst_108 = arith.constant 3.200000e+01 : f32
    %321 = vector.broadcast %cst_108 : f32 to vector<2x1xf32>
    %322 = arith.divf %320, %321 : vector<2x1xf32>
    %323 = vector.broadcast %322 : vector<2x1xf32> to vector<2x32xf32>
    %324 = arith.subf %316, %323 : vector<2x32xf32>
    %325 = arith.mulf %324, %324 : vector<2x32xf32>
    %cst_109 = arith.constant dense<0.000000e+00> : vector<2xf32>
    %326 = vector.multi_reduction <add>, %325, %cst_109 [1] : vector<2x32xf32> to vector<2xf32>
    %327 = vector.shape_cast %326 : vector<2xf32> to vector<2x1xf32>
    %cst_110 = arith.constant 3.200000e+01 : f32
    %328 = vector.broadcast %cst_110 : f32 to vector<2x1xf32>
    %329 = arith.divf %327, %328 : vector<2x1xf32>
    %cst_111 = arith.constant 9.99999974E-6 : f32
    %330 = vector.broadcast %cst_111 : f32 to vector<2x1xf32>
    %331 = arith.addf %329, %330 : vector<2x1xf32>
    %332 = math.rsqrt %331 : vector<2x1xf32>
    %333 = vector.broadcast %332 : vector<2x1xf32> to vector<2x32xf32>
    %334 = arith.mulf %324, %333 : vector<2x32xf32>
    %335 = vector.broadcast %317 : vector<1x32xf32> to vector<2x32xf32>
    %336 = arith.mulf %334, %335 : vector<2x32xf32>
    %337 = vector.broadcast %318 : vector<1x32xf32> to vector<2x32xf32>
    %338 = arith.addf %336, %337 : vector<2x32xf32>
    %c0_112 = arith.constant 0 : index
    %c0_113 = arith.constant 0 : index
    %339 = vector.load %arg9[%c0_112, %c0_113] : memref<32x16xf32, #tpu.memory_space<vmem>>, vector<32x16xf32>
    %340 = arith.truncf %338 : vector<2x32xf32> to vector<2x32xbf16>
    %341 = arith.truncf %339 : vector<32x16xf32> to vector<32x16xbf16>
    %cst_114 = arith.constant dense<0.000000e+00> : vector<2x16xf32>
    %342 = tpu.matmul %340, %341, %cst_114 {dimension_numbers = #tpu.dot_dimension_numbers<[1], [0], [0], [1], [0, 0, 1, 1], [], []>} : vector<2x32xbf16>, vector<32x16xbf16>, vector<2x16xf32> -> vector<2x16xf32>
    %c18 = arith.constant 18 : index
    %c0_115 = arith.constant 0 : index
    %343 = vector.load %arg4[%c18, %c0_115] : memref<24x128xf32, #tpu.memory_space<vmem>>, vector<1x16xf32>
    %344 = vector.broadcast %343 : vector<1x16xf32> to vector<2x16xf32>
    %345 = arith.addf %342, %344 : vector<2x16xf32>
    %c0_116 = arith.constant 0 : index
    %c0_117 = arith.constant 0 : index
    %346 = vector.load %arg10[%c0_116, %c0_117] : memref<2x16xf32, #tpu.memory_space<vmem>>, vector<2x16xf32>
    tpu.vector_store %arg10[%c0_116, %c0_117], %345 {strides = array<i32>} : memref<2x16xf32, #tpu.memory_space<vmem>>, vector<2x16xf32>,
    return
  }
  func.func @transform_0(%arg0: i32) -> (i32, i32) {
    %c0_i32 = arith.constant 0 : i32
    %c0_i32_0 = arith.constant 0 : i32
    return %arg0, %c0_i32 : i32, i32
  }
  func.func @transform_1(%arg0: i32) -> (i32, i32) {
    %c0_i32 = arith.constant 0 : i32
    %c0_i32_0 = arith.constant 0 : i32
    %c0_i32_1 = arith.constant 0 : i32
    return %c0_i32, %c0_i32_0 : i32, i32
  }
  func.func @transform_2(%arg0: i32) -> (i32, i32) {
    %c0_i32 = arith.constant 0 : i32
    %c0_i32_0 = arith.constant 0 : i32
    %c0_i32_1 = arith.constant 0 : i32
    return %c0_i32, %c0_i32_0 : i32, i32
  }
  func.func @transform_3(%arg0: i32) -> (i32, i32) {
    %c0_i32 = arith.constant 0 : i32
    %c0_i32_0 = arith.constant 0 : i32
    %c0_i32_1 = arith.constant 0 : i32
    return %c0_i32, %c0_i32_0 : i32, i32
  }
  func.func @transform_4(%arg0: i32) -> (i32, i32, i32) {
    %c0_i32 = arith.constant 0 : i32
    %c0_i32_0 = arith.constant 0 : i32
    %c0_i32_1 = arith.constant 0 : i32
    %c0_i32_2 = arith.constant 0 : i32
    return %c0_i32, %c0_i32_0, %c0_i32_1 : i32, i32, i32
  }
  func.func @transform_5(%arg0: i32) -> (i32, i32, i32) {
    %c0_i32 = arith.constant 0 : i32
    %c0_i32_0 = arith.constant 0 : i32
    %c0_i32_1 = arith.constant 0 : i32
    %c0_i32_2 = arith.constant 0 : i32
    return %c0_i32, %c0_i32_0, %c0_i32_1 : i32, i32, i32
  }
  func.func @transform_6(%arg0: i32) -> (i32, i32, i32) {
    %c0_i32 = arith.constant 0 : i32
    %c0_i32_0 = arith.constant 0 : i32
    %c0_i32_1 = arith.constant 0 : i32
    %c0_i32_2 = arith.constant 0 : i32
    return %c0_i32, %c0_i32_0, %c0_i32_1 : i32, i32, i32
  }
  func.func @transform_7(%arg0: i32) -> (i32, i32, i32) {
    %c0_i32 = arith.constant 0 : i32
    %c0_i32_0 = arith.constant 0 : i32
    %c0_i32_1 = arith.constant 0 : i32
    %c0_i32_2 = arith.constant 0 : i32
    return %c0_i32, %c0_i32_0, %c0_i32_1 : i32, i32, i32
  }
  func.func @transform_8(%arg0: i32) -> (i32, i32) {
    %c0_i32 = arith.constant 0 : i32
    %c0_i32_0 = arith.constant 0 : i32
    %c0_i32_1 = arith.constant 0 : i32
    return %c0_i32, %c0_i32_0 : i32, i32
  }
  func.func @transform_9(%arg0: i32) -> (i32, i32) {
    %c0_i32 = arith.constant 0 : i32
    %c0_i32_0 = arith.constant 0 : i32
    return %arg0, %c0_i32 : i32, i32
  }
}

</mosaic_0001>

<bundles_post_ra>
// kernel: vit_forward.1
= control target key start
LH: loop header
LB: loop body
LE: loop exit
PB: predicated region body
PF: predicated region fallthrough
CT: control target
= control target key end

     0   :  { %v4692_v3 = vmov 0.0   ;;  %vm4693_vm0 = vmmov 0   ;;  %s6428_s0 = inlined_call_operand.vmem [shape: f32[48,64], index: 0, kind: input, shape index: {}]   ;;  %s6429_s1 = inlined_call_operand.vmem [shape: f32[48,32], index: 1, kind: input, shape index: {}]   ;;  %s6430_s2 = inlined_call_operand.vmem [shape: f32[64,32], index: 2, kind: input, shape index: {}]   ;;  %s6431_s3 = inlined_call_operand.vmem [shape: f32[24,128], index: 3, kind: input, shape index: {}]   ;;  %s6432_s4 = inlined_call_operand.vmem [shape: f32[2,32,96], index: 4, kind: input, shape index: {}]   ;;  %s6433_s5 = inlined_call_operand.vmem [shape: f32[2,32,32], index: 5, kind: input, shape index: {}]   ;;  %s6434_s6 = inlined_call_operand.vmem [shape: f32[2,32,128], index: 6, kind: input, shape index: {}]   ;;  %s6435_s7 = inlined_call_operand.vmem [shape: f32[2,128,32], index: 7, kind: input, shape index: {}]   ;;  %s6436_s8 = inlined_call_operand.vmem [shape: f32[32,16], index: 8, kind: input, shape index: {}]   ;;  %s6437_s9 = inlined_call_operand.hbm [shape: f32[2,16], index: 9, kind: output, shape index: {}]  }
   0x1   :  { %v115_v0 = vld [vmem:[%s6430_s2] sm:$0xff]  ;;  %v116_v1 = vld [vmem:[%s6430_s2 + $0x8] sm:$0xff]  ;;  %v117_v2 = vld [vmem:[%s6430_s2 + $0x10] sm:$0xff]  ;;  %3820 = vmatprep.subr.bf16.mxu0 %v4692_v3  ;;  %3828 = vmatprep.mubr.msk.bf16.mxu0 %vm4693_vm0, %v4692_v3 }
   0x2   :  { %v126_v4 = vpack.c.bf16 %v116_v1, %v115_v0  ;;  %v118_v5 = vld [vmem:[%s6430_s2 + $0x18] sm:$0xff]  ;;  %3840 = vmatprep.subr.bf16.mxu1 %v4692_v3  ;;  %3844 = vmatprep.mubr.msk.bf16.mxu1 %vm4693_vm0, %v4692_v3  ;;  %v119_v7 = vld [vmem:[%s6430_s2 + $0x20] sm:$0xff]  ;;  %v120_v8 = vld [vmem:[%s6430_s2 + $0x28] sm:$0xff] }
   0x3   :  { %v127_v6 = vpack.c.bf16 %v118_v5, %v117_v2 }
   0x4   :  { %3821 = vmatpush3.bf16.msra.mxu0 %v126_v4 }
   0x5   :  { %3822 = vmatprep.subr.bf16.mxu0 %v4692_v3 }
   0x6   :  { %14 = vsyncpa [#allocation3], 0  ;;  %v128_v9 = vpack.c.bf16 %v120_v8, %v119_v7  ;;  %v121_v10 = vld [vmem:[%s6430_s2 + $0x30] sm:$0xff]  ;;  %v122_v11 = vld [vmem:[%s6430_s2 + $0x38] sm:$0xff]  ;;  %vm136_vm1 = vcmask 523264   ;;  %vm205_vm2 = vcmask 261120  }
   0x7   :  { %v129_v12 = vpack.c.bf16 %v122_v11, %v121_v10  ;;  %v109_v13 = vld [vmem:[%s6428_s0] sm:$0xff]  ;;  %v110_v14 = vld [vmem:[%s6428_s0 + $0x8] sm:$0xff]  ;;  %v111_v16 = vld [vmem:[%s6428_s0 + $0x10] sm:$0xff]  ;;  %s4694_s17 = smov 96   ;;  %s4695_s18 = smov 88   ;;  %vm397_vm3 = vcmask 64512  }
   0x8   :  { %3823 = vmatpush3.bf16.msra.mxu0 %v127_v6  ;;  %v123_v15 = vpack.c.bf16 %v110_v14, %v109_v13  ;;  %v112_v17 = vld [vmem:[%s6428_s0 + $0x18] sm:$0xff]  ;;  %v113_v19 = vld [vmem:[%s6428_s0 + $0x20] sm:$0xff]  ;;  %v114_v20 = vld [vmem:[%s6428_s0 + $0x28] sm:$0xff]  ;;  %s4696_s0 = smov 80   ;;  %s4697_s19 = smov 120   ;;  %vm758_vm5 = vcmask 392192  }
   0x9   :  { %3824 = vmatprep.subr.bf16.mxu0 %v4692_v3  ;;  %v124_v18 = vpack.c.bf16 %v112_v17, %v111_v16  ;;  %v125_v21 = vpack.c.bf16 %v114_v20, %v113_v19  ;;  %v130_v22 = vld [vmem:[%s6429_s1] sm:$0xff]  ;;  %v131_v24 = vld [vmem:[%s6429_s1 + $0x8] sm:$0xff]  ;;  %v132_v31 = vld [vmem:[%s6429_s1 + $0x10] sm:$0xff]  ;;  %s4698_s20 = smov 72   ;;  %s4699_s21 = smov 112   ;;  %vm1413_vm9 = vcmask 130048  }
   0xa   :  { %v133_v34 = vld [vmem:[%s6429_s1 + $0x18] sm:$0xff]  ;;  %v134_v41 = vld [vmem:[%s6429_s1 + $0x20] sm:$0xff]  ;;  %v135_v44 = vld [vmem:[%s6429_s1 + $0x28] sm:$0xff]  ;;  %s4700_s22 = smov 104   ;;  %s4701_s23 = smov 56   ;;  %vm1420_vm10 = vcmask 195584  }
   0xb   :  { %v305_v19 = vld [vmem:[%s6432_s4] sm:$0xff]  ;;  %v306_v20 = vld [vmem:[%s6432_s4 + $0x8] sm:$0xff]  ;;  %s4702_s24 = smov 64   ;;  %s4703_s25 = smov 48   ;;  %vm3446_vm11 = vcmask 1040384   ;;  %vm3450_vm12 = vcmask 254976  }
   0xc   :  { %3825 = vmatpush3.bf16.msra.mxu0 %v128_v9  ;;  %s4705_s1 = smov 40   ;;  %s4706_s29 = smov 8   ;;  %vm3529_vm13 = vcmask 123904  }
   0xd   :  { %3826 = vmatprep.subr.bf16.mxu0 %v4692_v3  ;;  %s4707_s13 = smov 16   ;;  %s4708_s14 = smov 24  }
   0xe   :  { %s4709_s28 = smov [#allocation2]  }
   0xf   :  { %s3537_s2 = sshll.u32 %s4709_s28, 4  ;;  %s3538_s2 = int_to_ptr.vmem [resolvable:$true] %s3537_s2 }
  0x10   :  { %3827 = vmatpush3.bf16.msra.mxu0 %v129_v12  ;;  %s4668_s30 = scalar_lea.vmem %s3538_s2, 32  ;;  %p4673_p1 = scmp.lt.s32.totalorder %s3538_s2, %s3538_s2 }
  0x11   :  { %3874 = vmatprep.subr.bf16.mxu0 %v4692_v3  ;;  %p4669_p0 = scmp.ne.s32.totalorder %s3538_s2, %s4668_s30  ;;  %p4674_p2 = scmp.lt.s32.totalorder %s4668_s30, %s4668_s30 }
  0x13   :  { %3829 = vmatmul.mubr.msk.bf16.vlgmr.msra.gmra.mrb[0].mxu0 %vm136_vm1, %v123_v15  ;;  %p4675_p3 = por %p4674_p2, %p4673_p1 }
  0x14   :  { %3832 = vmatprep.mubr.msk.bf16.mxu0 %vm4693_vm0, %v4692_v3 }
  0x15   :  { %p4676_p4 = pnand %p4675_p3, %p4669_p0 }
  0x1b   :  { %3833 = vmatmul.mubr.msk.bf16.gmra.mrb[4].mxu0 %vm136_vm1, %v124_v18 }
  0x1c   :  { %3836 = vmatprep.mubr.msk.bf16.mxu0 %vm4693_vm0, %v4692_v3 }
  0x23   :  { %3837 = vmatmul.mubr.msk.bf16.gmra.mrb[8].mxu0 %vm136_vm1, %v125_v21  ;;  %v312_v21 = vpack.c.bf16 %v306_v20, %v305_v19 }
  0x24   :  { %3880 = vmatprep.mubr.msk.bf16.mxu0 %vm4693_vm0, %v4692_v3 }
  0x25   :  { %3841 = vmatpush3.bf16.msra.mxu1 %v312_v21 }
  0x26   :  { %3842 = vmatprep.subr.bf16.mxu1 %v4692_v3 }
  0xe6   :  { %v180_v23 = vpop.f32.mrb[0].mxu0 }
  0xe7   :  { %v4824_v25 = vadd.f32 %v180_v23, %v130_v22  ;;  %v3830_v26 = vpop.f32.mrb[1].mxu0  ;;  %v307_v22 = vld [vmem:[%s6432_s4 + $0x10] sm:$0xff]  ;;  %v308_v23 = vld [vmem:[%s6432_s4 + $0x18] sm:$0xff] }
  0xe8   :  { %v183_v27 = vpop.f32.mrb[2].mxu0 }
  0xe9   :  { %v4826_v28 = vadd.f32 %v183_v27, %v131_v24  ;;  %v3831_v29 = vpop.f32.mrb[3].mxu0  ;;  %v206_v30 = vsel %vm205_vm2, %v4824_v25, 0.0  ;;  %v313_v24 = vpack.c.bf16 %v308_v23, %v307_v22 }
  0xea   :  { %207 = vadd.xlane.f32.xlu0 %v206_v30 }
  0xeb   :  { %v209_v32 = vsel %vm205_vm2, %v4826_v28, 0.0  ;;  %3843 = vmatpush3.bf16.msra.mxu1 %v313_v24 }
  0xec   :  { %3856 = vmatprep.subr.bf16.mxu1 %v4692_v3 }
  0xee   :  { %210 = vadd.xlane.f32.xlu0 %v209_v32  ;;  %v188_v33 = vpop.f32.mrb[4].mxu0 }
  0xef   :  { %v4838_v35 = vadd.f32 %v188_v33, %v132_v31  ;;  %v3834_v36 = vpop.f32.mrb[5].mxu0 }
  0xf0   :  { %v191_v37 = vpop.f32.mrb[6].mxu0 }
  0xf1   :  { %v4840_v38 = vadd.f32 %v191_v37, %v133_v34  ;;  %v3835_v39 = vpop.f32.mrb[7].mxu0  ;;  %v212_v40 = vsel %vm205_vm2, %v4838_v35, 0.0 }
  0xf2   :  { %213 = vadd.xlane.f32.xlu1 %v212_v40 }
  0xf3   :  { %v215_v42 = vsel %vm205_vm2, %v4840_v38, 0.0 }
  0xf6   :  { %216 = vadd.xlane.f32.xlu1 %v215_v42  ;;  %v196_v43 = vpop.f32.mrb[8].mxu0 }
  0xf7   :  { %v4852_v45 = vadd.f32 %v196_v43, %v134_v41  ;;  %v3838_v46 = vpop.f32.mrb[9].mxu0 }
  0xf8   :  { %v199_v47 = vpop.f32.mrb[10].mxu0  ;;  %v3548_v46 = vld [vmem:[%s6431_s3] ss:$0 sm:$0xff] }
  0xf9   :  { %v4854_v48 = vadd.f32 %v199_v47, %v135_v44  ;;  %v218_v49 = vsel %vm205_vm2, %v4852_v45, 0.0  ;;  %v3839_v50 = vpop.f32.mrb[11].mxu0 }
  0xfa   :  { %219 = vadd.xlane.f32.xlu0 %v218_v49 }
  0xfb   :  { %v221_v51 = vsel %vm205_vm2, %v4854_v48, 0.0 }
  0xfc   :  { %222 = vadd.xlane.f32.xlu1 %v221_v51 }
 0x177   :  { %v208_v52 = vpop.xlane.xlu0 %207 }
 0x178   :  { %v225_v53 = vmul.f32 0.03125, %v208_v52 }
 0x17a   :  { %v231_v54 = vsub.f32 %v4824_v25, %v225_v53 }
 0x17b   :  { %v211_v55 = vpop.xlane.xlu0 %210 }
 0x17c   :  { %v226_v56 = vmul.f32 0.03125, %v211_v55  ;;  %v237_v57 = vmul.f32 %v231_v54, %v231_v54 }
 0x17e   :  { %v4862_v58 = vsub.f32 %v4826_v28, %v226_v56  ;;  %v243_v59 = vsel %vm205_vm2, %v237_v57, 0.0  ;;  %v3549_v56 = vld [vmem:[%s6431_s3 + $0x1] ss:$0 sm:$0xff] }
 0x17f   :  { %v214_v60 = vpop.xlane.xlu1 %213  ;;  %244 = vadd.xlane.f32.xlu0 %v243_v59 }
 0x180   :  { %v227_v61 = vmul.f32 0.03125, %v214_v60  ;;  %v238_v62 = vmul.f32 %v4862_v58, %v4862_v58 }
 0x182   :  { %v4868_v63 = vsub.f32 %v4838_v35, %v227_v61  ;;  %v246_v0 = vsel %vm205_vm2, %v238_v62, 0.0 }
 0x183   :  { %v217_v1 = vpop.xlane.xlu1 %216  ;;  %247 = vadd.xlane.f32.xlu1 %v246_v0 }
 0x184   :  { %v228_v2 = vmul.f32 0.03125, %v217_v1  ;;  %v239_v4 = vmul.f32 %v4868_v63, %v4868_v63 }
 0x186   :  { %v4874_v5 = vsub.f32 %v4840_v38, %v228_v2  ;;  %v249_v6 = vsel %vm205_vm2, %v239_v4, 0.0 }
 0x187   :  { %250 = vadd.xlane.f32.xlu0 %v249_v6  ;;  %v220_v7 = vpop.xlane.xlu0 %219 }
 0x188   :  { %v229_v8 = vmul.f32 0.03125, %v220_v7  ;;  %v240_v9 = vmul.f32 %v4874_v5, %v4874_v5 }
 0x189   :  { %v223_v10 = vpop.xlane.xlu1 %222 }
 0x18a   :  { %v4880_v11 = vsub.f32 %v4852_v45, %v229_v8  ;;  %v230_v12 = vmul.f32 0.03125, %v223_v10  ;;  %v252_v13 = vsel %vm205_vm2, %v240_v9, 0.0 }
 0x18b   :  { %253 = vadd.xlane.f32.xlu1 %v252_v13 }
 0x18c   :  { %v4884_v14 = vsub.f32 %v4854_v48, %v230_v12  ;;  %v241_v15 = vmul.f32 %v4880_v11, %v4880_v11 }
 0x18e   :  { %v255_v16 = vsel %vm205_vm2, %v241_v15, 0.0  ;;  %v242_v17 = vmul.f32 %v4884_v14, %v4884_v14 }
 0x18f   :  { %256 = vadd.xlane.f32.xlu0 %v255_v16 }
 0x190   :  { %v258_v18 = vsel %vm205_vm2, %v242_v17, 0.0 }
 0x191   :  { %259 = vadd.xlane.f32.xlu1 %v258_v18 }
 0x20c   :  { %v245_v26 = vpop.xlane.xlu0 %244 }
 0x20d   :  { %v261_v27 = vmul.f32 0.03125, %v245_v26 }
 0x20f   :  { %v267_v29 = vadd.f32 1e-05, %v261_v27 }
 0x210   :  { %v248_v30 = vpop.xlane.xlu1 %247 }
 0x211   :  { %4402 = vrsqrt.f32 %v267_v29  ;;  %v262_v31 = vmul.f32 0.03125, %v248_v30 }
 0x213   :  { %v268_v32 = vadd.f32 1e-05, %v262_v31 }
 0x214   :  { %v251_v33 = vpop.xlane.xlu0 %250 }
 0x215   :  { %4404 = vrsqrt.f32 %v268_v32  ;;  %v263_v34 = vmul.f32 0.03125, %v251_v33 }
 0x217   :  { %v269_v36 = vadd.f32 1e-05, %v263_v34 }
 0x218   :  { %v254_v37 = vpop.xlane.xlu1 %253 }
 0x219   :  { %4406 = vrsqrt.f32 %v269_v36  ;;  %v264_v39 = vmul.f32 0.03125, %v254_v37 }
 0x21b   :  { %v4403_v40 = vpop.eup %4402  ;;  %v270_v41 = vadd.f32 1e-05, %v264_v39 }
 0x21c   :  { %v257_v42 = vpop.xlane.xlu0 %256  ;;  %v279_v43 = vmul.f32 %v4403_v40, %v231_v54 }
 0x21d   :  { %4408 = vrsqrt.f32 %v270_v41  ;;  %v265_v44 = vmul.f32 0.03125, %v257_v42 }
 0x21e   :  { %v260_v47 = vpop.xlane.xlu1 %259  ;;  %v289_v53 = vmul.f32 %v3548_v46, %v279_v43 }
 0x21f   :  { %v4405_v49 = vpop.eup %4404  ;;  %v271_v50 = vadd.f32 1e-05, %v265_v44  ;;  %v266_v51 = vmul.f32 0.03125, %v260_v47 }
 0x220   :  { %v280_v52 = vmul.f32 %v4405_v49, %v4862_v58  ;;  %v299_v59 = vadd.f32 %v3549_v56, %v289_v53 }
 0x221   :  { %4410 = vrsqrt.f32 %v271_v50  ;;  %v272_v55 = vadd.f32 1e-05, %v266_v51 }
 0x222   :  { %v290_v54 = vmul.f32 %v3548_v46, %v280_v52 }
 0x223   :  { %v4407_v57 = vpop.eup %4406  ;;  %4412 = vrsqrt.f32 %v272_v55 }
 0x224   :  { %v300_v60 = vadd.f32 %v3549_v56, %v290_v54  ;;  %v281_v61 = vmul.f32 %v4407_v57, %v4868_v63 }
 0x226   :  { %v309_v62 = vpack.c.bf16 %v300_v60, %v299_v59  ;;  %v291_v1 = vmul.f32 %v3548_v46, %v281_v61 }
 0x227   :  { %v4409_v0 = vpop.eup %4408 }
 0x228   :  { %3845 = vmatmul.mubr.msk.bf16.vlgmr.msra.gmra.mrb[0].mxu1 %vm205_vm2, %v309_v62  ;;  %v282_v58 = vmul.f32 %v4409_v0, %v4874_v5  ;;  %v301_v6 = vadd.f32 %v3549_v56, %v291_v1 }
 0x229   :  { %3848 = vmatprep.mubr.msk.bf16.mxu1 %vm4693_vm0, %v4692_v3 }
 0x22a   :  { %v292_v2 = vmul.f32 %v3548_v46, %v282_v58 }
 0x22b   :  { %v4411_v4 = vpop.eup %4410 }
 0x22c   :  { %v302_v7 = vadd.f32 %v3549_v56, %v292_v2  ;;  %v283_v8 = vmul.f32 %v4411_v4, %v4880_v11  ;;  %v3550_v11 = vld [vmem:[%s6431_s3 + $0x2] ss:$0 sm:$0xff] }
 0x22d   :  { %v4413_v9 = vpop.eup %4412 }
 0x22e   :  { %v310_v10 = vpack.c.bf16 %v302_v7, %v301_v6  ;;  %v284_v63 = vmul.f32 %v4413_v9, %v4884_v14  ;;  %v293_v12 = vmul.f32 %v3548_v46, %v283_v8 }
 0x230   :  { %3849 = vmatmul.mubr.msk.bf16.gmra.mrb[4].mxu1 %vm205_vm2, %v310_v10  ;;  %v294_v13 = vmul.f32 %v3548_v46, %v284_v63  ;;  %v303_v15 = vadd.f32 %v3549_v56, %v293_v12 }
 0x231   :  { %3852 = vmatprep.mubr.msk.bf16.mxu1 %vm4693_vm0, %v4692_v3 }
 0x232   :  { %v304_v5 = vadd.f32 %v3549_v56, %v294_v13 }
 0x234   :  { %v311_v16 = vpack.c.bf16 %v304_v5, %v303_v15 }
 0x238   :  { %3853 = vmatmul.mubr.msk.bf16.gmra.mrb[8].mxu1 %vm205_vm2, %v311_v16 }
 0x239   :  { %3862 = vmatprep.mubr.msk.bf16.mxu1 %vm4693_vm0, %v4692_v3 }
 0x2fb   :  { %v362_v14 = vpop.f32.mrb[0].mxu1 }
 0x2fc   :  { %v3846_v17 = vpop.f32.mrb[1].mxu1  ;;  %v363_v19 = vadd.f32 %v3550_v11, %v362_v14 }
 0x2fd   :  { %v365_v18 = vpop.f32.mrb[2].mxu1 }
 0x2fe   :  { %v366_v20 = vadd.f32 %v3550_v11, %v365_v18  ;;  %v3847_v21 = vpop.f32.mrb[3].mxu1 }
 0x300   :  { %v4929_v22 = vpack.c.bf16 %v366_v20, %v363_v19  ;;  %v41_v20 = vlaneseq }
 0x302   :  { %391 = vrot.lane.b32.xlu0 %v4929_v22, %s4694_s17  ;;  %v42_v21 = vand.u32 127, %v41_v20 }
 0x303   :  { %v370_v23 = vpop.f32.mrb[4].mxu1 }
 0x304   :  { %v3850_v24 = vpop.f32.mrb[5].mxu1  ;;  %v371_v27 = vadd.f32 %v3550_v11, %v370_v23  ;;  %vm62_vm4 = vcmp.lt.s32.totalorder %v42_v21, 17  ;;  %v4704_v23 = vmov -1e+30   ;;  %vm88_vm6 = vcmp.ge.s32.totalorder %v42_v21, 24 }
 0x305   :  { %v373_v26 = vpop.f32.mrb[6].mxu1  ;;  %v5065_v24 = vsel %vm62_vm4, 0.0, %v4704_v23  ;;  %vm89_vm7 = vcmp.lt.s32.totalorder %v42_v21, 41 }
 0x306   :  { %v374_v29 = vadd.f32 %v3550_v11, %v373_v26  ;;  %v3851_v30 = vpop.f32.mrb[7].mxu1  ;;  %vm90_vm8 = vmand %vm88_vm6, %vm89_vm7 }
 0x308   :  { %v4933_v31 = vpack.c.bf16 %v374_v29, %v371_v27 }
 0x30a   :  { %481 = vrot.lane.b32.xlu0 %v4933_v31, %s4695_s18  ;;  %393 = vrot.lane.b32.xlu1 %v4933_v31, %s4694_s17 }
 0x30b   :  { %v378_v32 = vpop.f32.mrb[8].mxu1 }
 0x30c   :  { %v3854_v33 = vpop.f32.mrb[9].mxu1  ;;  %v379_v36 = vadd.f32 %v3550_v11, %v378_v32 }
 0x30d   :  { %v381_v34 = vpop.f32.mrb[10].mxu1 }
 0x30e   :  { %v382_v37 = vadd.f32 %v3550_v11, %v381_v34  ;;  %566 = vrot.lane.b32.xlu0 %v4929_v22, %s4696_s0  ;;  %479 = vrot.lane.b32.xlu1 %v4929_v22, %s4695_s18  ;;  %v3855_v39 = vpop.f32.mrb[11].mxu1 }
 0x310   :  { %v4943_v40 = vpack.c.bf16 %v382_v37, %v379_v36 }
 0x312   :  { %568 = vrot.lane.b32.xlu0 %v4933_v31, %s4696_s0  ;;  %395 = vrot.lane.b32.xlu1 %v4943_v40, %s4694_s17 }
 0x316   :  { %475 = vrot.lane.b32.xlu0 %v4933_v31, %s4697_s19  ;;  %483 = vrot.lane.b32.xlu1 %v4943_v40, %s4695_s18 }
 0x31a   :  { %655 = vrot.lane.b32.xlu0 %v4933_v31, %s4698_s20  ;;  %473 = vrot.lane.b32.xlu1 %v4929_v22, %s4697_s19 }
 0x31e   :  { %560 = vrot.lane.b32.xlu0 %v4929_v22, %s4699_s21  ;;  %653 = vrot.lane.b32.xlu1 %v4929_v22, %s4698_s20 }
 0x322   :  { %562 = vrot.lane.b32.xlu0 %v4933_v31, %s4699_s21  ;;  %570 = vrot.lane.b32.xlu1 %v4943_v40, %s4696_s0 }
 0x326   :  { %564 = vrot.lane.b32.xlu0 %v4943_v40, %s4699_s21  ;;  %477 = vrot.lane.b32.xlu1 %v4943_v40, %s4697_s19 }
 0x32a   :  { %651 = vrot.lane.b32.xlu0 %v4943_v40, %s4700_s22  ;;  %657 = vrot.lane.b32.xlu1 %v4943_v40, %s4698_s20 }
 0x32e   :  { %1104 = vrot.lane.b32.xlu0 %v4929_v22, %s4701_s23  ;;  %647 = vrot.lane.b32.xlu1 %v4929_v22, %s4700_s22 }
 0x332   :  { %1108 = vrot.lane.b32.xlu0 %v4943_v40, %s4701_s23  ;;  %649 = vrot.lane.b32.xlu1 %v4933_v31, %s4700_s22 }
 0x336   :  { %1026 = vrot.lane.b32.xlu1 %v4929_v22, %s4702_s24 }
 0x33a   :  { %1028 = vrot.lane.b32.xlu1 %v4933_v31, %s4702_s24 }
 0x33e   :  { %1106 = vrot.lane.b32.xlu1 %v4933_v31, %s4701_s23 }
 0x342   :  { %1182 = vrot.lane.b32.xlu1 %v4929_v22, %s4703_s25 }
 0x346   :  { %1030 = vrot.lane.b32.xlu1 %v4943_v40, %s4702_s24 }
 0x374   :  { %v392_v41 = vpop.permute.xlu0 %391 }
 0x375   :  { %v408_v42 = vsel %vm397_vm3, %v392_v41, 0 }
 0x376   :  { %3857 = vmatpush3.bf16.xpose.msra.mxu1 %v408_v42 }
 0x377   :  { %3858 = vmatprep.subr.bf16.mxu1 %v4692_v3 }
 0x37c   :  { %v482_v43 = vpop.permute.xlu0 %481  ;;  %v394_v44 = vpop.permute.xlu1 %393 }
 0x37d   :  { %v411_v46 = vsel %vm397_vm3, %v394_v44, 0  ;;  %v498_v56 = vsel %vm397_vm3, %v482_v43, 0 }
 0x37e   :  { %3859 = vmatpush3.bf16.xpose.msra.mxu1 %v411_v46 }
 0x37f   :  { %3860 = vmatprep.subr.bf16.mxu1 %v4692_v3 }
 0x380   :  { %v480_v47 = vpop.permute.xlu1 %479  ;;  %v567_v49 = vpop.permute.xlu0 %566 }
 0x381   :  { %v495_v50 = vsel %vm397_vm3, %v480_v47, 0  ;;  %v582_v57 = vsel %vm397_vm3, %v567_v49, 0 }
 0x382   :  { %3875 = vmatpush3.bf16.xpose.msra.mxu0 %v495_v50 }
 0x383   :  { %3876 = vmatprep.subr.bf16.mxu0 %v4692_v3 }
 0x384   :  { %v396_v51 = vpop.permute.xlu1 %395  ;;  %v569_v53 = vpop.permute.xlu0 %568 }
 0x385   :  { %v414_v52 = vsel %vm397_vm3, %v396_v51, 0  ;;  %v585_v58 = vsel %vm397_vm3, %v569_v53, 0 }
 0x386   :  { %3861 = vmatpush3.bf16.xpose.msra.mxu1 %v414_v52 }
 0x387   :  { %3892 = vmatprep.subr.bf16.mxu1 %v4692_v3 }
 0x388   :  { %v484_v55 = vpop.permute.xlu1 %483  ;;  %v476_v59 = vpop.permute.xlu0 %475 }
 0x389   :  { %v501_v61 = vsel %vm397_vm3, %v484_v55, 0 }
 0x38a   :  { %3877 = vmatpush3.bf16.xpose.msra.mxu0 %v498_v56 }
 0x38b   :  { %3878 = vmatprep.subr.bf16.mxu0 %v4692_v3 }
 0x38c   :  { %v474_v54 = vpop.permute.xlu1 %473  ;;  %v656_v62 = vpop.permute.xlu0 %655 }
 0x38d   :  { %3863 = vmatmul.mubr.msk.bf16.vlgmr.msra.gmra.mrb[12].mxu1 %vm397_vm3, %v4929_v22  ;;  %v672_v10 = vsel %vm397_vm3, %v656_v62, 0 }
 0x38e   :  { %3893 = vmatpush3.bf16.xpose.msra.mxu1 %v582_v57  ;;  %3866 = vmatprep.mubr.msk.bf16.mxu1 %vm4693_vm0, %v4692_v3 }
 0x38f   :  { %3894 = vmatprep.subr.bf16.mxu1 %v4692_v3 }
 0x390   :  { %v654_v60 = vpop.permute.xlu1 %653  ;;  %v561_v2 = vpop.permute.xlu0 %560 }
 0x391   :  { %v669_v4 = vsel %vm397_vm3, %v654_v60, 0 }
 0x392   :  { %3879 = vmatpush3.bf16.xpose.msra.mxu0 %v501_v61 }
 0x393   :  { %3910 = vmatprep.subr.bf16.mxu0 %v4692_v3 }
 0x394   :  { %v571_v0 = vpop.permute.xlu1 %570  ;;  %v563_v8 = vpop.permute.xlu0 %562 }
 0x395   :  { %3867 = vmatmul.mubr.msk.bf16.gmra.mrb[16].mxu1 %vm397_vm3, %v4933_v31  ;;  %v588_v7 = vsel %vm397_vm3, %v571_v0, 0 }
 0x396   :  { %3895 = vmatpush3.bf16.xpose.msra.mxu1 %v585_v58  ;;  %3870 = vmatprep.mubr.msk.bf16.mxu1 %vm4693_vm0, %v4692_v3 }
 0x397   :  { %3896 = vmatprep.subr.bf16.mxu1 %v4692_v3 }
 0x398   :  { %v478_v1 = vpop.permute.xlu1 %477  ;;  %v565_v12 = vpop.permute.xlu0 %564 }
 0x399   :  { %3881 = vmatmul.mubr.msk.bf16.vlgmr.msra.gmra.mrb[12].mxu0 %vm397_vm3, %v474_v54 }
 0x39a   :  { %3911 = vmatpush3.bf16.xpose.msra.mxu0 %v669_v4  ;;  %3884 = vmatprep.mubr.msk.bf16.mxu0 %vm4693_vm0, %v4692_v3 }
 0x39b   :  { %3912 = vmatprep.subr.bf16.mxu0 %v4692_v3 }
 0x39c   :  { %v658_v6 = vpop.permute.xlu1 %657  ;;  %v652_v15 = vpop.permute.xlu0 %651 }
 0x39d   :  { %3871 = vmatmul.mubr.msk.bf16.gmra.mrb[20].mxu1 %vm397_vm3, %v4943_v40  ;;  %v675_v13 = vsel %vm397_vm3, %v658_v6, 0 }
 0x39e   :  { %3897 = vmatpush3.bf16.xpose.msra.mxu1 %v588_v7  ;;  %3898 = vmatprep.mubr.msk.bf16.mxu1 %vm4693_vm0, %v4692_v3 }
 0x39f   :  { %4288 = vmatprep.subr.bf16.mxu1 %v4692_v3 }
 0x3a0   :  { %v648_v9 = vpop.permute.xlu1 %647  ;;  %v1105_v11 = vpop.permute.xlu0 %1104 }
 0x3a1   :  { %3885 = vmatmul.mubr.msk.bf16.gmra.mrb[16].mxu0 %vm397_vm3, %v476_v59  ;;  %v5090_v59 = vsel %vm90_vm8, 0.0, %v4704_v23 }
 0x3a2   :  { %3913 = vmatpush3.bf16.xpose.msra.mxu0 %v672_v10  ;;  %3888 = vmatprep.mubr.msk.bf16.mxu0 %vm4693_vm0, %v4692_v3 }
 0x3a3   :  { %3914 = vmatprep.subr.bf16.mxu0 %v4692_v3 }
 0x3a4   :  { %v650_v63 = vpop.permute.xlu1 %649  ;;  %v1109_v17 = vpop.permute.xlu0 %1108 }
 0x3a5   :  { %3899 = vmatmul.mubr.msk.bf16.vlgmr.msra.gmra.mrb[24].mxu1 %vm397_vm3, %v561_v2 }
 0x3a6   :  { %4291 = vmatpush3.bf16.xpose.msra.mxu1 %v669_v4  ;;  %3902 = vmatprep.mubr.msk.bf16.mxu1 %vm4693_vm0, %v4692_v3 }
 0x3a7   :  { %4289 = vmatprep.subr.bf16.mxu1 %v4692_v3 }
 0x3a8   :  { %v1027_v5 = vpop.permute.xlu1 %1026 }
 0x3a9   :  { %3889 = vmatmul.mubr.msk.bf16.gmra.mrb[20].mxu0 %vm397_vm3, %v478_v1 }
 0x3aa   :  { %3915 = vmatpush3.bf16.xpose.msra.mxu0 %v675_v13  ;;  %3916 = vmatprep.mubr.msk.bf16.mxu0 %vm4693_vm0, %v4692_v3 }
 0x3ab   :  { %3946 = vmatprep.subr.bf16.mxu0 %v4692_v3 }
 0x3ac   :  { %v1029_v16 = vpop.permute.xlu1 %1028 }
 0x3ad   :  { %3903 = vmatmul.mubr.msk.bf16.gmra.mrb[28].mxu1 %vm397_vm3, %v563_v8 }
 0x3ae   :  { %4292 = vmatpush3.bf16.xpose.msra.mxu1 %v672_v10  ;;  %3906 = vmatprep.mubr.msk.bf16.mxu1 %vm4693_vm0, %v4692_v3 }
 0x3af   :  { %4290 = vmatprep.subr.bf16.mxu1 %v4692_v3 }
 0x3b0   :  { %v1107_v14 = vpop.permute.xlu1 %1106 }
 0x3b1   :  { %3917 = vmatmul.mubr.msk.bf16.vlgmr.msra.gmra.mrb[24].mxu0 %vm397_vm3, %v648_v9 }
 0x3b2   :  { %3947 = vmatpush3.bf16.msra.mxu0 %v1105_v11  ;;  %3920 = vmatprep.mubr.msk.bf16.mxu0 %vm4693_vm0, %v4692_v3 }
 0x3b3   :  { %3948 = vmatprep.subr.bf16.mxu0 %v4692_v3 }
 0x3b4   :  { %v5060_v18 = vpop.permute.xlu1 %1182 }
 0x3b5   :  { %3907 = vmatmul.mubr.msk.bf16.gmra.mrb[32].mxu1 %vm397_vm3, %v565_v12 }
 0x3b6   :  { %4293 = vmatpush3.bf16.xpose.msra.mxu1 %v675_v13  ;;  %3949 = vmatpush3.bf16.msra.mxu0 %v1107_v14 }
 0x3b7   :  { %3950 = vmatprep.subr.bf16.mxu0 %v4692_v3  ;;  %3924 = vmatprep.mubr.msk.bf16.mxu1 %vm4693_vm0, %v4692_v3 }
 0x3b8   :  { %3928 = vmatprep.subr.bf16.mxu1 %v4692_v3  ;;  %v1031_v19 = vpop.permute.xlu1 %1030 }
 0x3b9   :  { %3921 = vmatmul.mubr.msk.bf16.gmra.mrb[28].mxu0 %vm397_vm3, %v650_v63 }
 0x3ba   :  { %3951 = vmatpush3.bf16.msra.mxu0 %v1109_v17  ;;  %3952 = vmatprep.mubr.msk.bf16.mxu0 %vm4693_vm0, %v4692_v3 }
 0x3bb   :  { %3982 = vmatprep.subr.bf16.mxu0 %v4692_v3 }
 0x3bd   :  { %3925 = vmatmul.mubr.msk.bf16.vlgmr.msra.gmra.mrb[36].mxu1 %vm397_vm3, %v652_v15 }
 0x3be   :  { %3929 = vmatpush3.bf16.msra.mxu1 %v1027_v5  ;;  %3934 = vmatprep.mubr.msk.bf16.mxu1 %vm4693_vm0, %v4692_v3 }
 0x3bf   :  { %3930 = vmatprep.subr.bf16.mxu1 %v4692_v3 }
 0x3c2   :  { %3931 = vmatpush3.bf16.msra.mxu1 %v1029_v16 }
 0x3c3   :  { %3932 = vmatprep.subr.bf16.mxu1 %v4692_v3 }
 0x3c6   :  { %3933 = vmatpush3.bf16.msra.mxu1 %v1031_v19 }
 0x3c7   :  { %3964 = vmatprep.subr.bf16.mxu1 %v4692_v3 }
 0x460   :  { %v450_v26 = vpop.f32.mrb[12].mxu1 }
 0x461   :  { %v5068_v27 = vadd.f32 %v450_v26, %v5065_v24  ;;  %v3864_v29 = vpop.f32.mrb[13].mxu1 }
 0x462   :  { %v453_v30 = vpop.f32.mrb[14].mxu1 }
 0x463   :  { %v3865_v32 = vpop.f32.mrb[15].mxu1  ;;  %v759_v33 = vsel %vm758_vm5, %v5068_v27, -inf  ;;  %v5081_v49 = vadd.f32 %v453_v30, %v5065_v24 }
 0x464   :  { %760 = vmax.xlane.f32.xlu1 %v759_v33 }
 0x465   :  { %v762_v57 = vsel %vm758_vm5, %v5081_v49, -inf }
 0x468   :  { %v458_v34 = vpop.f32.mrb[16].mxu1 }
 0x469   :  { %v5073_v36 = vadd.f32 %v458_v34, %v5065_v24  ;;  %v3868_v37 = vpop.f32.mrb[17].mxu1 }
 0x46a   :  { %v461_v39 = vpop.f32.mrb[18].mxu1 }
 0x46b   :  { %v3869_v41 = vpop.f32.mrb[19].mxu1  ;;  %v765_v42 = vsel %vm758_vm5, %v5073_v36, -inf  ;;  %v5096_v58 = vadd.f32 %v461_v39, %v5090_v59 }
 0x46c   :  { %v537_v43 = vpop.f32.mrb[12].mxu0  ;;  %766 = vmax.xlane.f32.xlu1 %v765_v42 }
 0x46d   :  { %v5078_v44 = vadd.f32 %v537_v43, %v5065_v24  ;;  %v3882_v46 = vpop.f32.mrb[13].mxu0  ;;  %v768_v12 = vsel %vm758_vm5, %v5096_v58, -inf }
 0x46e   :  { %v540_v47 = vpop.f32.mrb[14].mxu0 }
 0x46f   :  { %v3883_v50 = vpop.f32.mrb[15].mxu0  ;;  %v777_v51 = vsel %vm758_vm5, %v5078_v44, -inf  ;;  %v5086_v56 = vadd.f32 %v540_v47, %v5065_v24 }
 0x470   :  { %v466_v52 = vpop.f32.mrb[20].mxu1  ;;  %778 = vmax.xlane.f32.xlu0 %v777_v51 }
 0x471   :  { %v3872_v53 = vpop.f32.mrb[21].mxu1  ;;  %v5099_v1 = vadd.f32 %v466_v52, %v5090_v59  ;;  %v780_v4 = vsel %vm758_vm5, %v5086_v56, -inf }
 0x472   :  { %v469_v55 = vpop.f32.mrb[22].mxu1 }
 0x473   :  { %v3873_v54 = vpop.f32.mrb[23].mxu1  ;;  %v771_v13 = vsel %vm758_vm5, %v5099_v1, -inf  ;;  %v5116_v14 = vadd.f32 %v469_v55, %v5090_v59 }
 0x474   :  { %v545_v60 = vpop.f32.mrb[16].mxu0  ;;  %763 = vmax.xlane.f32.xlu0 %v762_v57 }
 0x475   :  { %v5093_v61 = vadd.f32 %v545_v60, %v5065_v24  ;;  %v3886_v62 = vpop.f32.mrb[17].mxu0  ;;  %v774_v33 = vsel %vm758_vm5, %v5116_v14, -inf }
 0x476   :  { %v548_v0 = vpop.f32.mrb[18].mxu0 }
 0x477   :  { %v3887_v2 = vpop.f32.mrb[19].mxu0  ;;  %v783_v6 = vsel %vm758_vm5, %v5093_v61, -inf  ;;  %v5106_v10 = vadd.f32 %v548_v0, %v5090_v59 }
 0x478   :  { %v624_v7 = vpop.f32.mrb[24].mxu1  ;;  %781 = vmax.xlane.f32.xlu0 %v780_v4  ;;  %784 = vmax.xlane.f32.xlu1 %v783_v6 }
 0x479   :  { %v3900_v8 = vpop.f32.mrb[25].mxu1  ;;  %v5119_v17 = vadd.f32 %v624_v7, %v5065_v24  ;;  %v786_v20 = vsel %vm758_vm5, %v5106_v10, -inf }
 0x47a   :  { %v627_v9 = vpop.f32.mrb[26].mxu1 }
 0x47b   :  { %v3901_v63 = vpop.f32.mrb[27].mxu1  ;;  %v795_v34 = vsel %vm758_vm5, %v5119_v17, -inf  ;;  %v5136_v43 = vadd.f32 %v627_v9, %v5065_v24 }
 0x47c   :  { %v553_v5 = vpop.f32.mrb[20].mxu0  ;;  %769 = vmax.xlane.f32.xlu0 %v768_v12  ;;  %772 = vmax.xlane.f32.xlu1 %v771_v13 }
 0x47d   :  { %v5113_v15 = vadd.f32 %v553_v5, %v5090_v59  ;;  %v3890_v16 = vpop.f32.mrb[21].mxu0  ;;  %v798_v60 = vsel %vm758_vm5, %v5136_v43, -inf }
 0x47e   :  { %v556_v11 = vpop.f32.mrb[22].mxu0 }
 0x47f   :  { %v3891_v19 = vpop.f32.mrb[23].mxu0  ;;  %v789_v21 = vsel %vm758_vm5, %v5113_v15, -inf  ;;  %v5126_v30 = vadd.f32 %v556_v11, %v5090_v59 }
 0x480   :  { %v632_v23 = vpop.f32.mrb[28].mxu1  ;;  %787 = vmax.xlane.f32.xlu0 %v786_v20  ;;  %790 = vmax.xlane.f32.xlu1 %v789_v21 }
 0x481   :  { %v3904_v26 = vpop.f32.mrb[29].mxu1  ;;  %v5139_v46 = vadd.f32 %v632_v23, %v5065_v24  ;;  %v792_v50 = vsel %vm758_vm5, %v5126_v30, -inf }
 0x482   :  { %v635_v29 = vpop.f32.mrb[30].mxu1 }
 0x483   :  { %v3905_v32 = vpop.f32.mrb[31].mxu1  ;;  %v801_v62 = vsel %vm758_vm5, %v5139_v46, -inf  ;;  %v5156_v7 = vadd.f32 %v635_v29, %v5090_v59 }
 0x484   :  { %v711_v37 = vpop.f32.mrb[24].mxu0  ;;  %775 = vmax.xlane.f32.xlu0 %v774_v33  ;;  %796 = vmax.xlane.f32.xlu1 %v795_v34 }
 0x485   :  { %v5133_v39 = vadd.f32 %v711_v37, %v5065_v24  ;;  %v3918_v41 = vpop.f32.mrb[25].mxu0  ;;  %v804_v21 = vsel %vm758_vm5, %v5156_v7, -inf }
 0x486   :  { %v714_v42 = vpop.f32.mrb[26].mxu0 }
 0x487   :  { %v3919_v47 = vpop.f32.mrb[27].mxu0  ;;  %v813_v51 = vsel %vm758_vm5, %v5133_v39, -inf  ;;  %v5146_v54 = vadd.f32 %v714_v42, %v5065_v24 }
 0x488   :  { %v640_v52 = vpop.f32.mrb[32].mxu1  ;;  %793 = vmax.xlane.f32.xlu0 %v792_v50  ;;  %814 = vmax.xlane.f32.xlu1 %v813_v51 }
 0x489   :  { %v3908_v53 = vpop.f32.mrb[33].mxu1  ;;  %v5159_v8 = vadd.f32 %v640_v52, %v5090_v59  ;;  %v816_v63 = vsel %vm758_vm5, %v5146_v54, -inf }
 0x48a   :  { %v643_v55 = vpop.f32.mrb[34].mxu1 }
 0x48b   :  { %v3909_v57 = vpop.f32.mrb[35].mxu1  ;;  %v807_v23 = vsel %vm758_vm5, %v5159_v8, -inf  ;;  %v5176_v26 = vadd.f32 %v643_v55, %v5090_v59 }
 0x48c   :  { %v719_v0 = vpop.f32.mrb[28].mxu0  ;;  %799 = vmax.xlane.f32.xlu0 %v798_v60  ;;  %802 = vmax.xlane.f32.xlu1 %v801_v62 }
 0x48d   :  { %v5153_v2 = vadd.f32 %v719_v0, %v5065_v24  ;;  %v3922_v4 = vpop.f32.mrb[29].mxu0  ;;  %v810_v34 = vsel %vm758_vm5, %v5176_v26, -inf }
 0x48e   :  { %v722_v6 = vpop.f32.mrb[30].mxu0 }
 0x48f   :  { %v3923_v9 = vpop.f32.mrb[31].mxu0  ;;  %v819_v12 = vsel %vm758_vm5, %v5153_v2, -inf  ;;  %v5166_v11 = vadd.f32 %v722_v6, %v5090_v59 }
 0x490   :  { %v727_v13 = vpop.f32.mrb[36].mxu1  ;;  %817 = vmax.xlane.f32.xlu0 %v816_v63  ;;  %820 = vmax.xlane.f32.xlu1 %v819_v12 }
 0x491   :  { %v3926_v5 = vpop.f32.mrb[37].mxu1  ;;  %v5169_v19 = vadd.f32 %v727_v13, %v5090_v59  ;;  %v822_v29 = vsel %vm758_vm5, %v5166_v11, -inf }
 0x492   :  { %v730_v16 = vpop.f32.mrb[38].mxu1 }
 0x493   :  { %v3927_v20 = vpop.f32.mrb[39].mxu1  ;;  %v825_v32 = vsel %vm758_vm5, %v5169_v19, -inf  ;;  %v5183_v33 = vadd.f32 %v730_v16, %v5090_v59 }
 0x494   :  { %805 = vmax.xlane.f32.xlu0 %v804_v21  ;;  %808 = vmax.xlane.f32.xlu1 %v807_v23 }
 0x495   :  { %v828_v37 = vsel %vm758_vm5, %v5183_v33, -inf }
 0x498   :  { %823 = vmax.xlane.f32.xlu0 %v822_v29  ;;  %826 = vmax.xlane.f32.xlu1 %v825_v32 }
 0x49c   :  { %811 = vmax.xlane.f32.xlu0 %v810_v34 }
 0x4a0   :  { %829 = vmax.xlane.f32.xlu0 %v828_v37 }
 0x4a9   :  { %1184 = vrot.lane.b32.xlu1 %v4933_v31, %s4703_s25 }
 0x4ad   :  { %1262 = vrot.lane.b32.xlu1 %v4933_v31, %s4705_s1 }
 0x4b6   :  { %1260 = vrot.lane.b32.xlu0 %v4929_v22, %s4705_s1 }
 0x4f1   :  { %v761_v41 = vpop.xlane.xlu1 %760 }
 0x4f2   :  { %v831_v42 = vsub.f32 %v5068_v27, %v761_v41 }
 0x4f4   :  { %v855_v47 = vmul.f32 1.442695, %v831_v42 }
 0x4f6   :  { %4414 = vpow2.f32 %v855_v47 }
 0x4f9   :  { %v767_v50 = vpop.xlane.xlu1 %766 }
 0x4fa   :  { %v833_v51 = vsub.f32 %v5073_v36, %v767_v50 }
 0x4fc   :  { %v859_v57 = vmul.f32 1.442695, %v833_v51 }
 0x4fd   :  { %v779_v52 = vpop.xlane.xlu0 %778 }
 0x4fe   :  { %v837_v53 = vsub.f32 %v5078_v44, %v779_v52 }
 0x500   :  { %v5198_v55 = vpop.eup %4414  ;;  %v867_v60 = vmul.f32 1.442695, %v837_v53 }
 0x501   :  { %v764_v62 = vpop.xlane.xlu0 %763  ;;  %v903_v31 = vsel %vm758_vm5, %v5198_v55, 0.0 }
 0x502   :  { %4416 = vpow2.f32 %v867_v60  ;;  %v832_v22 = vsub.f32 %v5081_v49, %v764_v62  ;;  %904 = vadd.xlane.f32.xlu1 %v903_v31 }
 0x503   :  { %4418 = vpow2.f32 %v859_v57 }
 0x504   :  { %v857_v27 = vmul.f32 1.442695, %v832_v22 }
 0x505   :  { %v782_v0 = vpop.xlane.xlu0 %781  ;;  %v785_v4 = vpop.xlane.xlu1 %784 }
 0x506   :  { %4420 = vpow2.f32 %v857_v27  ;;  %v838_v36 = vsub.f32 %v5086_v56, %v782_v0  ;;  %v839_v44 = vsub.f32 %v5093_v61, %v785_v4 }
 0x508   :  { %v869_v6 = vmul.f32 1.442695, %v838_v36  ;;  %v871_v9 = vmul.f32 1.442695, %v839_v44 }
 0x509   :  { %v770_v63 = vpop.xlane.xlu0 %769  ;;  %v773_v12 = vpop.xlane.xlu1 %772 }
 0x50a   :  { %4422 = vpow2.f32 %v869_v6  ;;  %v834_v13 = vsub.f32 %v5096_v58, %v770_v63  ;;  %v835_v5 = vsub.f32 %v5099_v1, %v773_v12 }
 0x50b   :  { %4424 = vpow2.f32 %v871_v9 }
 0x50c   :  { %v5207_v49 = vpop.eup %4416  ;;  %v861_v16 = vmul.f32 1.442695, %v834_v13  ;;  %v863_v20 = vmul.f32 1.442695, %v835_v5 }
 0x50d   :  { %v788_v21 = vpop.xlane.xlu0 %787  ;;  %v791_v23 = vpop.xlane.xlu1 %790  ;;  %v921_v56 = vsel %vm758_vm5, %v5207_v49, 0.0 }
 0x50e   :  { %v5211_v61 = vpop.eup %4418  ;;  %4426 = vpow2.f32 %v861_v16  ;;  %v840_v29 = vsub.f32 %v5106_v10, %v788_v21  ;;  %v841_v32 = vsub.f32 %v5113_v15, %v791_v23  ;;  %922 = vadd.xlane.f32.xlu1 %v921_v56 }
 0x50f   :  { %4428 = vpow2.f32 %v863_v20  ;;  %v909_v47 = vsel %vm758_vm5, %v5211_v61, 0.0 }
 0x510   :  { %v5215_v58 = vpop.eup %4420  ;;  %v873_v1 = vmul.f32 1.442695, %v840_v29  ;;  %v875_v34 = vmul.f32 1.442695, %v841_v32 }
 0x511   :  { %v776_v37 = vpop.xlane.xlu0 %775  ;;  %v797_v41 = vpop.xlane.xlu1 %796  ;;  %v906_v42 = vsel %vm758_vm5, %v5215_v58, 0.0 }
 0x512   :  { %4430 = vpow2.f32 %v873_v1  ;;  %v836_v50 = vsub.f32 %v5116_v14, %v776_v37  ;;  %v843_v10 = vsub.f32 %v5119_v17, %v797_v41  ;;  %907 = vadd.xlane.f32.xlu0 %v906_v42  ;;  %910 = vadd.xlane.f32.xlu1 %v909_v47 }
 0x513   :  { %4432 = vpow2.f32 %v875_v34 }
 0x514   :  { %v5223_v15 = vpop.eup %4422  ;;  %v865_v51 = vmul.f32 1.442695, %v836_v50  ;;  %v879_v52 = vmul.f32 1.442695, %v843_v10 }
 0x515   :  { %v5225_v53 = vpop.eup %4424  ;;  %v794_v57 = vpop.xlane.xlu0 %793  ;;  %v924_v62 = vsel %vm758_vm5, %v5223_v15, 0.0 }
 0x516   :  { %v815_v60 = vpop.xlane.xlu1 %814  ;;  %4434 = vpow2.f32 %v865_v51  ;;  %v842_v31 = vsub.f32 %v5126_v30, %v794_v57  ;;  %925 = vadd.xlane.f32.xlu0 %v924_v62  ;;  %v927_v17 = vsel %vm758_vm5, %v5225_v53, 0.0 }
 0x517   :  { %v849_v14 = vsub.f32 %v5133_v39, %v815_v60  ;;  %4436 = vpow2.f32 %v879_v52  ;;  %928 = vadd.xlane.f32.xlu1 %v927_v17 }
 0x518   :  { %v5233_v22 = vpop.eup %4426  ;;  %v877_v27 = vmul.f32 1.442695, %v842_v31 }
 0x519   :  { %v891_v0 = vmul.f32 1.442695, %v849_v14  ;;  %v5235_v4 = vpop.eup %4428  ;;  %v800_v36 = vpop.xlane.xlu0 %799  ;;  %v912_v6 = vsel %vm758_vm5, %v5233_v22, 0.0 }
 0x51a   :  { %v803_v44 = vpop.xlane.xlu1 %802  ;;  %4438 = vpow2.f32 %v877_v27  ;;  %v844_v30 = vsub.f32 %v5136_v43, %v800_v36  ;;  %913 = vadd.xlane.f32.xlu0 %v912_v6  ;;  %v915_v9 = vsel %vm758_vm5, %v5235_v4, 0.0 }
 0x51b   :  { %v845_v39 = vsub.f32 %v5139_v46, %v803_v44  ;;  %916 = vadd.xlane.f32.xlu1 %v915_v9  ;;  %4440 = vpow2.f32 %v891_v0 }
 0x51c   :  { %v5243_v63 = vpop.eup %4430  ;;  %v881_v12 = vmul.f32 1.442695, %v844_v30 }
 0x51d   :  { %v883_v13 = vmul.f32 1.442695, %v845_v39  ;;  %v5245_v5 = vpop.eup %4432  ;;  %v818_v16 = vpop.xlane.xlu0 %817  ;;  %v930_v21 = vsel %vm758_vm5, %v5243_v63, 0.0 }
 0x51e   :  { %v821_v20 = vpop.xlane.xlu1 %820  ;;  %v850_v43 = vsub.f32 %v5146_v54, %v818_v16  ;;  %931 = vadd.xlane.f32.xlu0 %v930_v21  ;;  %v933_v23 = vsel %vm758_vm5, %v5245_v5, 0.0 }
 0x51f   :  { %v851_v46 = vsub.f32 %v5153_v2, %v821_v20  ;;  %4442 = vpow2.f32 %v883_v13  ;;  %934 = vadd.xlane.f32.xlu1 %v933_v23 }
 0x520   :  { %v5253_v56 = vpop.eup %4434  ;;  %4444 = vpow2.f32 %v881_v12  ;;  %v893_v29 = vmul.f32 1.442695, %v850_v43 }
 0x521   :  { %v895_v32 = vmul.f32 1.442695, %v851_v46  ;;  %v5255_v1 = vpop.eup %4436  ;;  %v806_v34 = vpop.xlane.xlu0 %805  ;;  %v918_v54 = vsel %vm758_vm5, %v5253_v56, 0.0 }
 0x522   :  { %v809_v37 = vpop.xlane.xlu1 %808  ;;  %v846_v2 = vsub.f32 %v5156_v7, %v806_v34  ;;  %919 = vadd.xlane.f32.xlu0 %v918_v54  ;;  %v939_v42 = vsel %vm758_vm5, %v5255_v1, 0.0 }
 0x523   :  { %v847_v41 = vsub.f32 %v5159_v8, %v809_v37  ;;  %4446 = vpow2.f32 %v895_v32  ;;  %940 = vadd.xlane.f32.xlu1 %v939_v42 }
 0x524   :  { %v5263_v47 = vpop.eup %4438  ;;  %4448 = vpow2.f32 %v893_v29  ;;  %v885_v50 = vmul.f32 1.442695, %v846_v2 }
 0x525   :  { %v887_v10 = vmul.f32 1.442695, %v847_v41  ;;  %v824_v51 = vpop.xlane.xlu0 %823  ;;  %v936_v57 = vsel %vm758_vm5, %v5263_v47, 0.0  ;;  %v5267_v60 = vpop.eup %4440 }
 0x526   :  { %v827_v52 = vpop.xlane.xlu1 %826  ;;  %v852_v7 = vsub.f32 %v5166_v11, %v824_v51  ;;  %937 = vadd.xlane.f32.xlu0 %v936_v57  ;;  %v957_v27 = vsel %vm758_vm5, %v5267_v60, 0.0 }
 0x527   :  { %v853_v8 = vsub.f32 %v5169_v19, %v827_v52  ;;  %4450 = vpow2.f32 %v887_v10 }
 0x528   :  { %4452 = vpow2.f32 %v885_v50  ;;  %v897_v62 = vmul.f32 1.442695, %v852_v7 }
 0x529   :  { %v899_v31 = vmul.f32 1.442695, %v853_v8  ;;  %v5271_v14 = vpop.eup %4442  ;;  %v812_v17 = vpop.xlane.xlu0 %811 }
 0x52a   :  { %v5275_v0 = vpop.eup %4444  ;;  %v848_v36 = vsub.f32 %v5176_v26, %v812_v17  ;;  %958 = vadd.xlane.f32.xlu0 %v957_v27  ;;  %v945_v11 = vsel %vm758_vm5, %v5271_v14, 0.0  ;;  %v1185_v2 = vpop.permute.xlu1 %1184 }
 0x52b   :  { %4454 = vpow2.f32 %v899_v31  ;;  %946 = vadd.xlane.f32.xlu1 %v945_v11  ;;  %v942_v30 = vsel %vm758_vm5, %v5275_v0, 0.0 }
 0x52c   :  { %4456 = vpow2.f32 %v897_v62  ;;  %v889_v19 = vmul.f32 1.442695, %v848_v36 }
 0x52d   :  { %v5280_v44 = vpop.eup %4446  ;;  %v830_v6 = vpop.xlane.xlu0 %829 }
 0x52e   :  { %v5284_v39 = vpop.eup %4448  ;;  %v854_v9 = vsub.f32 %v5183_v33, %v830_v6  ;;  %943 = vadd.xlane.f32.xlu0 %v942_v30  ;;  %v963_v26 = vsel %vm758_vm5, %v5280_v44, 0.0  ;;  %4458 = vpow2.f32 %v889_v19  ;;  %v1263_v41 = vpop.permute.xlu1 %1262 }
 0x52f   :  { %964 = vadd.xlane.f32.xlu1 %v963_v26  ;;  %v960_v16 = vsel %vm758_vm5, %v5284_v39, 0.0 }
 0x530   :  { %v901_v12 = vmul.f32 1.442695, %v854_v9 }
 0x531   :  { %v5289_v13 = vpop.eup %4450  ;;  %v1261_v50 = vpop.permute.xlu0 %1260 }
 0x532   :  { %v5293_v20 = vpop.eup %4452  ;;  %961 = vadd.xlane.f32.xlu0 %v960_v16  ;;  %v951_v21 = vsel %vm758_vm5, %v5289_v13, 0.0  ;;  %4460 = vpow2.f32 %v901_v12 }
 0x533   :  { %952 = vadd.xlane.f32.xlu1 %v951_v21  ;;  %v948_v43 = vsel %vm758_vm5, %v5293_v20, 0.0 }
 0x535   :  { %v5297_v33 = vpop.eup %4454 }
 0x536   :  { %v5301_v46 = vpop.eup %4456  ;;  %949 = vadd.xlane.f32.xlu0 %v948_v43  ;;  %v969_v23 = vsel %vm758_vm5, %v5297_v33, 0.0 }
 0x537   :  { %970 = vadd.xlane.f32.xlu1 %v969_v23  ;;  %v966_v29 = vsel %vm758_vm5, %v5301_v46, 0.0 }
 0x538   :  { %v5307_v32 = vpop.eup %4458 }
 0x539   :  { %v954_v34 = vsel %vm758_vm5, %v5307_v32, 0.0 }
 0x53a   :  { %967 = vadd.xlane.f32.xlu0 %v966_v29 }
 0x53c   :  { %v5311_v37 = vpop.eup %4460 }
 0x53d   :  { %v972_v54 = vsel %vm758_vm5, %v5311_v37, 0.0 }
 0x53e   :  { %955 = vadd.xlane.f32.xlu0 %v954_v34 }
 0x542   :  { %973 = vadd.xlane.f32.xlu0 %v972_v54 }
 0x548   :  { %1186 = vrot.lane.b32.xlu1 %v4943_v40, %s4703_s25 }
 0x558   :  { %1264 = vrot.lane.b32.xlu0 %v4943_v40, %s4705_s1 }
 0x58f   :  { %v905_v42 = vpop.xlane.xlu1 %904 }
 0x590   :  { %4462 = vrcp.f32 %v905_v42 }
 0x59a   :  { %v4463_v62 = vpop.eup %4462 }
 0x59b   :  { %v923_v10 = vpop.xlane.xlu1 %922  ;;  %v999_v40 = vmul.f32 %v4463_v62, %v5198_v55 }
 0x59f   :  { %v908_v51 = vpop.xlane.xlu0 %907  ;;  %v911_v52 = vpop.xlane.xlu1 %910 }
 0x5a0   :  { %4464 = vrcp.f32 %v908_v51 }
 0x5a1   :  { %4466 = vrcp.f32 %v923_v10 }
 0x5a3   :  { %v926_v57 = vpop.xlane.xlu0 %925 }
 0x5a4   :  { %4468 = vrcp.f32 %v926_v57  ;;  %v929_v7 = vpop.xlane.xlu1 %928 }
 0x5a5   :  { %4470 = vrcp.f32 %v911_v52 }
 0x5a7   :  { %v914_v8 = vpop.xlane.xlu0 %913 }
 0x5a8   :  { %4472 = vrcp.f32 %v914_v8  ;;  %v917_v31 = vpop.xlane.xlu1 %916 }
 0x5a9   :  { %4474 = vrcp.f32 %v929_v7 }
 0x5aa   :  { %v4465_v17 = vpop.eup %4464 }
 0x5ab   :  { %v1000_v27 = vmul.f32 %v4465_v17, %v5215_v58  ;;  %v932_v36 = vpop.xlane.xlu0 %931  ;;  %v4467_v11 = vpop.eup %4466 }
 0x5ac   :  { %4476 = vrcp.f32 %v932_v36  ;;  %v935_v30 = vpop.xlane.xlu1 %934  ;;  %v1005_v9 = vmul.f32 %v4467_v11, %v5207_v49 }
 0x5ad   :  { %v1023_v19 = vpack.c.bf16 %v1000_v27, %v999_v40  ;;  %4478 = vrcp.f32 %v917_v31 }
 0x5ae   :  { %v4469_v6 = vpop.eup %4468 }
 0x5af   :  { %v1006_v26 = vmul.f32 %v4469_v6, %v5223_v15  ;;  %v920_v12 = vpop.xlane.xlu0 %919  ;;  %3935 = vmatmul.mubr.msk.bf16.vlgmr.msra.gmra.mrb[40].mxu1 %vm758_vm5, %v1023_v19  ;;  %v4471_v16 = vpop.eup %4470 }
 0x5b0   :  { %4480 = vrcp.f32 %v920_v12  ;;  %3965 = vmatpush3.bf16.msra.mxu1 %v5060_v18  ;;  %3938 = vmatprep.mubr.msk.bf16.mxu1 %vm4693_vm0, %v4692_v3  ;;  %v1001_v49 = vmul.f32 %v4471_v16, %v5211_v61  ;;  %v941_v23 = vpop.xlane.xlu1 %940 }
 0x5b1   :  { %v1101_v55 = vpack.c.bf16 %v1006_v26, %v1005_v9  ;;  %3966 = vmatprep.subr.bf16.mxu1 %v4692_v3  ;;  %4482 = vrcp.f32 %v935_v30 }
 0x5b2   :  { %v4473_v58 = vpop.eup %4472 }
 0x5b3   :  { %v938_v21 = vpop.xlane.xlu0 %937  ;;  %3953 = vmatmul.mubr.msk.bf16.vlgmr.msra.gmra.mrb[32].mxu0 %vm758_vm5, %v1101_v55  ;;  %v1002_v15 = vmul.f32 %v4473_v58, %v5233_v22  ;;  %v4475_v43 = vpop.eup %4474 }
 0x5b4   :  { %4484 = vrcp.f32 %v938_v21  ;;  %3967 = vmatpush3.bf16.msra.mxu1 %v1185_v2  ;;  %3983 = vmatpush3.bf16.msra.mxu0 %v1261_v50  ;;  %v1007_v61 = vmul.f32 %v4475_v43, %v5225_v53 }
 0x5b5   :  { %3984 = vmatprep.subr.bf16.mxu0 %v4692_v3  ;;  %v1024_v18 = vpack.c.bf16 %v1002_v15, %v1001_v49  ;;  %3956 = vmatprep.mubr.msk.bf16.mxu0 %vm4693_vm0, %v4692_v3  ;;  %4486 = vrcp.f32 %v941_v23 }
 0x5b6   :  { %v4477_v29 = vpop.eup %4476  ;;  %3968 = vmatprep.subr.bf16.mxu1 %v4692_v3 }
 0x5b7   :  { %v959_v34 = vpop.xlane.xlu0 %958  ;;  %3939 = vmatmul.mubr.msk.bf16.gmra.mrb[44].mxu1 %vm758_vm5, %v1024_v18  ;;  %v1008_v22 = vmul.f32 %v4477_v29, %v5243_v63  ;;  %v4479_v54 = vpop.eup %4478 }
 0x5b8   :  { %3985 = vmatpush3.bf16.msra.mxu0 %v1263_v41  ;;  %v947_v2 = vpop.xlane.xlu1 %946  ;;  %3942 = vmatprep.mubr.msk.bf16.mxu1 %vm4693_vm0, %v4692_v3  ;;  %v1003_v51 = vmul.f32 %v4479_v54, %v5235_v4 }
 0x5b9   :  { %v1102_v42 = vpack.c.bf16 %v1008_v22, %v1007_v61  ;;  %3986 = vmatprep.subr.bf16.mxu0 %v4692_v3 }
 0x5ba   :  { %v4481_v50 = vpop.eup %4480 }
 0x5bb   :  { %v944_v10 = vpop.xlane.xlu0 %943  ;;  %3957 = vmatmul.mubr.msk.bf16.gmra.mrb[36].mxu0 %vm758_vm5, %v1102_v42  ;;  %v1004_v53 = vmul.f32 %v4481_v50, %v5253_v56  ;;  %v4483_v52 = vpop.eup %4482 }
 0x5bc   :  { %4488 = vrcp.f32 %v944_v10  ;;  %v965_v63 = vpop.xlane.xlu1 %964  ;;  %3960 = vmatprep.mubr.msk.bf16.mxu0 %vm4693_vm0, %v4692_v3  ;;  %v1009_v8 = vmul.f32 %v4483_v52, %v5245_v5 }
 0x5bd   :  { %v1025_v41 = vpack.c.bf16 %v1004_v53, %v1003_v51  ;;  %4490 = vrcp.f32 %v947_v2  ;;  %v1428_v2 = vld [vmem:[%s6433_s5 + $0x8] sm:$0xff] }
 0x5be   :  { %v4485_v57 = vpop.eup %4484 }
 0x5bf   :  { %v962_v7 = vpop.xlane.xlu0 %961  ;;  %3943 = vmatmul.mubr.msk.bf16.gmra.mrb[48].mxu1 %vm758_vm5, %v1025_v41  ;;  %v1010_v62 = vmul.f32 %v4485_v57, %v5263_v47  ;;  %v4487_v17 = vpop.eup %4486 }
 0x5c0   :  { %v953_v31 = vpop.xlane.xlu1 %952  ;;  %3970 = vmatprep.mubr.msk.bf16.mxu1 %vm4693_vm0, %v4692_v3  ;;  %4492 = vrcp.f32 %v962_v7  ;;  %v1011_v5 = vmul.f32 %v4487_v17, %v5255_v1 }
 0x5c1   :  { %v1103_v4 = vpack.c.bf16 %v1010_v62, %v1009_v8 }
 0x5c3   :  { %v950_v56 = vpop.xlane.xlu0 %949  ;;  %3961 = vmatmul.mubr.msk.bf16.gmra.mrb[40].mxu0 %vm758_vm5, %v1103_v4 }
 0x5c4   :  { %4494 = vrcp.f32 %v950_v56  ;;  %v971_v40 = vpop.xlane.xlu1 %970  ;;  %3988 = vmatprep.mubr.msk.bf16.mxu0 %vm4693_vm0, %v4692_v3 }
 0x5c5   :  { %4496 = vrcp.f32 %v959_v34 }
 0x5c6   :  { %v4489_v27 = vpop.eup %4488  ;;  %4498 = vrcp.f32 %v953_v31 }
 0x5c7   :  { %v1012_v47 = vmul.f32 %v4489_v27, %v5275_v0  ;;  %v968_v36 = vpop.xlane.xlu0 %967  ;;  %v4491_v30 = vpop.eup %4490 }
 0x5c8   :  { %v1187_v11 = vpop.permute.xlu1 %1186  ;;  %4500 = vrcp.f32 %v968_v36  ;;  %v1013_v26 = vmul.f32 %v4491_v30, %v5271_v14 }
 0x5c9   :  { %v1179_v19 = vpack.c.bf16 %v1012_v47, %v1011_v5  ;;  %3969 = vmatpush3.bf16.msra.mxu1 %v1187_v11 }
 0x5ca   :  { %4000 = vmatprep.subr.bf16.mxu1 %v4692_v3  ;;  %v4493_v9 = vpop.eup %4492 }
 0x5cb   :  { %v956_v6 = vpop.xlane.xlu0 %955  ;;  %v1018_v55 = vmul.f32 %v4493_v9, %v5284_v39 }
 0x5cc   :  { %4502 = vrcp.f32 %v956_v6  ;;  %3971 = vmatmul.mubr.msk.bf16.vlgmr.msra.gmra.mrb[52].mxu1 %vm758_vm5, %v1179_v19 }
 0x5cd   :  { %3974 = vmatprep.mubr.msk.bf16.mxu1 %vm4693_vm0, %v4692_v3  ;;  %4504 = vrcp.f32 %v965_v63 }
 0x5ce   :  { %v4495_v1 = vpop.eup %4494 }
 0x5cf   :  { %v974_v0 = vpop.xlane.xlu0 %973  ;;  %v1014_v12 = vmul.f32 %v4495_v1, %v5293_v20  ;;  %v4497_v16 = vpop.eup %4496  ;;  %v1429_v1 = vld [vmem:[%s6433_s5 + $0x10] sm:$0xff] }
 0x5d0   :  { %v1017_v21 = vmul.f32 %v4497_v16, %v5267_v60  ;;  %v4499_v15 = vpop.eup %4498  ;;  %4506 = vrcp.f32 %v974_v0  ;;  %v1430_v0 = vld [vmem:[%s6433_s5 + $0x18] sm:$0xff] }
 0x5d1   :  { %v1180_v58 = vpack.c.bf16 %v1014_v12, %v1013_v26  ;;  %4508 = vrcp.f32 %v971_v40  ;;  %v1015_v39 = vmul.f32 %v4499_v15, %v5289_v13  ;;  %v1435_v26 = vpack.c.bf16 %v1430_v0, %v1429_v1 }
 0x5d2   :  { %v4501_v43 = vpop.eup %4500  ;;  %v1257_v23 = vpack.c.bf16 %v1018_v55, %v1017_v21 }
 0x5d3   :  { %v1265_v49 = vpop.permute.xlu0 %1264  ;;  %v1020_v29 = vmul.f32 %v4501_v43, %v5301_v46 }
 0x5d4   :  { %3975 = vmatmul.mubr.msk.bf16.gmra.mrb[56].mxu1 %vm758_vm5, %v1180_v58  ;;  %3987 = vmatpush3.bf16.msra.mxu0 %v1265_v49 }
 0x5d5   :  { %3978 = vmatprep.mubr.msk.bf16.mxu1 %vm4693_vm0, %v4692_v3  ;;  %4016 = vmatprep.subr.bf16.mxu0 %v4692_v3 }
 0x5d6   :  { %v4503_v14 = vpop.eup %4502 }
 0x5d7   :  { %3989 = vmatmul.mubr.msk.bf16.vlgmr.msra.gmra.mrb[44].mxu0 %vm758_vm5, %v1257_v23  ;;  %v1016_v60 = vmul.f32 %v4503_v14, %v5307_v32  ;;  %v4505_v20 = vpop.eup %4504 }
 0x5d8   :  { %3992 = vmatprep.mubr.msk.bf16.mxu0 %vm4693_vm0, %v4692_v3  ;;  %v1019_v34 = vmul.f32 %v4505_v20, %v5280_v44  ;;  %v1427_v44 = vld [vmem:[%s6433_s5] sm:$0xff] }
 0x5d9   :  { %v1181_v18 = vpack.c.bf16 %v1016_v60, %v1015_v39  ;;  %v1434_v42 = vpack.c.bf16 %v1428_v2, %v1427_v44 }
 0x5da   :  { %v1258_v61 = vpack.c.bf16 %v1020_v29, %v1019_v34  ;;  %v4507_v22 = vpop.eup %4506 }
 0x5db   :  { %v4509_v13 = vpop.eup %4508  ;;  %v1022_v32 = vmul.f32 %v4507_v22, %v5311_v37  ;;  %4001 = vmatpush3.bf16.msra.mxu1 %v1434_v42 }
 0x5dc   :  { %3979 = vmatmul.mubr.msk.bf16.gmra.mrb[60].mxu1 %vm758_vm5, %v1181_v18  ;;  %v1021_v54 = vmul.f32 %v4509_v13, %v5297_v33  ;;  %4002 = vmatprep.subr.bf16.mxu1 %v4692_v3 }
 0x5dd   :  { %4004 = vmatprep.mubr.msk.bf16.mxu1 %vm4693_vm0, %v4692_v3 }
 0x5de   :  { %v1259_v46 = vpack.c.bf16 %v1022_v32, %v1021_v54 }
 0x5df   :  { %3993 = vmatmul.mubr.msk.bf16.gmra.mrb[48].mxu0 %vm758_vm5, %v1258_v61  ;;  %4003 = vmatpush3.bf16.msra.mxu1 %v1435_v26 }
 0x5e0   :  { %3996 = vmatprep.mubr.msk.bf16.mxu0 %vm4693_vm0, %v4692_v3  ;;  %4032 = vmatprep.subr.bf16.mxu1 %v4692_v3 }
 0x5e7   :  { %3997 = vmatmul.mubr.msk.bf16.gmra.mrb[52].mxu0 %vm758_vm5, %v1259_v46 }
 0x5e8   :  { %4020 = vmatprep.mubr.msk.bf16.mxu0 %vm4693_vm0, %v4692_v3 }
 0x682   :  { %v5392_v50 = vpop.f32.mrb[40].mxu1 }
 0x683   :  { %v3936_v37 = vpop.f32.mrb[41].mxu1 }
 0x684   :  { %v5394_v33 = vpop.f32.mrb[42].mxu1 }
 0x685   :  { %v3937_v10 = vpop.f32.mrb[43].mxu1 }
 0x686   :  { %v1156_v51 = vpop.f32.mrb[32].mxu0 }
 0x687   :  { %v3954_v53 = vpop.f32.mrb[33].mxu0 }
 0x688   :  { %v1159_v52 = vpop.f32.mrb[34].mxu0 }
 0x689   :  { %v4312_v63 = vpack.i.bf16 %v1159_v52, %v1156_v51  ;;  %v3955_v41 = vpop.f32.mrb[35].mxu0 }
 0x68a   :  { %v5397_v57 = vpop.f32.mrb[44].mxu1 }
 0x68b   :  { %4313 = vrot.lane.b32.xlu1 %v4312_v63, %s4706_s29  ;;  %v3940_v7 = vpop.f32.mrb[45].mxu1 }
 0x68c   :  { %v5400_v8 = vpop.f32.mrb[46].mxu1 }
 0x68d   :  { %v3941_v62 = vpop.f32.mrb[47].mxu1 }
 0x68e   :  { %v1164_v31 = vpop.f32.mrb[36].mxu0 }
 0x68f   :  { %v3958_v4 = vpop.f32.mrb[37].mxu0 }
 0x690   :  { %v1167_v56 = vpop.f32.mrb[38].mxu0 }
 0x691   :  { %v4327_v17 = vpack.i.bf16 %v1167_v56, %v1164_v31  ;;  %v3959_v40 = vpop.f32.mrb[39].mxu0 }
 0x692   :  { %v5402_v27 = vpop.f32.mrb[48].mxu1 }
 0x693   :  { %v3944_v5 = vpop.f32.mrb[49].mxu1 }
 0x694   :  { %v5404_v47 = vpop.f32.mrb[50].mxu1 }
 0x695   :  { %v3945_v36 = vpop.f32.mrb[51].mxu1 }
 0x696   :  { %v1172_v11 = vpop.f32.mrb[40].mxu0 }
 0x697   :  { %v3962_v19 = vpop.f32.mrb[41].mxu0 }
 0x698   :  { %v1175_v6 = vpop.f32.mrb[42].mxu0 }
 0x699   :  { %v4342_v30 = vpack.i.bf16 %v1175_v6, %v1172_v11  ;;  %v3963_v9 = vpop.f32.mrb[43].mxu0 }
 0x69f   :  { %v1234_v12 = vpop.f32.mrb[52].mxu1 }
 0x6a0   :  { %v3972_v16 = vpop.f32.mrb[53].mxu1 }
 0x6a1   :  { %v1237_v55 = vpop.f32.mrb[54].mxu1 }
 0x6a2   :  { %v4317_v58 = vpack.i.bf16 %v1237_v55, %v1234_v12  ;;  %v3973_v21 = vpop.f32.mrb[55].mxu1 }
 0x6a4   :  { %4318 = vrot.lane.b32.xlu0 %v4317_v58, %s4707_s13 }
 0x6a7   :  { %v1242_v49 = vpop.f32.mrb[56].mxu1 }
 0x6a8   :  { %4328 = vrot.lane.b32.xlu0 %v4327_v17, %s4706_s29  ;;  %v3976_v15 = vpop.f32.mrb[57].mxu1 }
 0x6a9   :  { %v1245_v43 = vpop.f32.mrb[58].mxu1 }
 0x6aa   :  { %v4332_v23 = vpack.i.bf16 %v1245_v43, %v1242_v49  ;;  %v3977_v14 = vpop.f32.mrb[59].mxu1  ;;  %v1312_v39 = vpop.f32.mrb[44].mxu0 }
 0x6ab   :  { %v3990_v60 = vpop.f32.mrb[45].mxu0 }
 0x6ac   :  { %v1315_v20 = vpop.f32.mrb[46].mxu0 }
 0x6ad   :  { %v4322_v18 = vpack.i.bf16 %v1315_v20, %v1312_v39  ;;  %v3991_v29 = vpop.f32.mrb[47].mxu0 }
 0x6af   :  { %v1250_v34 = vpop.f32.mrb[60].mxu1  ;;  %4323 = vrot.lane.b32.xlu1 %v4322_v18, %s4708_s14 }
 0x6b0   :  { %v3980_v61 = vpop.f32.mrb[61].mxu1 }
 0x6b1   :  { %v1253_v22 = vpop.f32.mrb[62].mxu1 }
 0x6b2   :  { %v4347_v13 = vpack.i.bf16 %v1253_v22, %v1250_v34  ;;  %v3981_v32 = vpop.f32.mrb[63].mxu1  ;;  %v1320_v54 = vpop.f32.mrb[48].mxu0 }
 0x6b3   :  { %v3994_v46 = vpop.f32.mrb[49].mxu0  ;;  %4333 = vrot.lane.b32.xlu1 %v4332_v23, %s4707_s13 }
 0x6b4   :  { %v1323_v44 = vpop.f32.mrb[50].mxu0 }
 0x6b5   :  { %v4337_v2 = vpack.i.bf16 %v1323_v44, %v1320_v54  ;;  %v3995_v42 = vpop.f32.mrb[51].mxu0 }
 0x6b7   :  { %4338 = vrot.lane.b32.xlu0 %v4337_v2, %s4708_s14  ;;  %4343 = vrot.lane.b32.xlu1 %v4342_v30, %s4706_s29 }
 0x6ba   :  { %v1328_v37 = vpop.f32.mrb[52].mxu0 }
 0x6bb   :  { %v3998_v10 = vpop.f32.mrb[53].mxu0  ;;  %4348 = vrot.lane.b32.xlu0 %v4347_v13, %s4707_s13 }
 0x6bc   :  { %v1331_v51 = vpop.f32.mrb[54].mxu0 }
 0x6bd   :  { %v4352_v53 = vpack.i.bf16 %v1331_v51, %v1328_v37  ;;  %v3999_v52 = vpop.f32.mrb[55].mxu0 }
 0x6bf   :  { %4353 = vrot.lane.b32.xlu1 %v4352_v53, %s4708_s14 }
 0x6fd   :  { %v4314_v63 = vpop.permute.xlu1 %4313 }
 0x6fe   :  { %v4316_v7 = vunpack.i.h.bf16 %v4314_v63  ;;  %v4315_v62 = vunpack.i.l.bf16 %v4314_v63 }
 0x700   :  { %v1408_v17 = vsel %vm397_vm3, %v5394_v33, %v4316_v7  ;;  %v1407_v40 = vsel %vm397_vm3, %v5392_v50, %v4315_v62 }
 0x716   :  { %v4319_v41 = vpop.permute.xlu0 %4318 }
 0x717   :  { %v4321_v31 = vunpack.i.h.bf16 %v4319_v41  ;;  %v4320_v4 = vunpack.i.l.bf16 %v4319_v41 }
 0x719   :  { %v1414_v11 = vsel %vm1413_vm9, %v1407_v40, %v4320_v4  ;;  %v1415_v19 = vsel %vm1413_vm9, %v1408_v17, %v4321_v31 }
 0x71a   :  { %v4329_v6 = vpop.permute.xlu0 %4328 }
 0x71b   :  { %v4331_v26 = vunpack.i.h.bf16 %v4329_v6  ;;  %v4330_v12 = vunpack.i.l.bf16 %v4329_v6 }
 0x71d   :  { %v1410_v55 = vsel %vm397_vm3, %v5400_v8, %v4331_v26  ;;  %v1409_v58 = vsel %vm397_vm3, %v5397_v57, %v4330_v12 }
 0x721   :  { %v4324_v56 = vpop.permute.xlu1 %4323 }
 0x722   :  { %v4326_v5 = vunpack.i.h.bf16 %v4324_v56  ;;  %v4325_v36 = vunpack.i.l.bf16 %v4324_v56 }
 0x724   :  { %v1421_v30 = vsel %vm1420_vm10, %v1414_v11, %v4325_v36  ;;  %v1422_v9 = vsel %vm1420_vm10, %v1415_v19, %v4326_v5 }
 0x725   :  { %v1431_v1 = vpack.c.bf16 %v1422_v9, %v1421_v30  ;;  %v4334_v0 = vpop.permute.xlu1 %4333 }
 0x726   :  { %v4336_v16 = vunpack.i.h.bf16 %v4334_v0  ;;  %v4335_v33 = vunpack.i.l.bf16 %v4334_v0 }
 0x727   :  { %4005 = vmatmul.mubr.msk.bf16.vlgmr.msra.gmra.mrb[64].mxu1 %vm205_vm2, %v1431_v1 }
 0x728   :  { %4008 = vmatprep.mubr.msk.bf16.mxu1 %vm4693_vm0, %v4692_v3  ;;  %v1417_v15 = vsel %vm1413_vm9, %v1410_v55, %v4336_v16  ;;  %v1416_v43 = vsel %vm1413_vm9, %v1409_v58, %v4335_v33 }
 0x729   :  { %v4339_v50 = vpop.permute.xlu0 %4338  ;;  %v4344_v23 = vpop.permute.xlu1 %4343 }
 0x72a   :  { %v4341_v21 = vunpack.i.h.bf16 %v4339_v50  ;;  %v4340_v49 = vunpack.i.l.bf16 %v4339_v50  ;;  %v4346_v18 = vunpack.i.h.bf16 %v4344_v23  ;;  %v4345_v29 = vunpack.i.l.bf16 %v4344_v23 }
 0x72c   :  { %v1423_v14 = vsel %vm1420_vm10, %v1416_v43, %v4340_v49  ;;  %v1424_v39 = vsel %vm1420_vm10, %v1417_v15, %v4341_v21  ;;  %v1412_v61 = vsel %vm397_vm3, %v5404_v47, %v4346_v18  ;;  %v1411_v22 = vsel %vm397_vm3, %v5402_v27, %v4345_v29  ;;  %v3581_v27 = vld [vmem:[%s6431_s3 + $0x3] ss:$0 sm:$0xff] }
 0x72d   :  { %v4349_v60 = vpop.permute.xlu0 %4348  ;;  %v1432_v20 = vpack.c.bf16 %v1424_v39, %v1423_v14 }
 0x72e   :  { %v4351_v34 = vunpack.i.h.bf16 %v4349_v60  ;;  %v4350_v8 = vunpack.i.l.bf16 %v4349_v60 }
 0x72f   :  { %4009 = vmatmul.mubr.msk.bf16.gmra.mrb[68].mxu1 %vm205_vm2, %v1432_v20 }
 0x730   :  { %4012 = vmatprep.mubr.msk.bf16.mxu1 %vm4693_vm0, %v4692_v3  ;;  %v1418_v54 = vsel %vm1413_vm9, %v1411_v22, %v4350_v8  ;;  %v1419_v46 = vsel %vm1413_vm9, %v1412_v61, %v4351_v34 }
 0x731   :  { %v4354_v57 = vpop.permute.xlu1 %4353 }
 0x732   :  { %v4356_v13 = vunpack.i.h.bf16 %v4354_v57  ;;  %v4355_v32 = vunpack.i.l.bf16 %v4354_v57 }
 0x734   :  { %v1425_v44 = vsel %vm1420_vm10, %v1418_v54, %v4355_v32  ;;  %v1426_v2 = vsel %vm1420_vm10, %v1419_v46, %v4356_v13 }
 0x735   :  { %v1433_v42 = vpack.c.bf16 %v1426_v2, %v1425_v44 }
 0x737   :  { %4013 = vmatmul.mubr.msk.bf16.gmra.mrb[72].mxu1 %vm205_vm2, %v1433_v42 }
 0x738   :  { %4048 = vmatprep.mubr.msk.bf16.mxu1 %vm4693_vm0, %v4692_v3 }
 0x7fa   :  { %v1479_v47 = vpop.f32.mrb[64].mxu1 }
 0x7fb   :  { %v1502_v37 = vadd.f32 %v1479_v47, %v4824_v25  ;;  %v4006_v10 = vpop.f32.mrb[65].mxu1  ;;  %v1619_v47 = vld [vmem:[%s6434_s6] sm:$0xff] }
 0x7fc   :  { %v1482_v51 = vpop.f32.mrb[66].mxu1  ;;  %v1621_v10 = vld [vmem:[%s6434_s6 + $0x10] sm:$0xff] }
 0x7fd   :  { %v5458_v53 = vadd.f32 %v3581_v27, %v1502_v37  ;;  %v1503_v52 = vadd.f32 %v1482_v51, %v4826_v28  ;;  %v4007_v63 = vpop.f32.mrb[67].mxu1  ;;  %v1622_v51 = vld [vmem:[%s6434_s6 + $0x18] sm:$0xff] }
 0x7fe   :  { %v1729_v63 = vld [vmem:[%s6435_s7] sm:$0xff] }
 0x7ff   :  { %v5461_v41 = vadd.f32 %v3581_v27, %v1503_v52  ;;  %v1521_v7 = vsel %vm205_vm2, %v5458_v53, 0.0  ;;  %v1627_v52 = vpack.c.bf16 %v1622_v51, %v1621_v10 }
 0x800   :  { %1522 = vadd.xlane.f32.xlu0 %v1521_v7  ;;  %v1730_v7 = vld [vmem:[%s6435_s7 + $0x8] sm:$0xff] }
 0x801   :  { %v1524_v62 = vsel %vm205_vm2, %v5461_v41, 0.0 }
 0x802   :  { %1525 = vadd.xlane.f32.xlu1 %v1524_v62  ;;  %v1487_v31 = vpop.f32.mrb[68].mxu1  ;;  %v1731_v62 = vld [vmem:[%s6435_s7 + $0x10] sm:$0xff] }
 0x803   :  { %v1504_v25 = vadd.f32 %v1487_v31, %v4838_v35  ;;  %v4010_v4 = vpop.f32.mrb[69].mxu1  ;;  %v1748_v31 = vpack.c.bf16 %v1730_v7, %v1729_v63  ;;  %v1735_v7 = vld [vmem:[%s6435_s7 + $0x30] sm:$0xff] }
 0x804   :  { %v1490_v56 = vpop.f32.mrb[70].mxu1 }
 0x805   :  { %v5468_v17 = vadd.f32 %v3581_v27, %v1504_v25  ;;  %v1505_v28 = vadd.f32 %v1490_v56, %v4840_v38  ;;  %v4011_v40 = vpop.f32.mrb[71].mxu1  ;;  %v1732_v25 = vld [vmem:[%s6435_s7 + $0x18] sm:$0xff]  ;;  %4033 = vmatpush3.bf16.msra.mxu1 %v1748_v31 }
 0x806   :  { %v1749_v4 = vpack.c.bf16 %v1732_v25, %v1731_v62  ;;  %4034 = vmatprep.subr.bf16.mxu1 %v4692_v3  ;;  %v1736_v62 = vld [vmem:[%s6435_s7 + $0x38] sm:$0xff]  ;;  %v1737_v25 = vld [vmem:[%s6435_s7 + $0x40] sm:$0xff] }
 0x807   :  { %v5471_v5 = vadd.f32 %v3581_v27, %v1505_v28  ;;  %v1527_v36 = vsel %vm205_vm2, %v5468_v17, 0.0  ;;  %v1751_v31 = vpack.c.bf16 %v1736_v62, %v1735_v7 }
 0x808   :  { %1528 = vadd.xlane.f32.xlu0 %v1527_v36 }
 0x809   :  { %v1530_v35 = vsel %vm205_vm2, %v5471_v5, 0.0  ;;  %4035 = vmatpush3.bf16.msra.mxu1 %v1749_v4  ;;  %v1738_v4 = vld [vmem:[%s6435_s7 + $0x48] sm:$0xff] }
 0x80a   :  { %v1495_v11 = vpop.f32.mrb[72].mxu1  ;;  %4036 = vmatprep.subr.bf16.mxu1 %v4692_v3 }
 0x80b   :  { %v1506_v19 = vadd.f32 %v1495_v11, %v4852_v45  ;;  %v4014_v6 = vpop.f32.mrb[73].mxu1 }
 0x80c   :  { %1531 = vadd.xlane.f32.xlu0 %v1530_v35  ;;  %v1498_v30 = vpop.f32.mrb[74].mxu1 }
 0x80d   :  { %v5478_v9 = vadd.f32 %v3581_v27, %v1506_v19  ;;  %v1507_v38 = vadd.f32 %v1498_v30, %v4854_v48  ;;  %v4015_v1 = vpop.f32.mrb[75].mxu1 }
 0x80f   :  { %v5481_v0 = vadd.f32 %v3581_v27, %v1507_v38  ;;  %v1533_v26 = vsel %vm205_vm2, %v5478_v9, 0.0  ;;  %v1620_v27 = vld [vmem:[%s6434_s6 + $0x8] sm:$0xff] }
 0x810   :  { %1534 = vadd.xlane.f32.xlu0 %v1533_v26  ;;  %v1626_v37 = vpack.c.bf16 %v1620_v27, %v1619_v47 }
 0x811   :  { %v1536_v45 = vsel %vm205_vm2, %v5481_v0, 0.0 }
 0x812   :  { %1537 = vadd.xlane.f32.xlu1 %v1536_v45  ;;  %4017 = vmatpush3.bf16.msra.mxu0 %v1626_v37  ;;  %v3582_v45 = vld [vmem:[%s6431_s3 + $0x4] ss:$0 sm:$0xff] }
 0x813   :  { %4018 = vmatprep.subr.bf16.mxu0 %v4692_v3 }
 0x816   :  { %4019 = vmatpush3.bf16.msra.mxu0 %v1627_v52 }
 0x817   :  { %4060 = vmatprep.subr.bf16.mxu0 %v4692_v3 }
 0x88d   :  { %v1523_v12 = vpop.xlane.xlu0 %1522 }
 0x88e   :  { %v1539_v16 = vmul.f32 0.03125, %v1523_v12 }
 0x88f   :  { %v1526_v33 = vpop.xlane.xlu1 %1525 }
 0x890   :  { %v5488_v50 = vsub.f32 %v5458_v53, %v1539_v16  ;;  %v1540_v55 = vmul.f32 0.03125, %v1526_v33 }
 0x892   :  { %v5491_v48 = vsub.f32 %v5461_v41, %v1540_v55  ;;  %v1551_v58 = vmul.f32 %v5488_v50, %v5488_v50 }
 0x894   :  { %v1557_v21 = vsel %vm205_vm2, %v1551_v58, 0.0  ;;  %v1552_v49 = vmul.f32 %v5491_v48, %v5491_v48 }
 0x895   :  { %v1529_v15 = vpop.xlane.xlu0 %1528  ;;  %1558 = vadd.xlane.f32.xlu0 %v1557_v21 }
 0x896   :  { %v1541_v43 = vmul.f32 0.03125, %v1529_v15  ;;  %v1560_v23 = vsel %vm205_vm2, %v1552_v49, 0.0 }
 0x897   :  { %1561 = vadd.xlane.f32.xlu1 %v1560_v23 }
 0x898   :  { %v5500_v14 = vsub.f32 %v5468_v17, %v1541_v43  ;;  %v3583_v43 = vld [vmem:[%s6431_s3 + $0x5] ss:$0 sm:$0xff] }
 0x899   :  { %v1532_v39 = vpop.xlane.xlu0 %1531 }
 0x89a   :  { %v1542_v60 = vmul.f32 0.03125, %v1532_v39  ;;  %v1553_v20 = vmul.f32 %v5500_v14, %v5500_v14 }
 0x89c   :  { %v5505_v18 = vsub.f32 %v5471_v5, %v1542_v60  ;;  %v1563_v29 = vsel %vm205_vm2, %v1553_v20, 0.0 }
 0x89d   :  { %1564 = vadd.xlane.f32.xlu0 %v1563_v29  ;;  %v1535_v34 = vpop.xlane.xlu0 %1534 }
 0x89e   :  { %v1543_v8 = vmul.f32 0.03125, %v1535_v34  ;;  %v1554_v57 = vmul.f32 %v5505_v18, %v5505_v18 }
 0x89f   :  { %v1538_v61 = vpop.xlane.xlu1 %1537 }
 0x8a0   :  { %v5511_v22 = vsub.f32 %v5478_v9, %v1543_v8  ;;  %v1544_v13 = vmul.f32 0.03125, %v1538_v61  ;;  %v1566_v32 = vsel %vm205_vm2, %v1554_v57, 0.0 }
 0x8a1   :  { %1567 = vadd.xlane.f32.xlu1 %v1566_v32 }
 0x8a2   :  { %v5515_v54 = vsub.f32 %v5481_v0, %v1544_v13  ;;  %v1555_v46 = vmul.f32 %v5511_v22, %v5511_v22 }
 0x8a4   :  { %v1569_v44 = vsel %vm205_vm2, %v1555_v46, 0.0  ;;  %v1556_v2 = vmul.f32 %v5515_v54, %v5515_v54 }
 0x8a5   :  { %1570 = vadd.xlane.f32.xlu0 %v1569_v44 }
 0x8a6   :  { %v1572_v42 = vsel %vm205_vm2, %v1556_v2, 0.0 }
 0x8a7   :  { %1573 = vadd.xlane.f32.xlu1 %v1572_v42 }
 0x922   :  { %v1559_v56 = vpop.xlane.xlu0 %1558 }
 0x923   :  { %v1575_v28 = vmul.f32 0.03125, %v1559_v56  ;;  %v1752_v56 = vpack.c.bf16 %v1738_v4, %v1737_v25 }
 0x924   :  { %v1562_v40 = vpop.xlane.xlu1 %1561 }
 0x925   :  { %v1581_v36 = vadd.f32 1e-05, %v1575_v28  ;;  %v1576_v11 = vmul.f32 0.03125, %v1562_v40  ;;  %v1739_v28 = vld [vmem:[%s6435_s7 + $0x50] sm:$0xff]  ;;  %v1740_v40 = vld [vmem:[%s6435_s7 + $0x58] sm:$0xff] }
 0x927   :  { %4510 = vrsqrt.f32 %v1581_v36  ;;  %v1582_v19 = vadd.f32 1e-05, %v1576_v11  ;;  %v1753_v36 = vpack.c.bf16 %v1740_v40, %v1739_v28  ;;  %v1741_v11 = vld [vmem:[%s6435_s7 + $0x60] sm:$0xff] }
 0x929   :  { %4512 = vrsqrt.f32 %v1582_v19  ;;  %v1742_v19 = vld [vmem:[%s6435_s7 + $0x68] sm:$0xff] }
 0x92a   :  { %v1565_v6 = vpop.xlane.xlu0 %1564 }
 0x92b   :  { %v1577_v35 = vmul.f32 0.03125, %v1565_v6  ;;  %v1754_v6 = vpack.c.bf16 %v1742_v19, %v1741_v11 }
 0x92d   :  { %v1583_v30 = vadd.f32 1e-05, %v1577_v35  ;;  %v1743_v35 = vld [vmem:[%s6435_s7 + $0x70] sm:$0xff] }
 0x92e   :  { %v1568_v38 = vpop.xlane.xlu1 %1567 }
 0x92f   :  { %4514 = vrsqrt.f32 %v1583_v30  ;;  %v1578_v1 = vmul.f32 0.03125, %v1568_v38  ;;  %v1744_v30 = vld [vmem:[%s6435_s7 + $0x78] sm:$0xff] }
 0x930   :  { %v1755_v38 = vpack.c.bf16 %v1744_v30, %v1743_v35  ;;  %v3588_v30 = vld [vmem:[%s6431_s3 + $0x7] ss:$0 sm:$0xff] }
 0x931   :  { %v4511_v26 = vpop.eup %4510  ;;  %v1584_v12 = vadd.f32 1e-05, %v1578_v1  ;;  %v3584_v1 = vld [vmem:[%s6431_s3 + $0x6] ss:$0 sm:$0xff] }
 0x932   :  { %v1593_v16 = vmul.f32 %v4511_v26, %v5488_v50  ;;  %v1571_v33 = vpop.xlane.xlu0 %1570 }
 0x933   :  { %v4513_v55 = vpop.eup %4512  ;;  %4516 = vrsqrt.f32 %v1584_v12  ;;  %v1579_v58 = vmul.f32 0.03125, %v1571_v33 }
 0x934   :  { %v1603_v21 = vmul.f32 %v3582_v45, %v1593_v16  ;;  %v1594_v49 = vmul.f32 %v4513_v55, %v5491_v48  ;;  %v1574_v15 = vpop.xlane.xlu1 %1573 }
 0x935   :  { %v1585_v23 = vadd.f32 1e-05, %v1579_v58  ;;  %v1580_v39 = vmul.f32 0.03125, %v1574_v15 }
 0x936   :  { %v1604_v60 = vmul.f32 %v3582_v45, %v1594_v49  ;;  %v1613_v29 = vadd.f32 %v3583_v43, %v1603_v21 }
 0x937   :  { %4518 = vrsqrt.f32 %v1585_v23  ;;  %v1586_v20 = vadd.f32 1e-05, %v1580_v39 }
 0x938   :  { %v1614_v34 = vadd.f32 %v3583_v43, %v1604_v60 }
 0x939   :  { %v4515_v50 = vpop.eup %4514  ;;  %4520 = vrsqrt.f32 %v1586_v20 }
 0x93a   :  { %v1623_v8 = vpack.c.bf16 %v1614_v34, %v1613_v29  ;;  %v1595_v57 = vmul.f32 %v4515_v50, %v5500_v14 }
 0x93c   :  { %4021 = vmatmul.mubr.msk.bf16.vlgmr.msra.gmra.mrb[56].mxu0 %vm205_vm2, %v1623_v8  ;;  %v1605_v13 = vmul.f32 %v3582_v45, %v1595_v57 }
 0x93d   :  { %v4517_v48 = vpop.eup %4516  ;;  %4024 = vmatprep.mubr.msk.bf16.mxu0 %vm4693_vm0, %v4692_v3 }
 0x93e   :  { %v1596_v61 = vmul.f32 %v4517_v48, %v5505_v18  ;;  %v1615_v44 = vadd.f32 %v3583_v43, %v1605_v13 }
 0x940   :  { %v1606_v32 = vmul.f32 %v3582_v45, %v1596_v61 }
 0x941   :  { %v4519_v46 = vpop.eup %4518 }
 0x942   :  { %v1616_v2 = vadd.f32 %v3583_v43, %v1606_v32  ;;  %v1597_v42 = vmul.f32 %v4519_v46, %v5511_v22  ;;  %v1733_v22 = vld [vmem:[%s6435_s7 + $0x20] sm:$0xff] }
 0x943   :  { %v4521_v47 = vpop.eup %4520 }
 0x944   :  { %v1624_v27 = vpack.c.bf16 %v1616_v2, %v1615_v44  ;;  %v1598_v37 = vmul.f32 %v4521_v47, %v5515_v54  ;;  %v1607_v14 = vmul.f32 %v3582_v45, %v1597_v42  ;;  %v1734_v54 = vld [vmem:[%s6435_s7 + $0x28] sm:$0xff] }
 0x945   :  { %v1750_v63 = vpack.c.bf16 %v1734_v54, %v1733_v22 }
 0x946   :  { %4025 = vmatmul.mubr.msk.bf16.gmra.mrb[60].mxu0 %vm205_vm2, %v1624_v27  ;;  %v1608_v10 = vmul.f32 %v3582_v45, %v1598_v37  ;;  %v1617_v18 = vadd.f32 %v3583_v43, %v1607_v14 }
 0x947   :  { %4028 = vmatprep.mubr.msk.bf16.mxu0 %vm4693_vm0, %v4692_v3  ;;  %4037 = vmatpush3.bf16.msra.mxu1 %v1750_v63 }
 0x948   :  { %v1618_v51 = vadd.f32 %v3583_v43, %v1608_v10  ;;  %4038 = vmatprep.subr.bf16.mxu1 %v4692_v3 }
 0x94a   :  { %v1625_v52 = vpack.c.bf16 %v1618_v51, %v1617_v18 }
 0x94b   :  { %4039 = vmatpush3.bf16.msra.mxu1 %v1751_v31 }
 0x94c   :  { %4040 = vmatprep.subr.bf16.mxu1 %v4692_v3 }
 0x94e   :  { %4029 = vmatmul.mubr.msk.bf16.gmra.mrb[64].mxu0 %vm205_vm2, %v1625_v52 }
 0x94f   :  { %4064 = vmatprep.mubr.msk.bf16.mxu0 %vm4693_vm0, %v4692_v3  ;;  %4041 = vmatpush3.bf16.msra.mxu1 %v1752_v56 }
 0x950   :  { %4042 = vmatprep.subr.bf16.mxu1 %v4692_v3 }
 0x953   :  { %4043 = vmatpush3.bf16.msra.mxu1 %v1753_v36 }
 0x954   :  { %4044 = vmatprep.subr.bf16.mxu1 %v4692_v3 }
 0x957   :  { %4045 = vmatpush3.bf16.msra.mxu1 %v1754_v6 }
 0x958   :  { %4046 = vmatprep.subr.bf16.mxu1 %v4692_v3 }
 0x95b   :  { %4047 = vmatpush3.bf16.msra.mxu1 %v1755_v38 }
 0x95c   :  { %4094 = vmatprep.subr.bf16.mxu1 %v4692_v3 }
 0xa0f   :  { %v1676_v26 = vpop.f32.mrb[56].mxu0 }
 0xa10   :  { %v1677_v45 = vadd.f32 %v3584_v1, %v1676_v26  ;;  %v4022_v12 = vpop.f32.mrb[57].mxu0 }
 0xa11   :  { %v1679_v16 = vpop.f32.mrb[58].mxu0 }
 0xa12   :  { %v1705_v33 = vmul.f32 0.70710677, %v1677_v45  ;;  %v1680_v55 = vadd.f32 %v3584_v1, %v1679_v16  ;;  %v4023_v58 = vpop.f32.mrb[59].mxu0  ;;  %v1699_v57 = vmul.f32 0.5, %v1677_v45 }
 0xa14   :  { %4522 = verf.f32 %v1705_v33  ;;  %v1706_v21 = vmul.f32 0.70710677, %v1680_v55  ;;  %v1700_v48 = vmul.f32 0.5, %v1680_v55 }
 0xa16   :  { %4524 = verf.f32 %v1706_v21 }
 0xa19   :  { %v1684_v49 = vpop.f32.mrb[60].mxu0 }
 0xa1a   :  { %v1685_v15 = vadd.f32 %v3584_v1, %v1684_v49  ;;  %v4026_v43 = vpop.f32.mrb[61].mxu0 }
 0xa1b   :  { %v1687_v23 = vpop.f32.mrb[62].mxu0 }
 0xa1c   :  { %v1707_v39 = vmul.f32 0.70710677, %v1685_v15  ;;  %v1688_v60 = vadd.f32 %v3584_v1, %v1687_v23  ;;  %v4027_v20 = vpop.f32.mrb[63].mxu0  ;;  %v1701_v22 = vmul.f32 0.5, %v1685_v15 }
 0xa1e   :  { %v4523_v29 = vpop.eup %4522  ;;  %4526 = verf.f32 %v1707_v39  ;;  %v1708_v34 = vmul.f32 0.70710677, %v1688_v60  ;;  %v1702_v54 = vmul.f32 0.5, %v1688_v60 }
 0xa1f   :  { %v1717_v50 = vadd.f32 1.0, %v4523_v29 }
 0xa20   :  { %v4525_v8 = vpop.eup %4524  ;;  %4528 = verf.f32 %v1708_v34 }
 0xa21   :  { %v1718_v61 = vadd.f32 1.0, %v4525_v8  ;;  %v1692_v13 = vpop.f32.mrb[64].mxu0  ;;  %v1723_v44 = vmul.f32 %v1717_v50, %v1699_v57 }
 0xa22   :  { %v1693_v32 = vadd.f32 %v3584_v1, %v1692_v13  ;;  %v4030_v46 = vpop.f32.mrb[65].mxu0 }
 0xa23   :  { %v1724_v2 = vmul.f32 %v1718_v61, %v1700_v48  ;;  %v1695_v42 = vpop.f32.mrb[66].mxu0 }
 0xa24   :  { %v1709_v47 = vmul.f32 0.70710677, %v1693_v32  ;;  %v1696_v27 = vadd.f32 %v3584_v1, %v1695_v42  ;;  %v4031_v37 = vpop.f32.mrb[67].mxu0  ;;  %v1703_v28 = vmul.f32 0.5, %v1693_v32 }
 0xa25   :  { %v1745_v14 = vpack.c.bf16 %v1724_v2, %v1723_v44 }
 0xa26   :  { %4530 = verf.f32 %v1709_v47  ;;  %v1710_v10 = vmul.f32 0.70710677, %v1696_v27  ;;  %v1704_v40 = vmul.f32 0.5, %v1696_v27 }
 0xa27   :  { %4049 = vmatmul.mubr.bf16.vlgmr.msra.gmra.mrb[76].mxu1 %v1745_v14 }
 0xa28   :  { %v4527_v51 = vpop.eup %4526  ;;  %4532 = verf.f32 %v1710_v10  ;;  %4052 = vmatprep.mubr.msk.bf16.mxu1 %vm4693_vm0, %v4692_v3 }
 0xa29   :  { %v1719_v18 = vadd.f32 1.0, %v4527_v51 }
 0xa2a   :  { %v4529_v52 = vpop.eup %4528 }
 0xa2b   :  { %v1720_v63 = vadd.f32 1.0, %v4529_v52  ;;  %v1725_v7 = vmul.f32 %v1719_v18, %v1701_v22 }
 0xa2d   :  { %v1726_v62 = vmul.f32 %v1720_v63, %v1702_v54 }
 0xa2f   :  { %v1746_v31 = vpack.c.bf16 %v1726_v62, %v1725_v7 }
 0xa30   :  { %v4531_v25 = vpop.eup %4530 }
 0xa31   :  { %v1721_v4 = vadd.f32 1.0, %v4531_v25  ;;  %4053 = vmatmul.mubr.bf16.gmra.mrb[80].mxu1 %v1746_v31 }
 0xa32   :  { %v4533_v56 = vpop.eup %4532  ;;  %4056 = vmatprep.mubr.msk.bf16.mxu1 %vm4693_vm0, %v4692_v3 }
 0xa33   :  { %v1722_v36 = vadd.f32 1.0, %v4533_v56  ;;  %v1727_v11 = vmul.f32 %v1721_v4, %v1703_v28 }
 0xa35   :  { %v1728_v19 = vmul.f32 %v1722_v36, %v1704_v40 }
 0xa37   :  { %v1747_v6 = vpack.c.bf16 %v1728_v19, %v1727_v11 }
 0xa39   :  { %4057 = vmatmul.mubr.bf16.gmra.mrb[84].mxu1 %v1747_v6 }
 0xa3a   :  { %4100 = vmatprep.mubr.msk.bf16.mxu1 %vm4693_vm0, %v4692_v3 }
 0xafa   :  { %v1790_v35 = vpop.f32.mrb[76].mxu1 }
 0xafb   :  { %v1813_v38 = vadd.f32 %v1790_v35, %v5458_v53  ;;  %v4050_v1 = vpop.f32.mrb[77].mxu1  ;;  %v3591_v35 = vld [vmem:[%s6432_s4 + $0x20] sm:$0xff] }
 0xafc   :  { %v1793_v26 = vpop.f32.mrb[78].mxu1  ;;  %v3593_v1 = vld [vmem:[%s6432_s4 + $0x30] sm:$0xff] }
 0xafd   :  { %v5627_v45 = vadd.f32 %v3588_v30, %v1813_v38  ;;  %v1814_v12 = vadd.f32 %v1793_v26, %v5461_v41  ;;  %v4051_v16 = vpop.f32.mrb[79].mxu1  ;;  %v3594_v26 = vld [vmem:[%s6432_s4 + $0x38] sm:$0xff] }
 0xaff   :  { %v5630_v33 = vadd.f32 %v3588_v30, %v1814_v12  ;;  %v1832_v55 = vsel %vm205_vm2, %v5627_v45, 0.0  ;;  %v1939_v12 = vpack.c.bf16 %v3594_v26, %v3593_v1 }
 0xb00   :  { %1833 = vadd.xlane.f32.xlu0 %v1832_v55 }
 0xb01   :  { %v1835_v58 = vsel %vm205_vm2, %v5630_v33, 0.0 }
 0xb02   :  { %1836 = vadd.xlane.f32.xlu1 %v1835_v58 }
 0xb04   :  { %v1798_v21 = vpop.f32.mrb[80].mxu1 }
 0xb05   :  { %v1815_v53 = vadd.f32 %v1798_v21, %v5468_v17  ;;  %v4054_v49 = vpop.f32.mrb[81].mxu1 }
 0xb06   :  { %v1801_v15 = vpop.f32.mrb[82].mxu1 }
 0xb07   :  { %v5637_v43 = vadd.f32 %v3588_v30, %v1815_v53  ;;  %v1816_v41 = vadd.f32 %v1801_v15, %v5471_v5  ;;  %v4055_v23 = vpop.f32.mrb[83].mxu1 }
 0xb09   :  { %v5640_v39 = vadd.f32 %v3588_v30, %v1816_v41  ;;  %v1838_v60 = vsel %vm205_vm2, %v5637_v43, 0.0 }
 0xb0a   :  { %1839 = vadd.xlane.f32.xlu0 %v1838_v60 }
 0xb0b   :  { %v1841_v20 = vsel %vm205_vm2, %v5640_v39, 0.0 }
 0xb0c   :  { %1842 = vadd.xlane.f32.xlu1 %v1841_v20  ;;  %v1806_v29 = vpop.f32.mrb[84].mxu1 }
 0xb0d   :  { %v1817_v17 = vadd.f32 %v1806_v29, %v5478_v9  ;;  %v4058_v34 = vpop.f32.mrb[85].mxu1 }
 0xb0e   :  { %v1809_v50 = vpop.f32.mrb[86].mxu1 }
 0xb0f   :  { %v5647_v8 = vadd.f32 %v3588_v30, %v1817_v17  ;;  %v1818_v5 = vadd.f32 %v1809_v50, %v5481_v0  ;;  %v4059_v57 = vpop.f32.mrb[87].mxu1  ;;  %v3589_v17 = vld [vmem:[%s6431_s3 + $0x8] ss:$0 sm:$0xff] }
 0xb11   :  { %v5650_v48 = vadd.f32 %v3588_v30, %v1818_v5  ;;  %v1844_v61 = vsel %vm205_vm2, %v5647_v8, 0.0  ;;  %v3592_v30 = vld [vmem:[%s6432_s4 + $0x28] sm:$0xff] }
 0xb12   :  { %1845 = vadd.xlane.f32.xlu0 %v1844_v61  ;;  %v1938_v38 = vpack.c.bf16 %v3592_v30, %v3591_v35 }
 0xb13   :  { %v1847_v13 = vsel %vm205_vm2, %v5650_v48, 0.0 }
 0xb14   :  { %1848 = vadd.xlane.f32.xlu1 %v1847_v13  ;;  %4061 = vmatpush3.bf16.msra.mxu0 %v1938_v38 }
 0xb15   :  { %4062 = vmatprep.subr.bf16.mxu0 %v4692_v3 }
 0xb18   :  { %4063 = vmatpush3.bf16.msra.mxu0 %v1939_v12 }
 0xb19   :  { %4076 = vmatprep.subr.bf16.mxu0 %v4692_v3 }
 0xb8d   :  { %v1834_v32 = vpop.xlane.xlu0 %1833 }
 0xb8e   :  { %v1850_v46 = vmul.f32 0.03125, %v1834_v32  ;;  %v3590_v32 = vld [vmem:[%s6431_s3 + $0x9] ss:$0 sm:$0xff] }
 0xb8f   :  { %v1837_v9 = vpop.xlane.xlu1 %1836 }
 0xb90   :  { %v1856_v44 = vsub.f32 %v5627_v45, %v1850_v46  ;;  %v1851_v2 = vmul.f32 0.03125, %v1837_v9 }
 0xb92   :  { %v1857_v42 = vsub.f32 %v5630_v33, %v1851_v2  ;;  %v1862_v0 = vmul.f32 %v1856_v44, %v1856_v44 }
 0xb94   :  { %v1868_v47 = vsel %vm205_vm2, %v1862_v0, 0.0  ;;  %v1863_v27 = vmul.f32 %v1857_v42, %v1857_v42 }
 0xb95   :  { %1869 = vadd.xlane.f32.xlu0 %v1868_v47 }
 0xb96   :  { %v1871_v37 = vsel %vm205_vm2, %v1863_v27, 0.0 }
 0xb97   :  { %v1840_v14 = vpop.xlane.xlu0 %1839  ;;  %1872 = vadd.xlane.f32.xlu1 %v1871_v37 }
 0xb98   :  { %v1852_v10 = vmul.f32 0.03125, %v1840_v14 }
 0xb99   :  { %v1843_v51 = vpop.xlane.xlu1 %1842 }
 0xb9a   :  { %v5661_v18 = vsub.f32 %v5637_v43, %v1852_v10  ;;  %v1853_v52 = vmul.f32 0.03125, %v1843_v51 }
 0xb9c   :  { %v5664_v22 = vsub.f32 %v5640_v39, %v1853_v52  ;;  %v1864_v54 = vmul.f32 %v5661_v18, %v5661_v18 }
 0xb9e   :  { %v1874_v63 = vsel %vm205_vm2, %v1864_v54, 0.0  ;;  %v1865_v7 = vmul.f32 %v5664_v22, %v5664_v22 }
 0xb9f   :  { %1875 = vadd.xlane.f32.xlu0 %v1874_v63  ;;  %v1846_v62 = vpop.xlane.xlu0 %1845 }
 0xba0   :  { %v1854_v31 = vmul.f32 0.03125, %v1846_v62  ;;  %v1877_v25 = vsel %vm205_vm2, %v1865_v7, 0.0 }
 0xba1   :  { %1878 = vadd.xlane.f32.xlu1 %v1877_v25  ;;  %v1849_v4 = vpop.xlane.xlu1 %1848 }
 0xba2   :  { %v5673_v56 = vsub.f32 %v5647_v8, %v1854_v31  ;;  %v1855_v28 = vmul.f32 0.03125, %v1849_v4 }
 0xba4   :  { %v5676_v40 = vsub.f32 %v5650_v48, %v1855_v28  ;;  %v1866_v36 = vmul.f32 %v5673_v56, %v5673_v56 }
 0xba6   :  { %v1880_v11 = vsel %vm205_vm2, %v1866_v36, 0.0  ;;  %v1867_v19 = vmul.f32 %v5676_v40, %v5676_v40 }
 0xba7   :  { %1881 = vadd.xlane.f32.xlu0 %v1880_v11 }
 0xba8   :  { %v1883_v6 = vsel %vm205_vm2, %v1867_v19, 0.0 }
 0xba9   :  { %1884 = vadd.xlane.f32.xlu1 %v1883_v6 }
 0xc22   :  { %v1870_v16 = vpop.xlane.xlu0 %1869 }
 0xc23   :  { %v1886_v55 = vmul.f32 0.03125, %v1870_v16 }
 0xc24   :  { %v1873_v58 = vpop.xlane.xlu1 %1872 }
 0xc25   :  { %v1892_v21 = vadd.f32 1e-05, %v1886_v55  ;;  %v1887_v53 = vmul.f32 0.03125, %v1873_v58 }
 0xc27   :  { %4534 = vrsqrt.f32 %v1892_v21  ;;  %v1893_v49 = vadd.f32 1e-05, %v1887_v53 }
 0xc29   :  { %4536 = vrsqrt.f32 %v1893_v49 }
 0xc2c   :  { %v1876_v15 = vpop.xlane.xlu0 %1875 }
 0xc2d   :  { %v1888_v41 = vmul.f32 0.03125, %v1876_v15 }
 0xc2e   :  { %v1879_v23 = vpop.xlane.xlu1 %1878 }
 0xc2f   :  { %v1894_v60 = vadd.f32 1e-05, %v1888_v41  ;;  %v1889_v20 = vmul.f32 0.03125, %v1879_v23 }
 0xc31   :  { %v4535_v29 = vpop.eup %4534  ;;  %4538 = vrsqrt.f32 %v1894_v60  ;;  %v1895_v34 = vadd.f32 1e-05, %v1889_v20 }
 0xc32   :  { %v1904_v50 = vmul.f32 %v4535_v29, %v1856_v44 }
 0xc33   :  { %v4537_v5 = vpop.eup %4536  ;;  %4540 = vrsqrt.f32 %v1895_v34 }
 0xc34   :  { %v1914_v57 = vmul.f32 %v3589_v17, %v1904_v50  ;;  %v1905_v61 = vmul.f32 %v4537_v5, %v1857_v42  ;;  %v1882_v13 = vpop.xlane.xlu0 %1881 }
 0xc35   :  { %v1890_v46 = vmul.f32 0.03125, %v1882_v13 }
 0xc36   :  { %v1915_v9 = vmul.f32 %v3589_v17, %v1905_v61  ;;  %v1885_v2 = vpop.xlane.xlu1 %1884  ;;  %v1924_v27 = vadd.f32 %v3590_v32, %v1914_v57 }
 0xc37   :  { %v1896_v0 = vadd.f32 1e-05, %v1890_v46  ;;  %v1891_v47 = vmul.f32 0.03125, %v1885_v2 }
 0xc38   :  { %v1925_v37 = vadd.f32 %v3590_v32, %v1915_v9 }
 0xc39   :  { %4542 = vrsqrt.f32 %v1896_v0  ;;  %v1897_v14 = vadd.f32 1e-05, %v1891_v47 }
 0xc3a   :  { %v1935_v10 = vpack.c.bf16 %v1925_v37, %v1924_v27 }
 0xc3b   :  { %v4539_v44 = vpop.eup %4538  ;;  %4544 = vrsqrt.f32 %v1897_v14 }
 0xc3c   :  { %4065 = vmatmul.mubr.msk.bf16.vlgmr.msra.gmra.mrb[68].mxu0 %vm205_vm2, %v1935_v10  ;;  %v1906_v42 = vmul.f32 %v4539_v44, %v5661_v18 }
 0xc3d   :  { %v4541_v51 = vpop.eup %4540  ;;  %4068 = vmatprep.mubr.msk.bf16.mxu0 %vm4693_vm0, %v4692_v3 }
 0xc3e   :  { %v1907_v52 = vmul.f32 %v4541_v51, %v5664_v22  ;;  %v1916_v54 = vmul.f32 %v3589_v17, %v1906_v42 }
 0xc40   :  { %v1917_v63 = vmul.f32 %v3589_v17, %v1907_v52  ;;  %v1926_v7 = vadd.f32 %v3590_v32, %v1916_v54 }
 0xc42   :  { %v1927_v62 = vadd.f32 %v3590_v32, %v1917_v63 }
 0xc43   :  { %v4543_v31 = vpop.eup %4542 }
 0xc44   :  { %v1936_v25 = vpack.c.bf16 %v1927_v62, %v1926_v7  ;;  %v1908_v4 = vmul.f32 %v4543_v31, %v5673_v56  ;;  %v3595_v56 = vld [vmem:[%s6431_s3 + $0xa] ss:$0 sm:$0xff] }
 0xc45   :  { %v4545_v28 = vpop.eup %4544 }
 0xc46   :  { %4069 = vmatmul.mubr.msk.bf16.gmra.mrb[72].mxu0 %vm205_vm2, %v1936_v25  ;;  %v1909_v36 = vmul.f32 %v4545_v28, %v5676_v40  ;;  %v1918_v18 = vmul.f32 %v3589_v17, %v1908_v4 }
 0xc47   :  { %4072 = vmatprep.mubr.msk.bf16.mxu0 %vm4693_vm0, %v4692_v3 }
 0xc48   :  { %v1919_v11 = vmul.f32 %v3589_v17, %v1909_v36  ;;  %v1928_v19 = vadd.f32 %v3590_v32, %v1918_v18 }
 0xc4a   :  { %v1929_v22 = vadd.f32 %v3590_v32, %v1919_v11 }
 0xc4c   :  { %v1937_v6 = vpack.c.bf16 %v1929_v22, %v1928_v19 }
 0xc4e   :  { %4073 = vmatmul.mubr.msk.bf16.gmra.mrb[76].mxu0 %vm205_vm2, %v1937_v6 }
 0xc4f   :  { %4082 = vmatprep.mubr.msk.bf16.mxu0 %vm4693_vm0, %v4692_v3 }
 0xd0f   :  { %v1988_v35 = vpop.f32.mrb[68].mxu0 }
 0xd10   :  { %v4066_v30 = vpop.f32.mrb[69].mxu0  ;;  %v1989_v38 = vadd.f32 %v3595_v56, %v1988_v35 }
 0xd11   :  { %v1991_v40 = vpop.f32.mrb[70].mxu0 }
 0xd12   :  { %v1992_v1 = vadd.f32 %v3595_v56, %v1991_v40  ;;  %v4067_v26 = vpop.f32.mrb[71].mxu0 }
 0xd14   :  { %v5720_v12 = vpack.c.bf16 %v1992_v1, %v1989_v38 }
 0xd16   :  { %2104 = vrot.lane.b32.xlu1 %v5720_v12, %s4695_s18  ;;  %2017 = vrot.lane.b32.xlu0 %v5720_v12, %s4694_s17 }
 0xd19   :  { %v1996_v16 = vpop.f32.mrb[72].mxu0 }
 0xd1a   :  { %v4070_v55 = vpop.f32.mrb[73].mxu0  ;;  %v1997_v21 = vadd.f32 %v3595_v56, %v1996_v16 }
 0xd1b   :  { %v1999_v58 = vpop.f32.mrb[74].mxu0 }
 0xd1c   :  { %v2000_v53 = vadd.f32 %v3595_v56, %v1999_v58  ;;  %v4071_v49 = vpop.f32.mrb[75].mxu0 }
 0xd1e   :  { %v5726_v15 = vpack.c.bf16 %v2000_v53, %v1997_v21 }
 0xd20   :  { %2019 = vrot.lane.b32.xlu1 %v5726_v15, %s4694_s17 }
 0xd21   :  { %v2004_v41 = vpop.f32.mrb[76].mxu0 }
 0xd22   :  { %v4074_v23 = vpop.f32.mrb[77].mxu0  ;;  %v2005_v20 = vadd.f32 %v3595_v56, %v2004_v41 }
 0xd23   :  { %v2007_v60 = vpop.f32.mrb[78].mxu0 }
 0xd24   :  { %v2008_v29 = vadd.f32 %v3595_v56, %v2007_v60  ;;  %2106 = vrot.lane.b32.xlu1 %v5726_v15, %s4695_s18  ;;  %v4075_v17 = vpop.f32.mrb[79].mxu0 }
 0xd26   :  { %v5732_v34 = vpack.c.bf16 %v2008_v29, %v2005_v20 }
 0xd28   :  { %2108 = vrot.lane.b32.xlu1 %v5732_v34, %s4695_s18  ;;  %2021 = vrot.lane.b32.xlu0 %v5732_v34, %s4694_s17 }
 0xd2c   :  { %2098 = vrot.lane.b32.xlu1 %v5720_v12, %s4697_s19  ;;  %2191 = vrot.lane.b32.xlu0 %v5720_v12, %s4696_s0 }
 0xd30   :  { %2193 = vrot.lane.b32.xlu1 %v5726_v15, %s4696_s0  ;;  %2278 = vrot.lane.b32.xlu0 %v5720_v12, %s4698_s20 }
 0xd34   :  { %2280 = vrot.lane.b32.xlu1 %v5726_v15, %s4698_s20  ;;  %2100 = vrot.lane.b32.xlu0 %v5726_v15, %s4697_s19 }
 0xd38   :  { %2102 = vrot.lane.b32.xlu1 %v5732_v34, %s4697_s19  ;;  %2195 = vrot.lane.b32.xlu0 %v5732_v34, %s4696_s0 }
 0xd3c   :  { %2185 = vrot.lane.b32.xlu1 %v5720_v12, %s4699_s21  ;;  %2282 = vrot.lane.b32.xlu0 %v5732_v34, %s4698_s20 }
 0xd40   :  { %2187 = vrot.lane.b32.xlu1 %v5726_v15, %s4699_s21  ;;  %2272 = vrot.lane.b32.xlu0 %v5720_v12, %s4700_s22 }
 0xd44   :  { %2189 = vrot.lane.b32.xlu1 %v5732_v34, %s4699_s21  ;;  %2274 = vrot.lane.b32.xlu0 %v5726_v15, %s4700_s22 }
 0xd48   :  { %2650 = vrot.lane.b32.xlu1 %v5720_v12, %s4702_s24  ;;  %2276 = vrot.lane.b32.xlu0 %v5732_v34, %s4700_s22 }
 0xd4c   :  { %2652 = vrot.lane.b32.xlu1 %v5726_v15, %s4702_s24  ;;  %2728 = vrot.lane.b32.xlu0 %v5720_v12, %s4701_s23 }
 0xd50   :  { %2730 = vrot.lane.b32.xlu1 %v5726_v15, %s4701_s23  ;;  %2732 = vrot.lane.b32.xlu0 %v5732_v34, %s4701_s23 }
 0xd54   :  { %2806 = vrot.lane.b32.xlu1 %v5720_v12, %s4703_s25 }
 0xd58   :  { %2654 = vrot.lane.b32.xlu1 %v5732_v34, %s4702_s24 }
 0xd88   :  { %v2018_v50 = vpop.permute.xlu0 %2017  ;;  %v2105_v5 = vpop.permute.xlu1 %2104 }
 0xd89   :  { %v2033_v57 = vsel %vm397_vm3, %v2018_v50, 0  ;;  %v2120_v61 = vsel %vm397_vm3, %v2105_v5, 0 }
 0xd8a   :  { %4077 = vmatpush3.bf16.xpose.msra.mxu0 %v2033_v57  ;;  %4095 = vmatpush3.bf16.xpose.msra.mxu1 %v2120_v61 }
 0xd8b   :  { %4078 = vmatprep.subr.bf16.mxu0 %v4692_v3  ;;  %4096 = vmatprep.subr.bf16.mxu1 %v4692_v3 }
 0xd92   :  { %v2020_v13 = vpop.permute.xlu1 %2019 }
 0xd93   :  { %v2036_v32 = vsel %vm397_vm3, %v2020_v13, 0 }
 0xd94   :  { %4079 = vmatpush3.bf16.xpose.msra.mxu0 %v2036_v32 }
 0xd95   :  { %4080 = vmatprep.subr.bf16.mxu0 %v4692_v3 }
 0xd96   :  { %v2107_v46 = vpop.permute.xlu1 %2106 }
 0xd97   :  { %v2123_v9 = vsel %vm397_vm3, %v2107_v46, 0 }
 0xd98   :  { %4097 = vmatpush3.bf16.xpose.msra.mxu1 %v2123_v9 }
 0xd99   :  { %4098 = vmatprep.subr.bf16.mxu1 %v4692_v3 }
 0xd9a   :  { %v2022_v2 = vpop.permute.xlu0 %2021  ;;  %v2109_v0 = vpop.permute.xlu1 %2108 }
 0xd9b   :  { %v2039_v47 = vsel %vm397_vm3, %v2022_v2, 0  ;;  %v2126_v14 = vsel %vm397_vm3, %v2109_v0, 0 }
 0xd9c   :  { %4081 = vmatpush3.bf16.xpose.msra.mxu0 %v2039_v47 }
 0xd9d   :  { %4112 = vmatprep.subr.bf16.mxu0 %v4692_v3 }
 0xd9e   :  { %v2192_v27 = vpop.permute.xlu0 %2191  ;;  %v2099_v37 = vpop.permute.xlu1 %2098 }
 0xd9f   :  { %v2207_v42 = vsel %vm397_vm3, %v2192_v27, 0 }
 0xda0   :  { %4099 = vmatpush3.bf16.xpose.msra.mxu1 %v2126_v14 }
 0xda1   :  { %4130 = vmatprep.subr.bf16.mxu1 %v4692_v3 }
 0xda2   :  { %v2279_v10 = vpop.permute.xlu0 %2278  ;;  %v2194_v44 = vpop.permute.xlu1 %2193 }
 0xda3   :  { %4083 = vmatmul.mubr.msk.bf16.vlgmr.msra.gmra.mrb[80].mxu0 %vm397_vm3, %v5720_v12  ;;  %v2294_v54 = vsel %vm397_vm3, %v2279_v10, 0  ;;  %v2210_v62 = vsel %vm397_vm3, %v2194_v44, 0 }
 0xda4   :  { %4113 = vmatpush3.bf16.xpose.msra.mxu0 %v2207_v42  ;;  %4086 = vmatprep.mubr.msk.bf16.mxu0 %vm4693_vm0, %v4692_v3 }
 0xda5   :  { %4114 = vmatprep.subr.bf16.mxu0 %v4692_v3 }
 0xda6   :  { %v2101_v51 = vpop.permute.xlu0 %2100  ;;  %v2281_v52 = vpop.permute.xlu1 %2280 }
 0xda7   :  { %4101 = vmatmul.mubr.msk.bf16.vlgmr.msra.gmra.mrb[88].mxu1 %vm397_vm3, %v2099_v37  ;;  %v2297_v4 = vsel %vm397_vm3, %v2281_v52, 0 }
 0xda8   :  { %4131 = vmatpush3.bf16.xpose.msra.mxu1 %v2294_v54  ;;  %4104 = vmatprep.mubr.msk.bf16.mxu1 %vm4693_vm0, %v4692_v3 }
 0xda9   :  { %4132 = vmatprep.subr.bf16.mxu1 %v4692_v3 }
 0xdaa   :  { %v2196_v63 = vpop.permute.xlu0 %2195  ;;  %v2103_v7 = vpop.permute.xlu1 %2102 }
 0xdab   :  { %4087 = vmatmul.mubr.msk.bf16.gmra.mrb[84].mxu0 %vm397_vm3, %v5726_v15  ;;  %v2213_v18 = vsel %vm397_vm3, %v2196_v63, 0 }
 0xdac   :  { %4115 = vmatpush3.bf16.xpose.msra.mxu0 %v2210_v62  ;;  %4090 = vmatprep.mubr.msk.bf16.mxu0 %vm4693_vm0, %v4692_v3 }
 0xdad   :  { %4116 = vmatprep.subr.bf16.mxu0 %v4692_v3 }
 0xdae   :  { %v2283_v31 = vpop.permute.xlu0 %2282  ;;  %v2186_v25 = vpop.permute.xlu1 %2185 }
 0xdaf   :  { %4105 = vmatmul.mubr.msk.bf16.gmra.mrb[92].mxu1 %vm397_vm3, %v2101_v51  ;;  %v2300_v22 = vsel %vm397_vm3, %v2283_v31, 0 }
 0xdb0   :  { %4133 = vmatpush3.bf16.xpose.msra.mxu1 %v2297_v4  ;;  %4108 = vmatprep.mubr.msk.bf16.mxu1 %vm4693_vm0, %v4692_v3 }
 0xdb1   :  { %4134 = vmatprep.subr.bf16.mxu1 %v4692_v3 }
 0xdb2   :  { %v2273_v28 = vpop.permute.xlu0 %2272  ;;  %v2188_v36 = vpop.permute.xlu1 %2187 }
 0xdb3   :  { %4091 = vmatmul.mubr.msk.bf16.gmra.mrb[88].mxu0 %vm397_vm3, %v5732_v34 }
 0xdb4   :  { %4117 = vmatpush3.bf16.xpose.msra.mxu0 %v2213_v18  ;;  %4118 = vmatprep.mubr.msk.bf16.mxu0 %vm4693_vm0, %v4692_v3 }
 0xdb5   :  { %4148 = vmatprep.subr.bf16.mxu0 %v4692_v3 }
 0xdb6   :  { %v2275_v11 = vpop.permute.xlu0 %2274  ;;  %v2190_v19 = vpop.permute.xlu1 %2189 }
 0xdb7   :  { %4109 = vmatmul.mubr.msk.bf16.gmra.mrb[96].mxu1 %vm397_vm3, %v2103_v7 }
 0xdb8   :  { %4135 = vmatpush3.bf16.xpose.msra.mxu1 %v2300_v22  ;;  %4136 = vmatprep.mubr.msk.bf16.mxu1 %vm4693_vm0, %v4692_v3 }
 0xdb9   :  { %4166 = vmatprep.subr.bf16.mxu1 %v4692_v3 }
 0xdba   :  { %v2277_v6 = vpop.permute.xlu0 %2276  ;;  %v2651_v56 = vpop.permute.xlu1 %2650 }
 0xdbb   :  { %4119 = vmatmul.mubr.msk.bf16.vlgmr.msra.gmra.mrb[92].mxu0 %vm397_vm3, %v2186_v25 }
 0xdbc   :  { %4149 = vmatpush3.bf16.msra.mxu0 %v2651_v56  ;;  %4122 = vmatprep.mubr.msk.bf16.mxu0 %vm4693_vm0, %v4692_v3 }
 0xdbd   :  { %4150 = vmatprep.subr.bf16.mxu0 %v4692_v3 }
 0xdbe   :  { %v2729_v35 = vpop.permute.xlu0 %2728  ;;  %v2653_v30 = vpop.permute.xlu1 %2652 }
 0xdbf   :  { %4137 = vmatmul.mubr.msk.bf16.vlgmr.msra.gmra.mrb[100].mxu1 %vm397_vm3, %v2273_v28 }
 0xdc0   :  { %4151 = vmatpush3.bf16.msra.mxu0 %v2653_v30  ;;  %4167 = vmatpush3.bf16.msra.mxu1 %v2729_v35 }
 0xdc1   :  { %4168 = vmatprep.subr.bf16.mxu1 %v4692_v3  ;;  %4140 = vmatprep.mubr.msk.bf16.mxu1 %vm4693_vm0, %v4692_v3 }
 0xdc2   :  { %v2731_v40 = vpop.permute.xlu1 %2730  ;;  %4152 = vmatprep.subr.bf16.mxu0 %v4692_v3  ;;  %v2733_v1 = vpop.permute.xlu0 %2732 }
 0xdc3   :  { %4123 = vmatmul.mubr.msk.bf16.gmra.mrb[96].mxu0 %vm397_vm3, %v2188_v36 }
 0xdc4   :  { %4169 = vmatpush3.bf16.msra.mxu1 %v2731_v40  ;;  %4126 = vmatprep.mubr.msk.bf16.mxu0 %vm4693_vm0, %v4692_v3 }
 0xdc5   :  { %4170 = vmatprep.subr.bf16.mxu1 %v4692_v3 }
 0xdc6   :  { %v5840_v38 = vpop.permute.xlu1 %2806 }
 0xdc7   :  { %4141 = vmatmul.mubr.msk.bf16.gmra.mrb[104].mxu1 %vm397_vm3, %v2275_v11 }
 0xdc8   :  { %4171 = vmatpush3.bf16.msra.mxu1 %v2733_v1  ;;  %4144 = vmatprep.mubr.msk.bf16.mxu1 %vm4693_vm0, %v4692_v3 }
 0xdc9   :  { %4202 = vmatprep.subr.bf16.mxu1 %v4692_v3 }
 0xdca   :  { %v2655_v26 = vpop.permute.xlu1 %2654 }
 0xdcb   :  { %4127 = vmatmul.mubr.msk.bf16.gmra.mrb[100].mxu0 %vm397_vm3, %v2190_v19 }
 0xdcc   :  { %4153 = vmatpush3.bf16.msra.mxu0 %v2655_v26  ;;  %4154 = vmatprep.mubr.msk.bf16.mxu0 %vm4693_vm0, %v4692_v3 }
 0xdcd   :  { %4184 = vmatprep.subr.bf16.mxu0 %v4692_v3 }
 0xdcf   :  { %4145 = vmatmul.mubr.msk.bf16.gmra.mrb[108].mxu1 %vm397_vm3, %v2277_v6 }
 0xdd0   :  { %4172 = vmatprep.mubr.msk.bf16.mxu1 %vm4693_vm0, %v4692_v3 }
 0xe76   :  { %v2075_v16 = vpop.f32.mrb[80].mxu0 }
 0xe77   :  { %v5854_v55 = vadd.f32 %v2075_v16, %v5065_v24  ;;  %v4084_v58 = vpop.f32.mrb[81].mxu0 }
 0xe78   :  { %v2078_v21 = vpop.f32.mrb[82].mxu0 }
 0xe79   :  { %v4085_v53 = vpop.f32.mrb[83].mxu0  ;;  %v2383_v49 = vsel %vm758_vm5, %v5854_v55, -inf  ;;  %v5862_v29 = vadd.f32 %v2078_v21, %v5065_v24 }
 0xe7a   :  { %2384 = vmax.xlane.f32.xlu1 %v2383_v49  ;;  %v2162_v41 = vpop.f32.mrb[88].mxu1 }
 0xe7b   :  { %v5859_v23 = vadd.f32 %v2162_v41, %v5065_v24  ;;  %v4102_v60 = vpop.f32.mrb[89].mxu1  ;;  %v2386_v2 = vsel %vm758_vm5, %v5862_v29, -inf }
 0xe7c   :  { %v2165_v20 = vpop.f32.mrb[90].mxu1 }
 0xe7d   :  { %v4103_v17 = vpop.f32.mrb[91].mxu1  ;;  %v2401_v50 = vsel %vm758_vm5, %v5859_v23, -inf  ;;  %v5870_v32 = vadd.f32 %v2165_v20, %v5065_v24 }
 0xe7e   :  { %v2083_v5 = vpop.f32.mrb[84].mxu0  ;;  %2402 = vmax.xlane.f32.xlu0 %v2401_v50 }
 0xe7f   :  { %v5867_v57 = vadd.f32 %v2083_v5, %v5065_v24  ;;  %v4088_v61 = vpop.f32.mrb[85].mxu0  ;;  %v2404_v44 = vsel %vm758_vm5, %v5870_v32, -inf }
 0xe80   :  { %v2086_v13 = vpop.f32.mrb[86].mxu0 }
 0xe81   :  { %v4089_v46 = vpop.f32.mrb[87].mxu0  ;;  %v2389_v9 = vsel %vm758_vm5, %v5867_v57, -inf  ;;  %v5880_v14 = vadd.f32 %v2086_v13, %v5090_v59 }
 0xe82   :  { %2390 = vmax.xlane.f32.xlu1 %v2389_v9  ;;  %2387 = vmax.xlane.f32.xlu0 %v2386_v2  ;;  %v2170_v0 = vpop.f32.mrb[92].mxu1 }
 0xe83   :  { %v5877_v47 = vadd.f32 %v2170_v0, %v5065_v24  ;;  %v4106_v27 = vpop.f32.mrb[93].mxu1  ;;  %v2392_v31 = vsel %vm758_vm5, %v5880_v14, -inf }
 0xe84   :  { %v2173_v37 = vpop.f32.mrb[94].mxu1 }
 0xe85   :  { %v4107_v10 = vpop.f32.mrb[95].mxu1  ;;  %v2407_v42 = vsel %vm758_vm5, %v5877_v47, -inf  ;;  %v5890_v7 = vadd.f32 %v2173_v37, %v5090_v59 }
 0xe86   :  { %v2091_v51 = vpop.f32.mrb[88].mxu0  ;;  %2405 = vmax.xlane.f32.xlu0 %v2404_v44  ;;  %2408 = vmax.xlane.f32.xlu1 %v2407_v42 }
 0xe87   :  { %v5887_v52 = vadd.f32 %v2091_v51, %v5090_v59  ;;  %v4092_v54 = vpop.f32.mrb[89].mxu0  ;;  %v2410_v22 = vsel %vm758_vm5, %v5890_v7, -inf }
 0xe88   :  { %v2094_v63 = vpop.f32.mrb[90].mxu0 }
 0xe89   :  { %v4093_v62 = vpop.f32.mrb[91].mxu0  ;;  %v2395_v25 = vsel %vm758_vm5, %v5887_v52, -inf  ;;  %v5900_v11 = vadd.f32 %v2094_v63, %v5090_v59 }
 0xe8a   :  { %2393 = vmax.xlane.f32.xlu0 %v2392_v31  ;;  %2396 = vmax.xlane.f32.xlu1 %v2395_v25  ;;  %v2178_v4 = vpop.f32.mrb[96].mxu1 }
 0xe8b   :  { %v5897_v28 = vadd.f32 %v2178_v4, %v5090_v59  ;;  %v4110_v36 = vpop.f32.mrb[97].mxu1  ;;  %v2398_v16 = vsel %vm758_vm5, %v5900_v11, -inf }
 0xe8c   :  { %v2181_v18 = vpop.f32.mrb[98].mxu1 }
 0xe8d   :  { %v4111_v19 = vpop.f32.mrb[99].mxu1  ;;  %v2413_v6 = vsel %vm758_vm5, %v5897_v28, -inf  ;;  %v5910_v1 = vadd.f32 %v2181_v18, %v5090_v59 }
 0xe8e   :  { %v2249_v56 = vpop.f32.mrb[92].mxu0  ;;  %2411 = vmax.xlane.f32.xlu0 %v2410_v22  ;;  %2414 = vmax.xlane.f32.xlu1 %v2413_v6 }
 0xe8f   :  { %v5907_v35 = vadd.f32 %v2249_v56, %v5065_v24  ;;  %v4120_v30 = vpop.f32.mrb[93].mxu0  ;;  %v2416_v17 = vsel %vm758_vm5, %v5910_v1, -inf }
 0xe90   :  { %v2252_v40 = vpop.f32.mrb[94].mxu0 }
 0xe91   :  { %v4121_v26 = vpop.f32.mrb[95].mxu0  ;;  %v2419_v58 = vsel %vm758_vm5, %v5907_v35, -inf  ;;  %v5920_v60 = vadd.f32 %v2252_v40, %v5065_v24 }
 0xe92   :  { %2399 = vmax.xlane.f32.xlu0 %v2398_v16  ;;  %2420 = vmax.xlane.f32.xlu1 %v2419_v58  ;;  %v2336_v21 = vpop.f32.mrb[100].mxu1 }
 0xe93   :  { %v5917_v53 = vadd.f32 %v2336_v21, %v5065_v24  ;;  %v4138_v49 = vpop.f32.mrb[101].mxu1  ;;  %v2422_v0 = vsel %vm758_vm5, %v5920_v60, -inf }
 0xe94   :  { %v2339_v41 = vpop.f32.mrb[102].mxu1 }
 0xe95   :  { %v4139_v20 = vpop.f32.mrb[103].mxu1  ;;  %v2437_v50 = vsel %vm758_vm5, %v5917_v53, -inf  ;;  %v5930_v9 = vadd.f32 %v2339_v41, %v5065_v24 }
 0xe96   :  { %v2257_v5 = vpop.f32.mrb[96].mxu0  ;;  %2417 = vmax.xlane.f32.xlu0 %v2416_v17  ;;  %2438 = vmax.xlane.f32.xlu1 %v2437_v50 }
 0xe97   :  { %v5927_v61 = vadd.f32 %v2257_v5, %v5065_v24  ;;  %v4124_v13 = vpop.f32.mrb[97].mxu0  ;;  %v2440_v63 = vsel %vm758_vm5, %v5930_v9, -inf }
 0xe98   :  { %v2260_v46 = vpop.f32.mrb[98].mxu0 }
 0xe99   :  { %v4125_v2 = vpop.f32.mrb[99].mxu0  ;;  %v2425_v27 = vsel %vm758_vm5, %v5927_v61, -inf  ;;  %v5940_v51 = vadd.f32 %v2260_v46, %v5090_v59 }
 0xe9a   :  { %2423 = vmax.xlane.f32.xlu0 %v2422_v0  ;;  %2426 = vmax.xlane.f32.xlu1 %v2425_v27  ;;  %v2344_v37 = vpop.f32.mrb[104].mxu1 }
 0xe9b   :  { %v5937_v10 = vadd.f32 %v2344_v37, %v5065_v24  ;;  %v4142_v44 = vpop.f32.mrb[105].mxu1  ;;  %v2428_v19 = vsel %vm758_vm5, %v5940_v51, -inf }
 0xe9c   :  { %v2347_v42 = vpop.f32.mrb[106].mxu1 }
 0xe9d   :  { %v4143_v54 = vpop.f32.mrb[107].mxu1  ;;  %v2443_v62 = vsel %vm758_vm5, %v5937_v10, -inf  ;;  %v5950_v36 = vadd.f32 %v2347_v42, %v5090_v59 }
 0xe9e   :  { %v2265_v31 = vpop.f32.mrb[100].mxu0  ;;  %2441 = vmax.xlane.f32.xlu0 %v2440_v63  ;;  %2444 = vmax.xlane.f32.xlu1 %v2443_v62 }
 0xe9f   :  { %v5947_v25 = vadd.f32 %v2265_v31, %v5090_v59  ;;  %v4128_v24 = vpop.f32.mrb[101].mxu0  ;;  %v2446_v58 = vsel %vm758_vm5, %v5950_v36, -inf }
 0xea0   :  { %v2268_v4 = vpop.f32.mrb[102].mxu0 }
 0xea1   :  { %v4129_v18 = vpop.f32.mrb[103].mxu0  ;;  %v2431_v22 = vsel %vm758_vm5, %v5947_v25, -inf  ;;  %v5960_v26 = vadd.f32 %v2268_v4, %v5090_v59 }
 0xea2   :  { %2429 = vmax.xlane.f32.xlu0 %v2428_v19  ;;  %2432 = vmax.xlane.f32.xlu1 %v2431_v22  ;;  %v2352_v6 = vpop.f32.mrb[108].mxu1 }
 0xea3   :  { %v5957_v56 = vadd.f32 %v2352_v6, %v5090_v59  ;;  %v4146_v30 = vpop.f32.mrb[109].mxu1  ;;  %v2434_v41 = vsel %vm758_vm5, %v5960_v26, -inf }
 0xea4   :  { %v2355_v40 = vpop.f32.mrb[110].mxu1 }
 0xea5   :  { %v4147_v16 = vpop.f32.mrb[111].mxu1  ;;  %v2449_v21 = vsel %vm758_vm5, %v5957_v56, -inf  ;;  %v5967_v49 = vadd.f32 %v2355_v40, %v5090_v59 }
 0xea6   :  { %2447 = vmax.xlane.f32.xlu0 %v2446_v58  ;;  %2450 = vmax.xlane.f32.xlu1 %v2449_v21 }
 0xea7   :  { %v2452_v20 = vsel %vm758_vm5, %v5967_v49, -inf }
 0xeaa   :  { %2435 = vmax.xlane.f32.xlu0 %v2434_v41 }
 0xeae   :  { %2453 = vmax.xlane.f32.xlu0 %v2452_v20 }
 0xeb7   :  { %2808 = vrot.lane.b32.xlu1 %v5726_v15, %s4703_s25 }
 0xebb   :  { %2886 = vrot.lane.b32.xlu1 %v5726_v15, %s4705_s1 }
 0xec4   :  { %2884 = vrot.lane.b32.xlu0 %v5720_v12, %s4705_s1 }
 0xf07   :  { %v2385_v17 = vpop.xlane.xlu1 %2384 }
 0xf08   :  { %v2455_v59 = vsub.f32 %v5854_v55, %v2385_v17 }
 0xf0a   :  { %v2479_v50 = vmul.f32 1.442695, %v2455_v59 }
 0xf0b   :  { %v2403_v5 = vpop.xlane.xlu0 %2402 }
 0xf0c   :  { %4546 = vpow2.f32 %v2479_v50  ;;  %v2461_v13 = vsub.f32 %v5859_v23, %v2403_v5 }
 0xf0e   :  { %v2491_v46 = vmul.f32 1.442695, %v2461_v13 }
 0xf0f   :  { %v2391_v2 = vpop.xlane.xlu1 %2390  ;;  %v2388_v0 = vpop.xlane.xlu0 %2387 }
 0xf10   :  { %4548 = vpow2.f32 %v2491_v46  ;;  %v2457_v27 = vsub.f32 %v5867_v57, %v2391_v2  ;;  %v2456_v37 = vsub.f32 %v5862_v29, %v2388_v0 }
 0xf12   :  { %v2483_v15 = vmul.f32 1.442695, %v2457_v27  ;;  %v2481_v44 = vmul.f32 1.442695, %v2456_v37 }
 0xf13   :  { %v2406_v42 = vpop.xlane.xlu0 %2405  ;;  %v2409_v12 = vpop.xlane.xlu1 %2408 }
 0xf14   :  { %4550 = vpow2.f32 %v2483_v15  ;;  %v2462_v55 = vsub.f32 %v5870_v32, %v2406_v42  ;;  %v2463_v54 = vsub.f32 %v5877_v47, %v2409_v12 }
 0xf15   :  { %4552 = vpow2.f32 %v2481_v44 }
 0xf16   :  { %v5985_v63 = vpop.eup %4546  ;;  %v2493_v23 = vmul.f32 1.442695, %v2462_v55  ;;  %v2495_v62 = vmul.f32 1.442695, %v2463_v54 }
 0xf17   :  { %v2394_v31 = vpop.xlane.xlu0 %2393  ;;  %v2397_v24 = vpop.xlane.xlu1 %2396  ;;  %v2527_v57 = vsel %vm758_vm5, %v5985_v63, 0.0 }
 0xf18   :  { %4554 = vpow2.f32 %v2493_v23  ;;  %v2458_v29 = vsub.f32 %v5880_v14, %v2394_v31  ;;  %v2459_v4 = vsub.f32 %v5887_v52, %v2397_v24  ;;  %2528 = vadd.xlane.f32.xlu1 %v2527_v57 }
 0xf19   :  { %4556 = vpow2.f32 %v2495_v62 }
 0xf1a   :  { %v5991_v32 = vpop.eup %4548  ;;  %v2485_v47 = vmul.f32 1.442695, %v2458_v29  ;;  %v2487_v18 = vmul.f32 1.442695, %v2459_v4 }
 0xf1b   :  { %v2412_v19 = vpop.xlane.xlu0 %2411  ;;  %v2415_v22 = vpop.xlane.xlu1 %2414  ;;  %v2545_v6 = vsel %vm758_vm5, %v5991_v32, 0.0 }
 0xf1c   :  { %4558 = vpow2.f32 %v2485_v47  ;;  %v2464_v30 = vsub.f32 %v5890_v7, %v2412_v19  ;;  %v2465_v40 = vsub.f32 %v5897_v28, %v2415_v22  ;;  %2546 = vadd.xlane.f32.xlu1 %v2545_v6 }
 0xf1d   :  { %4560 = vpow2.f32 %v2487_v18 }
 0xf1e   :  { %v5997_v14 = vpop.eup %4550  ;;  %v2497_v52 = vmul.f32 1.442695, %v2464_v30  ;;  %v2499_v16 = vmul.f32 1.442695, %v2465_v40 }
 0xf1f   :  { %v5999_v58 = vpop.eup %4552  ;;  %v2400_v21 = vpop.xlane.xlu0 %2399  ;;  %v2533_v20 = vsel %vm758_vm5, %v5997_v14, 0.0 }
 0xf20   :  { %v2421_v41 = vpop.xlane.xlu1 %2420  ;;  %4562 = vpow2.f32 %v2497_v52  ;;  %v2460_v17 = vsub.f32 %v5900_v11, %v2400_v21  ;;  %2534 = vadd.xlane.f32.xlu1 %v2533_v20  ;;  %v2530_v28 = vsel %vm758_vm5, %v5999_v58, 0.0 }
 0xf21   :  { %v2467_v7 = vsub.f32 %v5907_v35, %v2421_v41  ;;  %4564 = vpow2.f32 %v2499_v16  ;;  %2531 = vadd.xlane.f32.xlu0 %v2530_v28 }
 0xf22   :  { %v6007_v59 = vpop.eup %4554  ;;  %v2489_v50 = vmul.f32 1.442695, %v2460_v17 }
 0xf23   :  { %v2503_v5 = vmul.f32 1.442695, %v2467_v7  ;;  %v6009_v13 = vpop.eup %4556  ;;  %v2418_v46 = vpop.xlane.xlu0 %2417  ;;  %v2548_v0 = vsel %vm758_vm5, %v6007_v59, 0.0 }
 0xf24   :  { %v2439_v2 = vpop.xlane.xlu1 %2438  ;;  %4566 = vpow2.f32 %v2489_v50  ;;  %v2466_v11 = vsub.f32 %v5910_v1, %v2418_v46  ;;  %v2551_v27 = vsel %vm758_vm5, %v6009_v13, 0.0 }
 0xf25   :  { %v2473_v35 = vsub.f32 %v5917_v53, %v2439_v2  ;;  %4568 = vpow2.f32 %v2503_v5  ;;  %2552 = vadd.xlane.f32.xlu1 %v2551_v27  ;;  %2549 = vadd.xlane.f32.xlu0 %v2548_v0 }
 0xf26   :  { %v6017_v37 = vpop.eup %4558  ;;  %v2501_v15 = vmul.f32 1.442695, %v2466_v11 }
 0xf27   :  { %v6019_v44 = vpop.eup %4560  ;;  %v2515_v42 = vmul.f32 1.442695, %v2473_v35  ;;  %v2424_v12 = vpop.xlane.xlu0 %2423  ;;  %v2536_v54 = vsel %vm758_vm5, %v6017_v37, 0.0 }
 0xf28   :  { %v2427_v55 = vpop.xlane.xlu1 %2426  ;;  %4570 = vpow2.f32 %v2501_v15  ;;  %v2468_v1 = vsub.f32 %v5920_v60, %v2424_v12  ;;  %v2539_v23 = vsel %vm758_vm5, %v6019_v44, 0.0 }
 0xf29   :  { %v2469_v53 = vsub.f32 %v5927_v61, %v2427_v55  ;;  %2540 = vadd.xlane.f32.xlu1 %v2539_v23  ;;  %2537 = vadd.xlane.f32.xlu0 %v2536_v54  ;;  %4572 = vpow2.f32 %v2515_v42 }
 0xf2a   :  { %v6027_v62 = vpop.eup %4562  ;;  %v2505_v57 = vmul.f32 1.442695, %v2468_v1 }
 0xf2b   :  { %v2507_v31 = vmul.f32 1.442695, %v2469_v53  ;;  %v6029_v24 = vpop.eup %4564  ;;  %v2442_v29 = vpop.xlane.xlu0 %2441  ;;  %v2554_v47 = vsel %vm758_vm5, %v6027_v62, 0.0 }
 0xf2c   :  { %v2445_v4 = vpop.xlane.xlu1 %2444  ;;  %v2474_v60 = vsub.f32 %v5930_v9, %v2442_v29  ;;  %v2557_v18 = vsel %vm758_vm5, %v6029_v24, 0.0 }
 0xf2d   :  { %v2475_v61 = vsub.f32 %v5937_v10, %v2445_v4  ;;  %4574 = vpow2.f32 %v2507_v31  ;;  %2558 = vadd.xlane.f32.xlu1 %v2557_v18  ;;  %2555 = vadd.xlane.f32.xlu0 %v2554_v47 }
 0xf2e   :  { %v6037_v19 = vpop.eup %4566  ;;  %4576 = vpow2.f32 %v2505_v57  ;;  %v2517_v30 = vmul.f32 1.442695, %v2474_v60 }
 0xf2f   :  { %v2519_v22 = vmul.f32 1.442695, %v2475_v61  ;;  %v6039_v6 = vpop.eup %4568  ;;  %v2430_v40 = vpop.xlane.xlu0 %2429  ;;  %v2542_v9 = vsel %vm758_vm5, %v6037_v19, 0.0 }
 0xf30   :  { %v2433_v52 = vpop.xlane.xlu1 %2432  ;;  %v2470_v10 = vsub.f32 %v5940_v51, %v2430_v40  ;;  %v2563_v21 = vsel %vm758_vm5, %v6039_v6, 0.0 }
 0xf31   :  { %v2471_v16 = vsub.f32 %v5947_v25, %v2433_v52  ;;  %4578 = vpow2.f32 %v2519_v22  ;;  %2564 = vadd.xlane.f32.xlu1 %v2563_v21  ;;  %2543 = vadd.xlane.f32.xlu0 %v2542_v9 }
 0xf32   :  { %v6047_v41 = vpop.eup %4570  ;;  %4580 = vpow2.f32 %v2517_v30  ;;  %v2509_v17 = vmul.f32 1.442695, %v2470_v10 }
 0xf33   :  { %v2511_v20 = vmul.f32 1.442695, %v2471_v16  ;;  %v2448_v7 = vpop.xlane.xlu0 %2447  ;;  %v2560_v50 = vsel %vm758_vm5, %v6047_v41, 0.0  ;;  %v6053_v5 = vpop.eup %4572 }
 0xf34   :  { %v2451_v28 = vpop.xlane.xlu1 %2450  ;;  %v2476_v51 = vsub.f32 %v5950_v36, %v2448_v7  ;;  %v2581_v36 = vsel %vm758_vm5, %v6053_v5, 0.0 }
 0xf35   :  { %v2477_v25 = vsub.f32 %v5957_v56, %v2451_v28  ;;  %4582 = vpow2.f32 %v2511_v20  ;;  %2561 = vadd.xlane.f32.xlu0 %v2560_v50 }
 0xf36   :  { %4584 = vpow2.f32 %v2509_v17  ;;  %v2521_v0 = vmul.f32 1.442695, %v2476_v51 }
 0xf37   :  { %v2523_v46 = vmul.f32 1.442695, %v2477_v25  ;;  %v6055_v2 = vpop.eup %4574  ;;  %v2436_v11 = vpop.xlane.xlu0 %2435 }
 0xf38   :  { %v2472_v35 = vsub.f32 %v5960_v26, %v2436_v11  ;;  %v2569_v27 = vsel %vm758_vm5, %v6055_v2, 0.0  ;;  %v6062_v15 = vpop.eup %4576  ;;  %v2809_v52 = vpop.permute.xlu1 %2808 }
 0xf39   :  { %4586 = vpow2.f32 %v2523_v46  ;;  %2570 = vadd.xlane.f32.xlu1 %v2569_v27  ;;  %2582 = vadd.xlane.f32.xlu0 %v2581_v36  ;;  %v2566_v54 = vsel %vm758_vm5, %v6062_v15, 0.0 }
 0xf3a   :  { %4588 = vpow2.f32 %v2521_v0  ;;  %v2513_v42 = vmul.f32 1.442695, %v2472_v35 }
 0xf3b   :  { %v6064_v56 = vpop.eup %4578  ;;  %v2454_v12 = vpop.xlane.xlu0 %2453 }
 0xf3c   :  { %v2478_v55 = vsub.f32 %v5967_v49, %v2454_v12  ;;  %v2587_v26 = vsel %vm758_vm5, %v6064_v56, 0.0  ;;  %v6071_v1 = vpop.eup %4580  ;;  %4590 = vpow2.f32 %v2513_v42  ;;  %v2887_v9 = vpop.permute.xlu1 %2886 }
 0xf3d   :  { %2588 = vadd.xlane.f32.xlu1 %v2587_v26  ;;  %2567 = vadd.xlane.f32.xlu0 %v2566_v54  ;;  %v2584_v49 = vsel %vm758_vm5, %v6071_v1, 0.0 }
 0xf3e   :  { %v2525_v23 = vmul.f32 1.442695, %v2478_v55 }
 0xf3f   :  { %v6073_v53 = vpop.eup %4582  ;;  %v2885_v21 = vpop.permute.xlu0 %2884 }
 0xf40   :  { %v2575_v31 = vsel %vm758_vm5, %v6073_v53, 0.0  ;;  %v6079_v57 = vpop.eup %4584  ;;  %4592 = vpow2.f32 %v2525_v23 }
 0xf41   :  { %2576 = vadd.xlane.f32.xlu1 %v2575_v31  ;;  %2585 = vadd.xlane.f32.xlu0 %v2584_v49  ;;  %v2572_v47 = vsel %vm758_vm5, %v6079_v57, 0.0 }
 0xf43   :  { %v6081_v29 = vpop.eup %4586 }
 0xf44   :  { %v2593_v4 = vsel %vm758_vm5, %v6081_v29, 0.0  ;;  %v6087_v60 = vpop.eup %4588 }
 0xf45   :  { %2594 = vadd.xlane.f32.xlu1 %v2593_v4  ;;  %2573 = vadd.xlane.f32.xlu0 %v2572_v47  ;;  %v2590_v61 = vsel %vm758_vm5, %v6087_v60, 0.0 }
 0xf46   :  { %v6091_v18 = vpop.eup %4590 }
 0xf47   :  { %v2578_v22 = vsel %vm758_vm5, %v6091_v18, 0.0 }
 0xf49   :  { %2591 = vadd.xlane.f32.xlu0 %v2590_v61 }
 0xf4a   :  { %v6095_v30 = vpop.eup %4592 }
 0xf4b   :  { %v2596_v40 = vsel %vm758_vm5, %v6095_v30, 0.0 }
 0xf4d   :  { %2579 = vadd.xlane.f32.xlu0 %v2578_v22 }
 0xf51   :  { %2597 = vadd.xlane.f32.xlu0 %v2596_v40 }
 0xf56   :  { %2810 = vrot.lane.b32.xlu1 %v5732_v34, %s4703_s25 }
 0xf67   :  { %2888 = vrot.lane.b32.xlu0 %v5732_v34, %s4705_s1 }
 0xfa5   :  { %v2529_v10 = vpop.xlane.xlu1 %2528 }
 0xfa6   :  { %4594 = vrcp.f32 %v2529_v10 }
 0xfa9   :  { %v2547_v16 = vpop.xlane.xlu1 %2546 }
 0xfad   :  { %v2535_v20 = vpop.xlane.xlu1 %2534 }
 0xfae   :  { %v2532_v17 = vpop.xlane.xlu0 %2531 }
 0xfaf   :  { %4596 = vrcp.f32 %v2532_v17 }
 0xfb0   :  { %4598 = vrcp.f32 %v2547_v16  ;;  %v4595_v25 = vpop.eup %4594 }
 0xfb1   :  { %v2623_v34 = vmul.f32 %v4595_v25, %v5985_v63 }
 0xfb2   :  { %v2553_v7 = vpop.xlane.xlu1 %2552  ;;  %v2550_v28 = vpop.xlane.xlu0 %2549 }
 0xfb3   :  { %4600 = vrcp.f32 %v2550_v28 }
 0xfb4   :  { %4602 = vrcp.f32 %v2535_v20 }
 0xfb6   :  { %v2541_v50 = vpop.xlane.xlu1 %2540  ;;  %v2538_v51 = vpop.xlane.xlu0 %2537 }
 0xfb7   :  { %4604 = vrcp.f32 %v2538_v51 }
 0xfb8   :  { %4606 = vrcp.f32 %v2553_v7 }
 0xfb9   :  { %v4597_v46 = vpop.eup %4596 }
 0xfba   :  { %v2624_v0 = vmul.f32 %v4597_v46, %v5999_v58  ;;  %v2556_v11 = vpop.xlane.xlu0 %2555  ;;  %v4599_v35 = vpop.eup %4598 }
 0xfbb   :  { %v2559_v36 = vpop.xlane.xlu1 %2558  ;;  %4608 = vrcp.f32 %v2556_v11  ;;  %v2629_v55 = vmul.f32 %v4599_v35, %v5991_v32 }
 0xfbc   :  { %v2647_v27 = vpack.c.bf16 %v2624_v0, %v2623_v34  ;;  %4610 = vrcp.f32 %v2541_v50 }
 0xfbd   :  { %v4601_v42 = vpop.eup %4600 }
 0xfbe   :  { %4155 = vmatmul.mubr.msk.bf16.vlgmr.msra.gmra.mrb[104].mxu0 %vm758_vm5, %v2647_v27  ;;  %v2544_v12 = vpop.xlane.xlu0 %2543  ;;  %v2630_v26 = vmul.f32 %v4601_v42, %v6007_v59  ;;  %v4603_v63 = vpop.eup %4602 }
 0xfbf   :  { %4185 = vmatpush3.bf16.msra.mxu0 %v5840_v38  ;;  %4158 = vmatprep.mubr.msk.bf16.mxu0 %vm4693_vm0, %v4692_v3  ;;  %4612 = vrcp.f32 %v2544_v12  ;;  %v2565_v23 = vpop.xlane.xlu1 %2564  ;;  %v2625_v32 = vmul.f32 %v4603_v63, %v5997_v14 }
 0xfc0   :  { %4186 = vmatprep.subr.bf16.mxu0 %v4692_v3  ;;  %v2725_v58 = vpack.c.bf16 %v2630_v26, %v2629_v55  ;;  %4614 = vrcp.f32 %v2559_v36 }
 0xfc1   :  { %v4605_v54 = vpop.eup %4604 }
 0xfc2   :  { %v2562_v31 = vpop.xlane.xlu0 %2561  ;;  %4173 = vmatmul.mubr.msk.bf16.vlgmr.msra.gmra.mrb[112].mxu1 %vm758_vm5, %v2725_v58  ;;  %v2626_v38 = vmul.f32 %v4605_v54, %v6017_v37  ;;  %v4607_v59 = vpop.eup %4606 }
 0xfc3   :  { %4187 = vmatpush3.bf16.msra.mxu0 %v2809_v52  ;;  %4616 = vrcp.f32 %v2562_v31  ;;  %4203 = vmatpush3.bf16.msra.mxu1 %v2885_v21  ;;  %v2631_v22 = vmul.f32 %v4607_v59, %v6009_v13 }
 0xfc4   :  { %4176 = vmatprep.mubr.msk.bf16.mxu1 %vm4693_vm0, %v4692_v3  ;;  %4204 = vmatprep.subr.bf16.mxu1 %v4692_v3  ;;  %v2648_v49 = vpack.c.bf16 %v2626_v38, %v2625_v32  ;;  %4618 = vrcp.f32 %v2565_v23 }
 0xfc5   :  { %4188 = vmatprep.subr.bf16.mxu0 %v4692_v3  ;;  %v4609_v4 = vpop.eup %4608 }
 0xfc6   :  { %v2571_v47 = vpop.xlane.xlu1 %2570  ;;  %v2583_v61 = vpop.xlane.xlu0 %2582  ;;  %4159 = vmatmul.mubr.msk.bf16.gmra.mrb[108].mxu0 %vm758_vm5, %v2648_v49  ;;  %v2632_v14 = vmul.f32 %v4609_v4, %v6027_v62 }
 0xfc7   :  { %v4611_v37 = vpop.eup %4610  ;;  %4205 = vmatpush3.bf16.msra.mxu1 %v2887_v9  ;;  %4162 = vmatprep.mubr.msk.bf16.mxu0 %vm4693_vm0, %v4692_v3 }
 0xfc8   :  { %v2726_v40 = vpack.c.bf16 %v2632_v14, %v2631_v22  ;;  %4206 = vmatprep.subr.bf16.mxu1 %v4692_v3  ;;  %v2627_v20 = vmul.f32 %v4611_v37, %v6019_v44  ;;  %v3624_v22 = vld [vmem:[%s6433_s5 + $0x28] sm:$0xff] }
 0xfc9   :  { %v4613_v52 = vpop.eup %4612 }
 0xfca   :  { %v2589_v10 = vpop.xlane.xlu1 %2588  ;;  %v2568_v16 = vpop.xlane.xlu0 %2567  ;;  %4177 = vmatmul.mubr.msk.bf16.gmra.mrb[116].mxu1 %vm758_vm5, %v2726_v40  ;;  %v2628_v13 = vmul.f32 %v4613_v52, %v6037_v19 }
 0xfcb   :  { %v4615_v21 = vpop.eup %4614  ;;  %4620 = vrcp.f32 %v2568_v16  ;;  %4180 = vmatprep.mubr.msk.bf16.mxu1 %vm4693_vm0, %v4692_v3 }
 0xfcc   :  { %v2649_v9 = vpack.c.bf16 %v2628_v13, %v2627_v20  ;;  %v2633_v28 = vmul.f32 %v4615_v21, %v6029_v24  ;;  %4622 = vrcp.f32 %v2571_v47 }
 0xfcd   :  { %v4617_v62 = vpop.eup %4616 }
 0xfce   :  { %v2577_v17 = vpop.xlane.xlu1 %2576  ;;  %v2586_v7 = vpop.xlane.xlu0 %2585  ;;  %v2634_v50 = vmul.f32 %v4617_v62, %v6047_v41  ;;  %4163 = vmatmul.mubr.msk.bf16.gmra.mrb[112].mxu0 %vm758_vm5, %v2649_v9 }
 0xfcf   :  { %4190 = vmatprep.mubr.msk.bf16.mxu0 %vm4693_vm0, %v4692_v3  ;;  %4624 = vrcp.f32 %v2586_v7  ;;  %v4619_v25 = vpop.eup %4618 }
 0xfd0   :  { %v2727_v51 = vpack.c.bf16 %v2634_v50, %v2633_v28  ;;  %v2635_v34 = vmul.f32 %v4619_v25, %v6039_v6 }
 0xfd2   :  { %v2595_v44 = vpop.xlane.xlu1 %2594  ;;  %v2574_v19 = vpop.xlane.xlu0 %2573  ;;  %4181 = vmatmul.mubr.msk.bf16.gmra.mrb[120].mxu1 %vm758_vm5, %v2727_v51 }
 0xfd3   :  { %4626 = vrcp.f32 %v2574_v19  ;;  %4208 = vmatprep.mubr.msk.bf16.mxu1 %vm4693_vm0, %v4692_v3 }
 0xfd4   :  { %4628 = vrcp.f32 %v2583_v61 }
 0xfd5   :  { %v4621_v24 = vpop.eup %4620  ;;  %4630 = vrcp.f32 %v2577_v17 }
 0xfd6   :  { %v2811_v41 = vpop.permute.xlu1 %2810  ;;  %v2592_v46 = vpop.xlane.xlu0 %2591  ;;  %v2636_v0 = vmul.f32 %v4621_v24, %v6062_v15 }
 0xfd7   :  { %4189 = vmatpush3.bf16.msra.mxu0 %v2811_v41  ;;  %4632 = vrcp.f32 %v2592_v46  ;;  %v4623_v27 = vpop.eup %4622 }
 0xfd8   :  { %4220 = vmatprep.subr.bf16.mxu0 %v4692_v3  ;;  %v2803_v11 = vpack.c.bf16 %v2636_v0, %v2635_v34  ;;  %v2637_v15 = vmul.f32 %v4623_v27, %v6055_v2  ;;  %v3625_v27 = vld [vmem:[%s6433_s5 + $0x30] sm:$0xff] }
 0xfd9   :  { %v4625_v36 = vpop.eup %4624 }
 0xfda   :  { %v2580_v35 = vpop.xlane.xlu0 %2579  ;;  %4191 = vmatmul.mubr.msk.bf16.vlgmr.msra.gmra.mrb[116].mxu0 %vm758_vm5, %v2803_v11  ;;  %v2642_v26 = vmul.f32 %v4625_v36, %v6071_v1  ;;  %v3626_v36 = vld [vmem:[%s6433_s5 + $0x38] sm:$0xff] }
 0xfdb   :  { %4634 = vrcp.f32 %v2580_v35  ;;  %4194 = vmatprep.mubr.msk.bf16.mxu0 %vm4693_vm0, %v4692_v3 }
 0xfdc   :  { %4636 = vrcp.f32 %v2589_v10 }
 0xfdd   :  { %v4627_v42 = vpop.eup %4626 }
 0xfde   :  { %v2598_v6 = vpop.xlane.xlu0 %2597  ;;  %v4629_v12 = vpop.eup %4628  ;;  %v2638_v55 = vmul.f32 %v4627_v42, %v6079_v57  ;;  %v3058_v42 = vpack.c.bf16 %v3626_v36, %v3625_v27 }
 0xfdf   :  { %v2641_v58 = vmul.f32 %v4629_v12, %v6053_v5  ;;  %v4631_v23 = vpop.eup %4630  ;;  %4638 = vrcp.f32 %v2598_v6 }
 0xfe0   :  { %v2804_v63 = vpack.c.bf16 %v2638_v55, %v2637_v15  ;;  %4640 = vrcp.f32 %v2595_v44  ;;  %v2639_v1 = vmul.f32 %v4631_v23, %v6073_v53 }
 0xfe1   :  { %v4633_v31 = vpop.eup %4632  ;;  %v2881_v32 = vpack.c.bf16 %v2642_v26, %v2641_v58 }
 0xfe2   :  { %v2889_v54 = vpop.permute.xlu0 %2888  ;;  %4195 = vmatmul.mubr.msk.bf16.gmra.mrb[120].mxu0 %vm758_vm5, %v2804_v63  ;;  %v2644_v59 = vmul.f32 %v4633_v31, %v6087_v60 }
 0xfe3   :  { %4207 = vmatpush3.bf16.msra.mxu1 %v2889_v54  ;;  %4198 = vmatprep.mubr.msk.bf16.mxu0 %vm4693_vm0, %v4692_v3 }
 0xfe4   :  { %4236 = vmatprep.subr.bf16.mxu1 %v4692_v3 }
 0xfe5   :  { %v4635_v2 = vpop.eup %4634 }
 0xfe6   :  { %4209 = vmatmul.mubr.msk.bf16.vlgmr.msra.gmra.mrb[124].mxu1 %vm758_vm5, %v2881_v32  ;;  %v2640_v5 = vmul.f32 %v4635_v2, %v6091_v18  ;;  %v4637_v57 = vpop.eup %4636 }
 0xfe7   :  { %4212 = vmatprep.mubr.msk.bf16.mxu1 %vm4693_vm0, %v4692_v3  ;;  %v2643_v49 = vmul.f32 %v4637_v57, %v6064_v56  ;;  %v3623_v56 = vld [vmem:[%s6433_s5 + $0x20] sm:$0xff] }
 0xfe8   :  { %v2805_v38 = vpack.c.bf16 %v2640_v5, %v2639_v1  ;;  %v3057_v37 = vpack.c.bf16 %v3624_v22, %v3623_v56 }
 0xfe9   :  { %v2882_v4 = vpack.c.bf16 %v2644_v59, %v2643_v49  ;;  %v4639_v47 = vpop.eup %4638 }
 0xfea   :  { %4199 = vmatmul.mubr.msk.bf16.gmra.mrb[124].mxu0 %vm758_vm5, %v2805_v38  ;;  %v4641_v53 = vpop.eup %4640  ;;  %v2646_v18 = vmul.f32 %v4639_v47, %v6095_v30 }
 0xfeb   :  { %4224 = vmatprep.mubr.msk.bf16.mxu0 %vm4693_vm0, %v4692_v3  ;;  %v2645_v61 = vmul.f32 %v4641_v53, %v6081_v29  ;;  %4221 = vmatpush3.bf16.msra.mxu0 %v3057_v37 }
 0xfec   :  { %4222 = vmatprep.subr.bf16.mxu0 %v4692_v3 }
 0xfed   :  { %v2883_v60 = vpack.c.bf16 %v2646_v18, %v2645_v61 }
 0xfee   :  { %4213 = vmatmul.mubr.msk.bf16.gmra.mrb[128].mxu1 %vm758_vm5, %v2882_v4 }
 0xfef   :  { %4216 = vmatprep.mubr.msk.bf16.mxu1 %vm4693_vm0, %v4692_v3  ;;  %4223 = vmatpush3.bf16.msra.mxu0 %v3058_v42 }
 0xff0   :  { %4252 = vmatprep.subr.bf16.mxu0 %v4692_v3 }
 0xff6   :  { %4217 = vmatmul.mubr.msk.bf16.gmra.mrb[132].mxu1 %vm758_vm5, %v2883_v60 }
 0xff7   :  { %4240 = vmatprep.mubr.msk.bf16.mxu1 %vm4693_vm0, %v4692_v3 }
0x1091   :  { %v6176_v14 = vpop.f32.mrb[104].mxu0 }
0x1092   :  { %v4156_v30 = vpop.f32.mrb[105].mxu0 }
0x1093   :  { %v6178_v40 = vpop.f32.mrb[106].mxu0 }
0x1094   :  { %v4157_v29 = vpop.f32.mrb[107].mxu0 }
0x1095   :  { %v2780_v52 = vpop.f32.mrb[112].mxu1 }
0x1096   :  { %v4174_v10 = vpop.f32.mrb[113].mxu1 }
0x1097   :  { %v2783_v16 = vpop.f32.mrb[114].mxu1 }
0x1098   :  { %v4357_v21 = vpack.i.bf16 %v2783_v16, %v2780_v52  ;;  %v4175_v20 = vpop.f32.mrb[115].mxu1 }
0x1099   :  { %v6181_v13 = vpop.f32.mrb[108].mxu0 }
0x109a   :  { %v4160_v62 = vpop.f32.mrb[109].mxu0  ;;  %4358 = vrot.lane.b32.xlu1 %v4357_v21, %s4706_s29 }
0x109b   :  { %v6184_v9 = vpop.f32.mrb[110].mxu0 }
0x109c   :  { %v4161_v17 = vpop.f32.mrb[111].mxu0 }
0x109d   :  { %v2788_v7 = vpop.f32.mrb[116].mxu1 }
0x109e   :  { %v4178_v28 = vpop.f32.mrb[117].mxu1 }
0x109f   :  { %v2791_v50 = vpop.f32.mrb[118].mxu1 }
0x10a0   :  { %v4372_v51 = vpack.i.bf16 %v2791_v50, %v2788_v7  ;;  %v4179_v44 = vpop.f32.mrb[119].mxu1 }
0x10a1   :  { %v6186_v19 = vpop.f32.mrb[112].mxu0 }
0x10a2   :  { %v4164_v25 = vpop.f32.mrb[113].mxu0 }
0x10a3   :  { %v6188_v24 = vpop.f32.mrb[114].mxu0 }
0x10a4   :  { %v4165_v41 = vpop.f32.mrb[115].mxu0 }
0x10a5   :  { %v2796_v46 = vpop.f32.mrb[120].mxu1 }
0x10a6   :  { %v4182_v34 = vpop.f32.mrb[121].mxu1 }
0x10a7   :  { %v2799_v0 = vpop.f32.mrb[122].mxu1 }
0x10a8   :  { %v4387_v11 = vpack.i.bf16 %v2799_v0, %v2796_v46  ;;  %v4183_v35 = vpop.f32.mrb[123].mxu1 }
0x10ad   :  { %v2858_v6 = vpop.f32.mrb[116].mxu0 }
0x10ae   :  { %v4192_v12 = vpop.f32.mrb[117].mxu0 }
0x10af   :  { %v2861_v15 = vpop.f32.mrb[118].mxu0 }
0x10b0   :  { %v4362_v55 = vpack.i.bf16 %v2861_v15, %v2858_v6  ;;  %v4193_v26 = vpop.f32.mrb[119].mxu0 }
0x10b2   :  { %4363 = vrot.lane.b32.xlu0 %v4362_v55, %s4707_s13 }
0x10b5   :  { %v2866_v63 = vpop.f32.mrb[120].mxu0 }
0x10b6   :  { %v4196_v58 = vpop.f32.mrb[121].mxu0  ;;  %4373 = vrot.lane.b32.xlu0 %v4372_v51, %s4706_s29 }
0x10b7   :  { %v2869_v54 = vpop.f32.mrb[122].mxu0 }
0x10b8   :  { %v4377_v23 = vpack.i.bf16 %v2869_v54, %v2866_v63  ;;  %v4197_v31 = vpop.f32.mrb[123].mxu0 }
0x10b9   :  { %v2936_v32 = vpop.f32.mrb[124].mxu1 }
0x10ba   :  { %v4210_v2 = vpop.f32.mrb[125].mxu1 }
0x10bb   :  { %v2939_v1 = vpop.f32.mrb[126].mxu1 }
0x10bc   :  { %v4367_v5 = vpack.i.bf16 %v2939_v1, %v2936_v32  ;;  %v4211_v57 = vpop.f32.mrb[127].mxu1 }
0x10bd   :  { %v2874_v38 = vpop.f32.mrb[124].mxu0 }
0x10be   :  { %4368 = vrot.lane.b32.xlu1 %v4367_v5, %s4708_s14  ;;  %v4200_v59 = vpop.f32.mrb[125].mxu0 }
0x10bf   :  { %v2877_v49 = vpop.f32.mrb[126].mxu0 }
0x10c0   :  { %v4392_v4 = vpack.i.bf16 %v2877_v49, %v2874_v38  ;;  %v4201_v47 = vpop.f32.mrb[127].mxu0 }
0x10c1   :  { %v2944_v53 = vpop.f32.mrb[128].mxu1 }
0x10c2   :  { %4378 = vrot.lane.b32.xlu1 %v4377_v23, %s4707_s13  ;;  %v4214_v18 = vpop.f32.mrb[129].mxu1 }
0x10c3   :  { %v2947_v61 = vpop.f32.mrb[130].mxu1 }
0x10c4   :  { %v4382_v60 = vpack.i.bf16 %v2947_v61, %v2944_v53  ;;  %v4215_v56 = vpop.f32.mrb[131].mxu1 }
0x10c6   :  { %4388 = vrot.lane.b32.xlu1 %v4387_v11, %s4706_s29  ;;  %4383 = vrot.lane.b32.xlu0 %v4382_v60, %s4708_s14 }
0x10c9   :  { %v2952_v22 = vpop.f32.mrb[132].mxu1 }
0x10ca   :  { %4393 = vrot.lane.b32.xlu0 %v4392_v4, %s4707_s13  ;;  %v4218_v37 = vpop.f32.mrb[133].mxu1 }
0x10cb   :  { %v2955_v30 = vpop.f32.mrb[134].mxu1 }
0x10cc   :  { %v4397_v29 = vpack.i.bf16 %v2955_v30, %v2952_v22  ;;  %v4219_v52 = vpop.f32.mrb[135].mxu1 }
0x10ce   :  { %4398 = vrot.lane.b32.xlu1 %v4397_v29, %s4708_s14 }
0x110c   :  { %v4359_v10 = vpop.permute.xlu1 %4358 }
0x110d   :  { %v4361_v21 = vunpack.i.h.bf16 %v4359_v10  ;;  %v4360_v20 = vunpack.i.l.bf16 %v4359_v10 }
0x110f   :  { %v3032_v28 = vsel %vm397_vm3, %v6178_v40, %v4361_v21  ;;  %v3031_v50 = vsel %vm397_vm3, %v6176_v14, %v4360_v20 }
0x1124   :  { %v4364_v16 = vpop.permute.xlu0 %4363 }
0x1125   :  { %v4366_v62 = vunpack.i.h.bf16 %v4364_v16  ;;  %v4365_v17 = vunpack.i.l.bf16 %v4364_v16 }
0x1127   :  { %v3037_v25 = vsel %vm1413_vm9, %v3031_v50, %v4365_v17  ;;  %v3038_v41 = vsel %vm1413_vm9, %v3032_v28, %v4366_v62 }
0x1128   :  { %v4374_v46 = vpop.permute.xlu0 %4373 }
0x1129   :  { %v4376_v27 = vunpack.i.h.bf16 %v4374_v46  ;;  %v4375_v36 = vunpack.i.l.bf16 %v4374_v46 }
0x112b   :  { %v3034_v6 = vsel %vm397_vm3, %v6184_v9, %v4376_v27  ;;  %v3033_v12 = vsel %vm397_vm3, %v6181_v13, %v4375_v36 }
0x1130   :  { %v4369_v7 = vpop.permute.xlu1 %4368 }
0x1131   :  { %v4371_v51 = vunpack.i.h.bf16 %v4369_v7  ;;  %v4370_v44 = vunpack.i.l.bf16 %v4369_v7 }
0x1133   :  { %v3044_v34 = vsel %vm1420_vm10, %v3038_v41, %v4371_v51  ;;  %v3043_v0 = vsel %vm1420_vm10, %v3037_v25, %v4370_v44 }
0x1134   :  { %v3054_v11 = vpack.c.bf16 %v3044_v34, %v3043_v0  ;;  %v4379_v35 = vpop.permute.xlu1 %4378 }
0x1135   :  { %v4381_v42 = vunpack.i.h.bf16 %v4379_v35  ;;  %v4380_v40 = vunpack.i.l.bf16 %v4379_v35 }
0x1136   :  { %4225 = vmatmul.mubr.msk.bf16.vlgmr.msra.gmra.mrb[128].mxu0 %vm205_vm2, %v3054_v11 }
0x1137   :  { %4228 = vmatprep.mubr.msk.bf16.mxu0 %vm4693_vm0, %v4692_v3  ;;  %v3040_v26 = vsel %vm1413_vm9, %v3034_v6, %v4381_v42  ;;  %v3039_v63 = vsel %vm1413_vm9, %v3033_v12, %v4380_v40 }
0x1138   :  { %v4384_v14 = vpop.permute.xlu0 %4383  ;;  %v4389_v58 = vpop.permute.xlu1 %4388 }
0x1139   :  { %v4386_v15 = vunpack.i.h.bf16 %v4384_v14  ;;  %v4385_v55 = vunpack.i.l.bf16 %v4384_v14  ;;  %v4391_v2 = vunpack.i.h.bf16 %v4389_v58  ;;  %v4390_v1 = vunpack.i.l.bf16 %v4389_v58 }
0x113b   :  { %v3046_v54 = vsel %vm1420_vm10, %v3040_v26, %v4386_v15  ;;  %v3045_v23 = vsel %vm1420_vm10, %v3039_v63, %v4385_v55  ;;  %v3036_v57 = vsel %vm397_vm3, %v6188_v24, %v4391_v2  ;;  %v3035_v38 = vsel %vm397_vm3, %v6186_v19, %v4390_v1  ;;  %v3630_v19 = vld [vmem:[%s6431_s3 + $0xb] ss:$0 sm:$0xff] }
0x113c   :  { %v3055_v31 = vpack.c.bf16 %v3046_v54, %v3045_v23  ;;  %v4394_v32 = vpop.permute.xlu0 %4393 }
0x113d   :  { %v4396_v5 = vunpack.i.h.bf16 %v4394_v32  ;;  %v4395_v9 = vunpack.i.l.bf16 %v4394_v32 }
0x113e   :  { %4229 = vmatmul.mubr.msk.bf16.gmra.mrb[132].mxu0 %vm205_vm2, %v3055_v31 }
0x113f   :  { %4232 = vmatprep.mubr.msk.bf16.mxu0 %vm4693_vm0, %v4692_v3  ;;  %v3042_v4 = vsel %vm1413_vm9, %v3036_v57, %v4396_v5  ;;  %v3041_v47 = vsel %vm1413_vm9, %v3035_v38, %v4395_v9 }
0x1140   :  { %v4399_v13 = vpop.permute.xlu1 %4398 }
0x1141   :  { %v4401_v59 = vunpack.i.h.bf16 %v4399_v13  ;;  %v4400_v49 = vunpack.i.l.bf16 %v4399_v13 }
0x1143   :  { %v3048_v53 = vsel %vm1420_vm10, %v3042_v4, %v4401_v59  ;;  %v3047_v18 = vsel %vm1420_vm10, %v3041_v47, %v4400_v49 }
0x1144   :  { %v3056_v61 = vpack.c.bf16 %v3048_v53, %v3047_v18  ;;  %v3633_v18 = vld [vmem:[%s6434_s6 + $0x20] sm:$0xff] }
0x1146   :  { %4233 = vmatmul.mubr.msk.bf16.gmra.mrb[136].mxu0 %vm205_vm2, %v3056_v61  ;;  %v3634_v61 = vld [vmem:[%s6434_s6 + $0x28] sm:$0xff] }
0x1147   :  { %4268 = vmatprep.mubr.msk.bf16.mxu0 %vm4693_vm0, %v4692_v3 }
0x1209   :  { %v3102_v24 = vpop.f32.mrb[128].mxu0 }
0x120a   :  { %v3125_v60 = vadd.f32 %v3102_v24, %v5627_v45  ;;  %v4226_v56 = vpop.f32.mrb[129].mxu0  ;;  %v3250_v24 = vpack.c.bf16 %v3634_v61, %v3633_v18  ;;  %v3647_v61 = vld [vmem:[%s6435_s7 + $0xb0] sm:$0xff] }
0x120b   :  { %v3105_v22 = vpop.f32.mrb[130].mxu0 }
0x120c   :  { %v3136_v37 = vadd.f32 %v3630_v19, %v3125_v60  ;;  %v3126_v30 = vadd.f32 %v3105_v22, %v5630_v33  ;;  %v4227_v29 = vpop.f32.mrb[131].mxu0  ;;  %4237 = vmatpush3.bf16.msra.mxu1 %v3250_v24  ;;  %v3636_v60 = vld [vmem:[%s6434_s6 + $0x38] sm:$0xff]  ;;  %v3641_v22 = vld [vmem:[%s6435_s7 + $0x80] sm:$0xff] }
0x120d   :  { %4238 = vmatprep.subr.bf16.mxu1 %v4692_v3  ;;  %v3648_v24 = vld [vmem:[%s6435_s7 + $0xb8] sm:$0xff] }
0x120e   :  { %v3137_v52 = vadd.f32 %v3630_v19, %v3126_v30  ;;  %v3144_v10 = vsel %vm205_vm2, %v3136_v37, 0.0  ;;  %v3643_v30 = vld [vmem:[%s6435_s7 + $0x90] sm:$0xff] }
0x120f   :  { %3145 = vadd.xlane.f32.xlu0 %v3144_v10 }
0x1210   :  { %v3147_v16 = vsel %vm205_vm2, %v3137_v52, 0.0 }
0x1211   :  { %v3110_v21 = vpop.f32.mrb[132].mxu0  ;;  %3148 = vadd.xlane.f32.xlu1 %v3147_v16 }
0x1212   :  { %v3127_v20 = vadd.f32 %v3110_v21, %v5637_v43  ;;  %v4230_v62 = vpop.f32.mrb[133].mxu0 }
0x1213   :  { %v3113_v17 = vpop.f32.mrb[134].mxu0 }
0x1214   :  { %v6246_v7 = vadd.f32 %v3630_v19, %v3127_v20  ;;  %v3128_v45 = vadd.f32 %v3113_v17, %v5640_v39  ;;  %v4231_v28 = vpop.f32.mrb[135].mxu0 }
0x1216   :  { %v3139_v50 = vadd.f32 %v3630_v19, %v3128_v45  ;;  %v3150_v33 = vsel %vm205_vm2, %v6246_v7, 0.0 }
0x1217   :  { %3151 = vadd.xlane.f32.xlu0 %v3150_v33 }
0x1218   :  { %v3153_v41 = vsel %vm205_vm2, %v3139_v50, 0.0 }
0x1219   :  { %v3118_v51 = vpop.f32.mrb[136].mxu0 }
0x121a   :  { %v3129_v44 = vadd.f32 %v3118_v51, %v5647_v8  ;;  %v4234_v25 = vpop.f32.mrb[137].mxu0 }
0x121b   :  { %3154 = vadd.xlane.f32.xlu0 %v3153_v41  ;;  %v3121_v43 = vpop.f32.mrb[138].mxu0  ;;  %v3631_v41 = vld [vmem:[%s6431_s3 + $0xc] ss:$0 sm:$0xff] }
0x121c   :  { %v3140_v46 = vadd.f32 %v3630_v19, %v3129_v44  ;;  %v3130_v34 = vadd.f32 %v3121_v43, %v5650_v48  ;;  %v4235_v0 = vpop.f32.mrb[139].mxu0 }
0x121e   :  { %v6254_v11 = vadd.f32 %v3630_v19, %v3130_v34  ;;  %v3156_v39 = vsel %vm205_vm2, %v3140_v46, 0.0  ;;  %v3635_v19 = vld [vmem:[%s6434_s6 + $0x30] sm:$0xff] }
0x121f   :  { %3157 = vadd.xlane.f32.xlu0 %v3156_v39  ;;  %v3251_v56 = vpack.c.bf16 %v3636_v60, %v3635_v19  ;;  %v3376_v19 = vpack.c.bf16 %v3648_v24, %v3647_v61  ;;  %v3649_v60 = vld [vmem:[%s6435_s7 + $0xc0] sm:$0xff] }
0x1220   :  { %v3159_v35 = vsel %vm205_vm2, %v6254_v11, 0.0 }
0x1221   :  { %3160 = vadd.xlane.f32.xlu1 %v3159_v35  ;;  %4239 = vmatpush3.bf16.msra.mxu1 %v3251_v56  ;;  %v3650_v56 = vld [vmem:[%s6435_s7 + $0xc8] sm:$0xff] }
0x1222   :  { %4280 = vmatprep.subr.bf16.mxu1 %v4692_v3 }
0x129c   :  { %v3146_v27 = vpop.xlane.xlu0 %3145 }
0x129d   :  { %v3162_v8 = vmul.f32 0.03125, %v3146_v27 }
0x129e   :  { %v3149_v36 = vpop.xlane.xlu1 %3148 }
0x129f   :  { %v6259_v42 = vsub.f32 %v3136_v37, %v3162_v8  ;;  %v3163_v40 = vmul.f32 0.03125, %v3149_v36  ;;  %v3642_v37 = vld [vmem:[%s6435_s7 + $0x88] sm:$0xff] }
0x12a0   :  { %v3373_v29 = vpack.c.bf16 %v3642_v37, %v3641_v22  ;;  %v3632_v36 = vld [vmem:[%s6431_s3 + $0xd] ss:$0 sm:$0xff]  ;;  %v3377_v22 = vpack.c.bf16 %v3650_v56, %v3649_v60  ;;  %v3651_v37 = vld [vmem:[%s6435_s7 + $0xd0] sm:$0xff] }
0x12a1   :  { %v6261_v14 = vsub.f32 %v3137_v52, %v3163_v40  ;;  %v3174_v48 = vmul.f32 %v6259_v42, %v6259_v42  ;;  %v3644_v52 = vld [vmem:[%s6435_s7 + $0x98] sm:$0xff] }
0x12a2   :  { %4253 = vmatpush3.bf16.msra.mxu0 %v3373_v29  ;;  %v3374_v10 = vpack.c.bf16 %v3644_v52, %v3643_v30  ;;  %v3652_v30 = vld [vmem:[%s6435_s7 + $0xd8] sm:$0xff]  ;;  %v3653_v52 = vld [vmem:[%s6435_s7 + $0xe0] sm:$0xff] }
0x12a3   :  { %v3180_v6 = vsel %vm205_vm2, %v3174_v48, 0.0  ;;  %v3175_v12 = vmul.f32 %v6261_v14, %v6261_v14  ;;  %4254 = vmatprep.subr.bf16.mxu0 %v4692_v3  ;;  %v3378_v29 = vpack.c.bf16 %v3652_v30, %v3651_v37 }
0x12a4   :  { %v3152_v15 = vpop.xlane.xlu0 %3151  ;;  %3181 = vadd.xlane.f32.xlu0 %v3180_v6 }
0x12a5   :  { %v3164_v55 = vmul.f32 0.03125, %v3152_v15  ;;  %v3183_v26 = vsel %vm205_vm2, %v3175_v12, 0.0 }
0x12a6   :  { %3184 = vadd.xlane.f32.xlu1 %v3183_v26  ;;  %4255 = vmatpush3.bf16.msra.mxu0 %v3374_v10  ;;  %v3654_v10 = vld [vmem:[%s6435_s7 + $0xe8] sm:$0xff] }
0x12a7   :  { %v6270_v63 = vsub.f32 %v6246_v7, %v3164_v55  ;;  %4256 = vmatprep.subr.bf16.mxu0 %v4692_v3 }
0x12a8   :  { %v3155_v58 = vpop.xlane.xlu0 %3154 }
0x12a9   :  { %v3165_v54 = vmul.f32 0.03125, %v3155_v58  ;;  %v3176_v23 = vmul.f32 %v6270_v63, %v6270_v63 }
0x12ab   :  { %v6274_v31 = vsub.f32 %v3139_v50, %v3165_v54  ;;  %v3186_v32 = vsel %vm205_vm2, %v3176_v23, 0.0 }
0x12ac   :  { %3187 = vadd.xlane.f32.xlu0 %v3186_v32  ;;  %v3158_v2 = vpop.xlane.xlu0 %3157 }
0x12ad   :  { %v3166_v1 = vmul.f32 0.03125, %v3158_v2  ;;  %v3177_v5 = vmul.f32 %v6274_v31, %v6274_v31 }
0x12ae   :  { %v3161_v9 = vpop.xlane.xlu1 %3160 }
0x12af   :  { %v6279_v13 = vsub.f32 %v3140_v46, %v3166_v1  ;;  %v3167_v57 = vmul.f32 0.03125, %v3161_v9  ;;  %v3189_v38 = vsel %vm205_vm2, %v3177_v5, 0.0 }
0x12b0   :  { %3190 = vadd.xlane.f32.xlu1 %v3189_v38 }
0x12b1   :  { %v6283_v59 = vsub.f32 %v6254_v11, %v3167_v57  ;;  %v3178_v49 = vmul.f32 %v6279_v13, %v6279_v13 }
0x12b3   :  { %v3192_v4 = vsel %vm205_vm2, %v3178_v49, 0.0  ;;  %v3179_v47 = vmul.f32 %v6283_v59, %v6283_v59 }
0x12b4   :  { %3193 = vadd.xlane.f32.xlu0 %v3192_v4 }
0x12b5   :  { %v3195_v53 = vsel %vm205_vm2, %v3179_v47, 0.0 }
0x12b6   :  { %3196 = vadd.xlane.f32.xlu1 %v3195_v53 }
0x1331   :  { %v3182_v16 = vpop.xlane.xlu0 %3181 }
0x1332   :  { %v3198_v21 = vmul.f32 0.03125, %v3182_v16  ;;  %v3379_v16 = vpack.c.bf16 %v3654_v10, %v3653_v52 }
0x1333   :  { %v3185_v20 = vpop.xlane.xlu1 %3184 }
0x1334   :  { %v3204_v62 = vadd.f32 1e-05, %v3198_v21  ;;  %v3199_v17 = vmul.f32 0.03125, %v3185_v20  ;;  %v3655_v21 = vld [vmem:[%s6435_s7 + $0xf0] sm:$0xff]  ;;  %v3656_v20 = vld [vmem:[%s6435_s7 + $0xf8] sm:$0xff] }
0x1336   :  { %4642 = vrsqrt.f32 %v3204_v62  ;;  %v3205_v45 = vadd.f32 1e-05, %v3199_v17  ;;  %v3380_v62 = vpack.c.bf16 %v3656_v20, %v3655_v21  ;;  %v3637_v17 = vld [vmem:[%s6431_s3 + $0xe] ss:$0 sm:$0xff] }
0x1338   :  { %4644 = vrsqrt.f32 %v3205_v45 }
0x1339   :  { %v3188_v28 = vpop.xlane.xlu0 %3187 }
0x133a   :  { %v3200_v50 = vmul.f32 0.03125, %v3188_v28 }
0x133c   :  { %v3206_v33 = vadd.f32 1e-05, %v3200_v50 }
0x133d   :  { %v3191_v51 = vpop.xlane.xlu1 %3190 }
0x133e   :  { %4646 = vrsqrt.f32 %v3206_v33  ;;  %v3201_v44 = vmul.f32 0.03125, %v3191_v51 }
0x1340   :  { %v4643_v25 = vpop.eup %4642  ;;  %v3207_v43 = vadd.f32 1e-05, %v3201_v44 }
0x1341   :  { %v3216_v46 = vmul.f32 %v4643_v25, %v6259_v42  ;;  %v3194_v34 = vpop.xlane.xlu0 %3193 }
0x1342   :  { %v4645_v0 = vpop.eup %4644  ;;  %4648 = vrsqrt.f32 %v3207_v43  ;;  %v3202_v39 = vmul.f32 0.03125, %v3194_v34 }
0x1343   :  { %v3226_v35 = vmul.f32 %v3631_v41, %v3216_v46  ;;  %v3217_v27 = vmul.f32 %v4645_v0, %v6261_v14  ;;  %v3197_v8 = vpop.xlane.xlu1 %3196 }
0x1344   :  { %v3208_v40 = vadd.f32 1e-05, %v3202_v39  ;;  %v3203_v48 = vmul.f32 0.03125, %v3197_v8 }
0x1345   :  { %v3227_v6 = vmul.f32 %v3631_v41, %v3217_v27  ;;  %v3236_v15 = vadd.f32 %v3632_v36, %v3226_v35 }
0x1346   :  { %4650 = vrsqrt.f32 %v3208_v40  ;;  %v3209_v12 = vadd.f32 1e-05, %v3203_v48 }
0x1347   :  { %v3237_v55 = vadd.f32 %v3632_v36, %v3227_v6 }
0x1348   :  { %v4647_v42 = vpop.eup %4646  ;;  %4652 = vrsqrt.f32 %v3209_v12 }
0x1349   :  { %v3218_v26 = vmul.f32 %v4647_v42, %v6270_v63  ;;  %v3247_v58 = vpack.c.bf16 %v3237_v55, %v3236_v15 }
0x134b   :  { %4241 = vmatmul.mubr.msk.bf16.vlgmr.msra.gmra.mrb[136].mxu1 %vm205_vm2, %v3247_v58  ;;  %v3228_v23 = vmul.f32 %v3631_v41, %v3218_v26 }
0x134c   :  { %v4649_v14 = vpop.eup %4648  ;;  %4244 = vmatprep.mubr.msk.bf16.mxu1 %vm4693_vm0, %v4692_v3 }
0x134d   :  { %v3219_v54 = vmul.f32 %v4649_v14, %v6274_v31  ;;  %v3238_v5 = vadd.f32 %v3632_v36, %v3228_v23 }
0x134f   :  { %v3229_v32 = vmul.f32 %v3631_v41, %v3219_v54 }
0x1350   :  { %v4651_v2 = vpop.eup %4650 }
0x1351   :  { %v3220_v1 = vmul.f32 %v4651_v2, %v6279_v13  ;;  %v3239_v9 = vadd.f32 %v3632_v36, %v3229_v32  ;;  %v3645_v13 = vld [vmem:[%s6435_s7 + $0xa0] sm:$0xff] }
0x1352   :  { %v4653_v57 = vpop.eup %4652 }
0x1353   :  { %v3221_v38 = vmul.f32 %v4653_v57, %v6283_v59  ;;  %v3248_v63 = vpack.c.bf16 %v3239_v9, %v3238_v5  ;;  %v3230_v49 = vmul.f32 %v3631_v41, %v3220_v1  ;;  %v3646_v59 = vld [vmem:[%s6435_s7 + $0xa8] sm:$0xff] }
0x1354   :  { %v3375_v18 = vpack.c.bf16 %v3646_v59, %v3645_v13 }
0x1355   :  { %4245 = vmatmul.mubr.msk.bf16.gmra.mrb[140].mxu1 %vm205_vm2, %v3248_v63  ;;  %v3231_v4 = vmul.f32 %v3631_v41, %v3221_v38  ;;  %v3240_v31 = vadd.f32 %v3632_v36, %v3230_v49 }
0x1356   :  { %4248 = vmatprep.mubr.msk.bf16.mxu1 %vm4693_vm0, %v4692_v3  ;;  %4257 = vmatpush3.bf16.msra.mxu0 %v3375_v18 }
0x1357   :  { %v3241_v47 = vadd.f32 %v3632_v36, %v3231_v4  ;;  %4258 = vmatprep.subr.bf16.mxu0 %v4692_v3 }
0x1359   :  { %v3249_v53 = vpack.c.bf16 %v3241_v47, %v3240_v31 }
0x135a   :  { %4259 = vmatpush3.bf16.msra.mxu0 %v3376_v19 }
0x135b   :  { %4260 = vmatprep.subr.bf16.mxu0 %v4692_v3 }
0x135d   :  { %4249 = vmatmul.mubr.msk.bf16.gmra.mrb[144].mxu1 %vm205_vm2, %v3249_v53 }
0x135e   :  { %4284 = vmatprep.mubr.msk.bf16.mxu1 %vm4693_vm0, %v4692_v3  ;;  %4261 = vmatpush3.bf16.msra.mxu0 %v3377_v22 }
0x135f   :  { %4262 = vmatprep.subr.bf16.mxu0 %v4692_v3 }
0x1362   :  { %4263 = vmatpush3.bf16.msra.mxu0 %v3378_v29 }
0x1363   :  { %4264 = vmatprep.subr.bf16.mxu0 %v4692_v3 }
0x1366   :  { %4265 = vmatpush3.bf16.msra.mxu0 %v3379_v16 }
0x1367   :  { %4266 = vmatprep.subr.bf16.mxu0 %v4692_v3 }
0x136a   :  { %4267 = vmatpush3.bf16.msra.mxu0 %v3380_v62 }
0x141e   :  { %v3300_v45 = vpop.f32.mrb[136].mxu1 }
0x141f   :  { %v3301_v28 = vadd.f32 %v3637_v17, %v3300_v45  ;;  %v4242_v50 = vpop.f32.mrb[137].mxu1 }
0x1420   :  { %v3303_v33 = vpop.f32.mrb[138].mxu1 }
0x1421   :  { %v3329_v51 = vmul.f32 0.70710677, %v3301_v28  ;;  %v3304_v44 = vadd.f32 %v3637_v17, %v3303_v33  ;;  %v4243_v25 = vpop.f32.mrb[139].mxu1  ;;  %v3323_v6 = vmul.f32 0.5, %v3301_v28 }
0x1423   :  { %4654 = verf.f32 %v3329_v51  ;;  %v3330_v41 = vmul.f32 0.70710677, %v3304_v44  ;;  %v3324_v12 = vmul.f32 0.5, %v3304_v44  ;;  %v3657_v51 = vld [vmem:[%s6431_s3 + $0xf] ss:$0 sm:$0xff] }
0x1425   :  { %4656 = verf.f32 %v3330_v41 }
0x1428   :  { %v3308_v43 = vpop.f32.mrb[140].mxu1 }
0x1429   :  { %v3309_v46 = vadd.f32 %v3637_v17, %v3308_v43  ;;  %v4246_v34 = vpop.f32.mrb[141].mxu1 }
0x142a   :  { %v3311_v0 = vpop.f32.mrb[142].mxu1 }
0x142b   :  { %v3331_v39 = vmul.f32 0.70710677, %v3309_v46  ;;  %v3312_v35 = vadd.f32 %v3637_v17, %v3311_v0  ;;  %v4247_v27 = vpop.f32.mrb[143].mxu1  ;;  %v3325_v63 = vmul.f32 0.5, %v3309_v46 }
0x142c   :  { %v3475_v27 = vld [vmem:[%s6436_s8 + $0x8] sm:$0xff] }
0x142d   :  { %v4655_v8 = vpop.eup %4654  ;;  %4658 = verf.f32 %v3331_v39  ;;  %v3332_v36 = vmul.f32 0.70710677, %v3312_v35  ;;  %v3326_v49 = vmul.f32 0.5, %v3312_v35 }
0x142e   :  { %v3341_v40 = vadd.f32 1.0, %v4655_v8 }
0x142f   :  { %v4657_v48 = vpop.eup %4656  ;;  %4660 = verf.f32 %v3332_v36  ;;  %v3476_v36 = vld [vmem:[%s6436_s8 + $0x10] sm:$0xff] }
0x1430   :  { %v3342_v15 = vadd.f32 1.0, %v4657_v48  ;;  %v3316_v55 = vpop.f32.mrb[144].mxu1  ;;  %v3347_v58 = vmul.f32 %v3341_v40, %v3323_v6  ;;  %v3477_v40 = vld [vmem:[%s6436_s8 + $0x18] sm:$0xff] }
0x1431   :  { %v3317_v42 = vadd.f32 %v3637_v17, %v3316_v55  ;;  %v4250_v26 = vpop.f32.mrb[145].mxu1  ;;  %v3480_v48 = vpack.c.bf16 %v3477_v40, %v3476_v36 }
0x1432   :  { %v3348_v14 = vmul.f32 %v3342_v15, %v3324_v12  ;;  %v3319_v54 = vpop.f32.mrb[146].mxu1  ;;  %v3659_v26 = vld [vmem:[%s6431_s3 + $0x11] ss:$0 sm:$0xff] }
0x1433   :  { %v3333_v23 = vmul.f32 0.70710677, %v3317_v42  ;;  %v3320_v32 = vadd.f32 %v3637_v17, %v3319_v54  ;;  %v4251_v2 = vpop.f32.mrb[147].mxu1  ;;  %v3327_v61 = vmul.f32 0.5, %v3317_v42  ;;  %v3658_v42 = vld [vmem:[%s6431_s3 + $0x10] ss:$0 sm:$0xff] }
0x1434   :  { %v3370_v1 = vpack.c.bf16 %v3348_v14, %v3347_v58 }
0x1435   :  { %4662 = verf.f32 %v3333_v23  ;;  %v3334_v5 = vmul.f32 0.70710677, %v3320_v32  ;;  %v3328_v24 = vmul.f32 0.5, %v3320_v32  ;;  %v3660_v23 = vld [vmem:[%s6431_s3 + $0x12] ss:$0 sm:$0xff] }
0x1436   :  { %4269 = vmatmul.mubr.bf16.vlgmr.msra.gmra.mrb[140].mxu0 %v3370_v1 }
0x1437   :  { %v4659_v9 = vpop.eup %4658  ;;  %4664 = verf.f32 %v3334_v5  ;;  %4272 = vmatprep.mubr.msk.bf16.mxu0 %vm4693_vm0, %v4692_v3 }
0x1438   :  { %v3343_v57 = vadd.f32 1.0, %v4659_v9 }
0x1439   :  { %v4661_v38 = vpop.eup %4660 }
0x143a   :  { %v3344_v4 = vadd.f32 1.0, %v4661_v38  ;;  %v3349_v47 = vmul.f32 %v3343_v57, %v3325_v63 }
0x143c   :  { %v3350_v31 = vmul.f32 %v3344_v4, %v3326_v49 }
0x143e   :  { %v3371_v53 = vpack.c.bf16 %v3350_v31, %v3349_v47 }
0x143f   :  { %v4663_v13 = vpop.eup %4662 }
0x1440   :  { %v3345_v59 = vadd.f32 1.0, %v4663_v13  ;;  %4273 = vmatmul.mubr.bf16.gmra.mrb[144].mxu0 %v3371_v53 }
0x1441   :  { %v4665_v18 = vpop.eup %4664  ;;  %4276 = vmatprep.mubr.msk.bf16.mxu0 %vm4693_vm0, %v4692_v3 }
0x1442   :  { %v3346_v19 = vadd.f32 1.0, %v4665_v18  ;;  %v3351_v60 = vmul.f32 %v3345_v59, %v3327_v61 }
0x1444   :  { %v3352_v56 = vmul.f32 %v3346_v19, %v3328_v24 }
0x1446   :  { %v3372_v22 = vpack.c.bf16 %v3352_v56, %v3351_v60 }
0x1448   :  { %4277 = vmatmul.mubr.bf16.gmra.mrb[148].mxu0 %v3372_v22 }
0x1509   :  { %v3415_v37 = vpop.f32.mrb[140].mxu0 }
0x150a   :  { %v4270_v30 = vpop.f32.mrb[141].mxu0 }
0x150b   :  { %v3417_v29 = vpop.f32.mrb[142].mxu0 }
0x150c   :  { %v4271_v52 = vpop.f32.mrb[143].mxu0 }
0x1513   :  { %v3421_v10 = vpop.f32.mrb[144].mxu0 }
0x1514   :  { %v4274_v16 = vpop.f32.mrb[145].mxu0  ;;  %v3434_v28 = vadd.f32 %v3421_v10, %v6246_v7 }
0x1515   :  { %v3424_v21 = vpop.f32.mrb[146].mxu0 }
0x1516   :  { %v4275_v20 = vpop.f32.mrb[147].mxu0  ;;  %v3441_v25 = vadd.f32 %v3657_v51, %v3434_v28 }
0x151b   :  { %v3428_v62 = vpop.f32.mrb[148].mxu0 }
0x151c   :  { %v4278_v17 = vpop.f32.mrb[149].mxu0 }
0x151d   :  { %v3430_v45 = vpop.f32.mrb[150].mxu0 }
0x151e   :  { %v3435_v50 = vadd.f32 %v3430_v45, %v6254_v11  ;;  %v4279_v33 = vpop.f32.mrb[151].mxu0  ;;  %v3474_v11 = vld [vmem:[%s6436_s8] sm:$0xff] }
0x151f   :  { %v3479_v8 = vpack.c.bf16 %v3475_v27, %v3474_v11 }
0x1520   :  { %v3442_v44 = vadd.f32 %v3657_v51, %v3435_v50 }
0x1521   :  { %4281 = vmatpush3.bf16.msra.mxu1 %v3479_v8 }
0x1522   :  { %v3444_v41 = vrot.slane %v3442_v44, 7  ;;  %4282 = vmatprep.subr.bf16.mxu1 %v4692_v3 }
0x1524   :  { %v3447_v43 = vsel %vm3446_vm11, %v3441_v25, %v3444_v41 }
0x1525   :  { %v3451_v46 = vsel %vm3450_vm12, %v3447_v43, 0.0  ;;  %4283 = vmatpush3.bf16.msra.mxu1 %v3480_v48 }
0x1526   :  { %3452 = vadd.xlane.f32.xlu0 %v3451_v46 }
0x15b3   :  { %v3453_v34 = vpop.xlane.xlu0 %3452 }
0x15b4   :  { %v3454_v0 = vmul.f32 0.03125, %v3453_v34 }
0x15b6   :  { %v3455_v39 = vsub.f32 %v3447_v43, %v3454_v0 }
0x15b8   :  { %v3456_v35 = vmul.f32 %v3455_v39, %v3455_v39 }
0x15ba   :  { %v3457_v7 = vsel %vm3450_vm12, %v3456_v35, 0.0 }
0x15bb   :  { %3458 = vadd.xlane.f32.xlu1 %v3457_v7 }
0x1648   :  { %v3459_v6 = vpop.xlane.xlu1 %3458 }
0x1649   :  { %v3460_v12 = vmul.f32 0.03125, %v3459_v6 }
0x164b   :  { %v3461_v15 = vadd.f32 1e-05, %v3460_v12 }
0x164d   :  { %4666 = vrsqrt.f32 %v3461_v15 }
0x1657   :  { %v4667_v55 = vpop.eup %4666 }
0x1658   :  { %v3463_v3 = vmul.f32 %v4667_v55, %v3455_v39 }
0x165a   :  { %v3468_v58 = vmul.f32 %v3658_v42, %v3463_v3 }
0x165c   :  { %v3473_v14 = vadd.f32 %v3659_v26, %v3468_v58 }
0x165e   :  { %v3478_v54 = vpack.c.bf16 %v3473_v14, %v3473_v14 }
0x1660   :  { %4285 = vmatmul.mubr.msk.bf16.vlgmr.msra.gmra.mrb[148].mxu1 %vm205_vm2, %v3478_v54 }
0x1733   :  { %v3523_v32 = vpop.f32.mrb[148].mxu1 }
0x1734   :  { %v3524_v2 = vadd.f32 %v3660_v23, %v3523_v32  ;;  %v4286_v1 = vpop.f32.mrb[149].mxu1 }
0x1735   :  { %v3526_v5 = vpop.f32.mrb[150].mxu1 }
0x1736   :  { %v4287_v9 = vpop.f32.mrb[151].mxu1  ;;  %3530 = vst.msk [vmem:[#allocation2] sm:$0x3] %vm3529_vm13, %v3524_v2 }
0x1737   :  { %4679 = shalt.err (!%p4676_p4)
}
0x1738   :  { %s4680_s3 = scalar_lea.hbm %s6437_s9, 32 }
0x1739   :  { %p4681_p5 = scmp.ne.s32.totalorder %s6437_s9, %s4680_s3  ;;  %p4684_p6 = scmp.lt.u32.totalorder %s4680_s3, %s6437_s9 }
0x173b   :  { %p4686_p7 = pnand %p4684_p6, %p4681_p5 }
0x173d   :  { %4689 = shalt.err (!%p4686_p7)
}
0x173e   :  { %3540 = dma.vmem_to_hbm [thread:$0]  %s3538_s2, 32, %s6437_s9, [#allocation3]  }
0x173f   :  { %4690 = dma.done.wait [#allocation3], 32  }
0x1740   :  { %4691 = vsyncadd [#allocation3], 4294967264 }
0x1741   :  { %3544 = vsyncpa [#allocation3], 1 }

</bundles_post_ra>
